<compile_context>
chip_gen: v7x
topology: tpu7x:2x2x1
jax: 0.10.0
libtpu: 0.0.40
codegen_flags: <defaults>
</compile_context>

<pallas_src>
import functools
import math

import numpy as np
import jax
import jax.numpy as jnp
from jax.experimental import pallas as pl
from jax.experimental.pallas import tpu as pltpu


# ----------------------------------------------------------------------------
# Deterministic parameter init (JAX re-implementation of the PyTorch helpers)
# ----------------------------------------------------------------------------
def _fan_in(shape):
    rfs = int(np.prod(shape[2:])) if len(shape) > 2 else 1
    return shape[1] * rfs


def kaiming_normal_residual_conv(key, shape, coeff=2.0, fan_expansion=1.0):
    fan = _fan_in(shape)
    std = math.sqrt(coeff / (fan * fan_expansion))
    w = jax.random.normal(key, shape, dtype=jnp.float32) * std
    w = w / jnp.std(w, ddof=1)          # torch .std() is unbiased
    w = w * std
    w = w - jnp.mean(w)
    return w


def xavier_normal_residual_conv(key, shape, fan_expansion=1.0):
    fan = _fan_in(shape)
    std = math.sqrt(1.0 / (fan * fan_expansion))
    w = jax.random.normal(key, shape, dtype=jnp.float32) * std
    w = w / jnp.std(w, ddof=1)
    w = w * std
    w = w - jnp.mean(w)
    return w


# ----------------------------------------------------------------------------
# Pallas kernel: whole BasicBlock forward for one image per grid step.
# ----------------------------------------------------------------------------
_TRANS_B = (((1,), (1,)), ((), ()))      # contract the last dim of both operands


def _basic_block_kernel(x_ref, w1_ref, w2t_ref, o_ref, *, H, W):
    HW = H * W
    Cin = x_ref.shape[3]
    P = o_ref.shape[1]

    x = x_ref[0]                                           # (H, W, Cin)

    def pad_rep(a):
        # ReplicationPad2d(1) with whole-plane concats (no per-row work).
        a = jnp.concatenate([a[:, :1], a, a[:, -1:]], axis=1)   # (h, W+2, c)
        return jnp.concatenate([a[:1], a, a[-1:]], axis=0)      # (h+2, W+2, c)

    def tap_slabs(ap, c):
        # ap: (H+2, W+2, c) -> 9 slabs of (HW, c), taps in (ky, kx) order.
        # Only the kx=1,2 column slabs are unaligned sublane slices; they are
        # built once and reused across ky (leading-dim slices are free).
        cols = [ap[:, kx:kx + W, :] for kx in range(3)]
        return [cols[kx][ky:ky + H].reshape(HW, c)
                for ky in range(3) for kx in range(3)]

    # ---- conv1(pad(relu(x))) + relu: one (HW, 9*Cin) x (9*Cin, P) MXU dot ----
    patch1 = jnp.concatenate(tap_slabs(pad_rep(jnp.maximum(x, 0.0)), Cin),
                             axis=-1)                      # (HW, 9*Cin)
    mid = jnp.dot(patch1, w1_ref[...], preferred_element_type=jnp.float32)
    mid = jnp.maximum(mid, 0.0).reshape(H, W, P)           # free reshape (W % 8 == 0)

    # ---- conv2(pad(mid)) + shortcut, fused in ONE matmul, channel-major ------
    #   out[p, hw] = sum_k w2t[p, k] * patch2[hw, k]
    # The last Cin columns of patch2 are x itself and the matching weight rows
    # are the 1x1 shortcut weight (or an identity block for Identity shortcut),
    # so the residual add rides on the same MXU pass.  Computing the result as
    # (P, HW) keeps the output store lane-dense (no masked vst).
    patch2 = jnp.concatenate(tap_slabs(pad_rep(mid), P) + [x.reshape(HW, Cin)],
                             axis=-1)                      # (HW, 9*P + Cin)
    out_t = jax.lax.dot_general(w2t_ref[...], patch2, _TRANS_B,
                                preferred_element_type=jnp.float32)   # (P, HW)
    o_ref[0] = out_t.astype(o_ref.dtype)


def basic_block_forward(x_nchw, w1_oihw, w2_oihw, w_sc_oihw=None):
    """BasicBlock forward (stride=1). x_nchw: (N, Cin, H, W); weights in PyTorch OIHW."""
    N, Cin, H, W = x_nchw.shape
    P = int(w1_oihw.shape[0])
    HW = H * W
    # W % 8 == 0 keeps every in-kernel (H, W, c) <-> (HW, c) reshape a free
    # retiling; HW a multiple of 128 keeps the (P, HW) output store lane-dense.
    assert W % 8 == 0, "W must be a multiple of 8"

    has_sc = w_sc_oihw is not None
    if not has_sc:
        assert Cin == P, "Identity shortcut requires in_planes == planes (stride=1)"

    # Single activation stream, NHWC so channels sit on lanes for the matmuls.
    x = jnp.transpose(x_nchw, (0, 2, 3, 1)).astype(jnp.float32)       # (N, H, W, Cin)

    # Weights pre-flattened to the 2-D im2col layout (index = (ky*3 + kx)*c + cin),
    # so each is a single small 2-D VMEM block instead of 9 padded (c, p) tiles.
    w1f = jnp.transpose(w1_oihw, (2, 3, 1, 0)).reshape(9 * Cin, P).astype(jnp.float32)
    w2t = jnp.transpose(w2_oihw, (0, 2, 3, 1)).reshape(P, 9 * P).astype(jnp.float32)
    if has_sc:
        sc_t = w_sc_oihw[:, :, 0, 0].astype(jnp.float32)              # (P, Cin)
    else:
        sc_t = jnp.eye(P, dtype=jnp.float32)                          # Identity shortcut
    w2t_aug = jnp.concatenate([w2t, sc_t], axis=1)                    # (P, 9*P + Cin)

    kernel = functools.partial(_basic_block_kernel, H=H, W=W)

    out = pl.pallas_call(
        kernel,
        out_shape=jax.ShapeDtypeStruct((N, P, HW), jnp.float32),
        grid=(N,),
        in_specs=[
            pl.BlockSpec((1, H, W, Cin), lambda n: (n, 0, 0, 0)),
            pl.BlockSpec((9 * Cin, P), lambda n: (0, 0)),
            pl.BlockSpec(w2t_aug.shape, lambda n: (0, 0)),
        ],
        out_specs=pl.BlockSpec((1, P, HW), lambda n: (n, 0, 0)),
        compiler_params=pltpu.CompilerParams(dimension_semantics=("parallel",)),
    )(x, w1f, w2t_aug)

    # (N, P, HW) is already NCHW-contiguous: the reshape is free, no transpose.
    return out.reshape(N, P, H, W)


# ----------------------------------------------------------------------------
# Pure-JAX reference (NCHW, matches PyTorch F.conv2d / ReplicationPad2d)
# ----------------------------------------------------------------------------
def ref_forward(x, w1, w2, w_sc=None):
    dn = ('NCHW', 'OIHW', 'NCHW')
    pad = lambda t: jnp.pad(t, ((0, 0), (0, 0), (1, 1), (1, 1)), mode='edge')
    if w_sc is None:
        sc = x
    else:
        sc = jax.lax.conv_general_dilated(x, w_sc, (1, 1), 'VALID',
                                          dimension_numbers=dn)
    out = jax.nn.relu(x)
    out = jax.lax.conv_general_dilated(pad(out), w1, (1, 1), 'VALID',
                                       dimension_numbers=dn)
    out = jax.nn.relu(out)
    out = jax.lax.conv_general_dilated(pad(out), w2, (1, 1), 'VALID',
                                       dimension_numbers=dn)
    return out + sc


if __name__ == "__main__":
    key = jax.random.PRNGKey(0)
    N, Cin, H, W = 2, 4, 16, 16
    planes = 8                      # in_planes != planes -> 1x1 conv shortcut
    conf_params = {'c': 2, 'init': [0, 1, 2, 3], 'spp': [0, 2, 3]}

    k1, k2, k3, k4, k5, kx, kx2 = jax.random.split(key, 7)
    w1 = kaiming_normal_residual_conv(k1, (planes, Cin, 3, 3),
                                      coeff=conf_params['c'], fan_expansion=1.0)
    w2 = kaiming_normal_residual_conv(k2, (planes, planes, 3, 3),
                                      coeff=conf_params['c'], fan_expansion=1.0)
    w_sc = xavier_normal_residual_conv(k3, (planes, Cin, 1, 1), fan_expansion=1.0)
    x = jax.random.normal(kx, (N, Cin, H, W), dtype=jnp.float32)

    # Case 1: conv (1x1) shortcut.
    out = jax.block_until_ready(basic_block_forward(x, w1, w2, w_sc))
    assert out.shape == (N, planes, H, W)
    ref = ref_forward(x, w1, w2, w_sc)
    np.testing.assert_allclose(np.asarray(out), np.asarray(ref),
                               atol=1e-4, rtol=1e-4)

    # Case 2: Identity shortcut (in_planes == planes, stride 1).
    w1b = kaiming_normal_residual_conv(k4, (planes, planes, 3, 3),
                                       coeff=conf_params['c'], fan_expansion=1.0)
    w2b = kaiming_normal_residual_conv(k5, (planes, planes, 3, 3),
                                       coeff=conf_params['c'], fan_expansion=1.0)
    x2 = jax.random.normal(kx2, (N, planes, H, W), dtype=jnp.float32)
    out2 = jax.block_until_ready(basic_block_forward(x2, w1b, w2b, None))
    ref2 = ref_forward(x2, w1b, w2b, None)
    np.testing.assert_allclose(np.asarray(out2), np.asarray(ref2),
                               atol=1e-4, rtol=1e-4)

    print("KERNEL_OK")
</pallas_src>

<mosaic_0001>
module attributes {stable_mosaic.version = 11 : i64} {
  func.func @_basic_block_kernel(%arg0: i32, %arg1: memref<1x16x16x4xf32, #tpu.memory_space<vmem>>, %arg2: memref<36x8xf32, #tpu.memory_space<vmem>>, %arg3: memref<8x76xf32, #tpu.memory_space<vmem>>, %arg4: memref<1x8x256xf32, #tpu.memory_space<vmem>>) attributes {dimension_semantics = [#tpu.dimension_semantics<parallel>], iteration_bounds = array<i64: 2>, scalar_prefetch = 0 : i64, scratch_operands = 0 : i64, tpu.core_type = #tpu.core_type<tc>, window_params = [{transform_indices = @transform_0, window_bounds = array<i64: 1, 16, 16, 4>}, {pipeline_mode = #tpu.pipeline_mode<synchronous>, transform_indices = @transform_1, window_bounds = array<i64: 36, 8>}, {pipeline_mode = #tpu.pipeline_mode<synchronous>, transform_indices = @transform_2, window_bounds = array<i64: 8, 76>}, {transform_indices = @transform_3, window_bounds = array<i64: 1, 8, 256>}]} {
    %c0 = arith.constant 0 : index
    %c0_0 = arith.constant 0 : index
    %c0_1 = arith.constant 0 : index
    %c0_2 = arith.constant 0 : index
    %0 = vector.load %arg1[%c0, %c0_0, %c0_1, %c0_2] : memref<1x16x16x4xf32, #tpu.memory_space<vmem>>, vector<1x16x16x4xf32>
    %1 = vector.shape_cast %0 : vector<1x16x16x4xf32> to vector<16x16x4xf32>
    %cst = arith.constant 0.000000e+00 : f32
    %2 = vector.broadcast %cst : f32 to vector<16x16x4xf32>
    %3 = arith.maximumf %1, %2 : vector<16x16x4xf32>
    %4 = vector.extract_strided_slice %3 {offsets = [0, 0, 0], sizes = [16, 1, 4], strides = [1, 1, 1]} : vector<16x16x4xf32> to vector<16x1x4xf32>
    %5 = vector.extract_strided_slice %3 {offsets = [0, 15, 0], sizes = [16, 1, 4], strides = [1, 1, 1]} : vector<16x16x4xf32> to vector<16x1x4xf32>
    %6 = tpu.concatenate %4, %3, %5 in 1 : vector<16x1x4xf32>, vector<16x16x4xf32>, vector<16x1x4xf32> -> vector<16x18x4xf32>
    %7 = vector.extract_strided_slice %6 {offsets = [0, 0, 0], sizes = [1, 18, 4], strides = [1, 1, 1]} : vector<16x18x4xf32> to vector<1x18x4xf32>
    %8 = vector.extract_strided_slice %6 {offsets = [15, 0, 0], sizes = [1, 18, 4], strides = [1, 1, 1]} : vector<16x18x4xf32> to vector<1x18x4xf32>
    %9 = tpu.concatenate %7, %6, %8 in 0 : vector<1x18x4xf32>, vector<16x18x4xf32>, vector<1x18x4xf32> -> vector<18x18x4xf32>
    %10 = vector.extract_strided_slice %9 {offsets = [0, 0, 0], sizes = [18, 16, 4], strides = [1, 1, 1]} : vector<18x18x4xf32> to vector<18x16x4xf32>
    %11 = vector.extract_strided_slice %9 {offsets = [0, 1, 0], sizes = [18, 16, 4], strides = [1, 1, 1]} : vector<18x18x4xf32> to vector<18x16x4xf32>
    %12 = vector.extract_strided_slice %9 {offsets = [0, 2, 0], sizes = [18, 16, 4], strides = [1, 1, 1]} : vector<18x18x4xf32> to vector<18x16x4xf32>
    %13 = vector.extract_strided_slice %10 {offsets = [0, 0, 0], sizes = [16, 16, 4], strides = [1, 1, 1]} : vector<18x16x4xf32> to vector<16x16x4xf32>
    %14 = vector.shape_cast %13 : vector<16x16x4xf32> to vector<256x4xf32>
    %15 = vector.extract_strided_slice %11 {offsets = [0, 0, 0], sizes = [16, 16, 4], strides = [1, 1, 1]} : vector<18x16x4xf32> to vector<16x16x4xf32>
    %16 = vector.shape_cast %15 : vector<16x16x4xf32> to vector<256x4xf32>
    %17 = vector.extract_strided_slice %12 {offsets = [0, 0, 0], sizes = [16, 16, 4], strides = [1, 1, 1]} : vector<18x16x4xf32> to vector<16x16x4xf32>
    %18 = vector.shape_cast %17 : vector<16x16x4xf32> to vector<256x4xf32>
    %19 = vector.extract_strided_slice %10 {offsets = [1, 0, 0], sizes = [16, 16, 4], strides = [1, 1, 1]} : vector<18x16x4xf32> to vector<16x16x4xf32>
    %20 = vector.shape_cast %19 : vector<16x16x4xf32> to vector<256x4xf32>
    %21 = vector.extract_strided_slice %11 {offsets = [1, 0, 0], sizes = [16, 16, 4], strides = [1, 1, 1]} : vector<18x16x4xf32> to vector<16x16x4xf32>
    %22 = vector.shape_cast %21 : vector<16x16x4xf32> to vector<256x4xf32>
    %23 = vector.extract_strided_slice %12 {offsets = [1, 0, 0], sizes = [16, 16, 4], strides = [1, 1, 1]} : vector<18x16x4xf32> to vector<16x16x4xf32>
    %24 = vector.shape_cast %23 : vector<16x16x4xf32> to vector<256x4xf32>
    %25 = vector.extract_strided_slice %10 {offsets = [2, 0, 0], sizes = [16, 16, 4], strides = [1, 1, 1]} : vector<18x16x4xf32> to vector<16x16x4xf32>
    %26 = vector.shape_cast %25 : vector<16x16x4xf32> to vector<256x4xf32>
    %27 = vector.extract_strided_slice %11 {offsets = [2, 0, 0], sizes = [16, 16, 4], strides = [1, 1, 1]} : vector<18x16x4xf32> to vector<16x16x4xf32>
    %28 = vector.shape_cast %27 : vector<16x16x4xf32> to vector<256x4xf32>
    %29 = vector.extract_strided_slice %12 {offsets = [2, 0, 0], sizes = [16, 16, 4], strides = [1, 1, 1]} : vector<18x16x4xf32> to vector<16x16x4xf32>
    %30 = vector.shape_cast %29 : vector<16x16x4xf32> to vector<256x4xf32>
    %31 = tpu.concatenate %14, %16, %18, %20, %22, %24, %26, %28, %30 in 1 : vector<256x4xf32>, vector<256x4xf32>, vector<256x4xf32>, vector<256x4xf32>, vector<256x4xf32>, vector<256x4xf32>, vector<256x4xf32>, vector<256x4xf32>, vector<256x4xf32> -> vector<256x36xf32>
    %c0_3 = arith.constant 0 : index
    %c0_4 = arith.constant 0 : index
    %32 = vector.load %arg2[%c0_3, %c0_4] : memref<36x8xf32, #tpu.memory_space<vmem>>, vector<36x8xf32>
    %cst_5 = arith.constant dense<0.000000e+00> : vector<256x8xf32>
    %33 = tpu.matmul %31, %32, %cst_5 {dimension_numbers = #tpu.dot_dimension_numbers<[1], [0], [0], [1], [0, 0, 1, 1], [], []>} : vector<256x36xf32>, vector<36x8xf32>, vector<256x8xf32> -> vector<256x8xf32>
    %cst_6 = arith.constant 0.000000e+00 : f32
    %34 = vector.broadcast %cst_6 : f32 to vector<256x8xf32>
    %35 = arith.maximumf %33, %34 : vector<256x8xf32>
    %36 = vector.shape_cast %35 : vector<256x8xf32> to vector<16x16x8xf32>
    %37 = vector.extract_strided_slice %36 {offsets = [0, 0, 0], sizes = [16, 1, 8], strides = [1, 1, 1]} : vector<16x16x8xf32> to vector<16x1x8xf32>
    %38 = vector.extract_strided_slice %36 {offsets = [0, 15, 0], sizes = [16, 1, 8], strides = [1, 1, 1]} : vector<16x16x8xf32> to vector<16x1x8xf32>
    %39 = tpu.concatenate %37, %36, %38 in 1 : vector<16x1x8xf32>, vector<16x16x8xf32>, vector<16x1x8xf32> -> vector<16x18x8xf32>
    %40 = vector.extract_strided_slice %39 {offsets = [0, 0, 0], sizes = [1, 18, 8], strides = [1, 1, 1]} : vector<16x18x8xf32> to vector<1x18x8xf32>
    %41 = vector.extract_strided_slice %39 {offsets = [15, 0, 0], sizes = [1, 18, 8], strides = [1, 1, 1]} : vector<16x18x8xf32> to vector<1x18x8xf32>
    %42 = tpu.concatenate %40, %39, %41 in 0 : vector<1x18x8xf32>, vector<16x18x8xf32>, vector<1x18x8xf32> -> vector<18x18x8xf32>
    %43 = vector.extract_strided_slice %42 {offsets = [0, 0, 0], sizes = [18, 16, 8], strides = [1, 1, 1]} : vector<18x18x8xf32> to vector<18x16x8xf32>
    %44 = vector.extract_strided_slice %42 {offsets = [0, 1, 0], sizes = [18, 16, 8], strides = [1, 1, 1]} : vector<18x18x8xf32> to vector<18x16x8xf32>
    %45 = vector.extract_strided_slice %42 {offsets = [0, 2, 0], sizes = [18, 16, 8], strides = [1, 1, 1]} : vector<18x18x8xf32> to vector<18x16x8xf32>
    %46 = vector.extract_strided_slice %43 {offsets = [0, 0, 0], sizes = [16, 16, 8], strides = [1, 1, 1]} : vector<18x16x8xf32> to vector<16x16x8xf32>
    %47 = vector.shape_cast %46 : vector<16x16x8xf32> to vector<256x8xf32>
    %48 = vector.extract_strided_slice %44 {offsets = [0, 0, 0], sizes = [16, 16, 8], strides = [1, 1, 1]} : vector<18x16x8xf32> to vector<16x16x8xf32>
    %49 = vector.shape_cast %48 : vector<16x16x8xf32> to vector<256x8xf32>
    %50 = vector.extract_strided_slice %45 {offsets = [0, 0, 0], sizes = [16, 16, 8], strides = [1, 1, 1]} : vector<18x16x8xf32> to vector<16x16x8xf32>
    %51 = vector.shape_cast %50 : vector<16x16x8xf32> to vector<256x8xf32>
    %52 = vector.extract_strided_slice %43 {offsets = [1, 0, 0], sizes = [16, 16, 8], strides = [1, 1, 1]} : vector<18x16x8xf32> to vector<16x16x8xf32>
    %53 = vector.shape_cast %52 : vector<16x16x8xf32> to vector<256x8xf32>
    %54 = vector.extract_strided_slice %44 {offsets = [1, 0, 0], sizes = [16, 16, 8], strides = [1, 1, 1]} : vector<18x16x8xf32> to vector<16x16x8xf32>
    %55 = vector.shape_cast %54 : vector<16x16x8xf32> to vector<256x8xf32>
    %56 = vector.extract_strided_slice %45 {offsets = [1, 0, 0], sizes = [16, 16, 8], strides = [1, 1, 1]} : vector<18x16x8xf32> to vector<16x16x8xf32>
    %57 = vector.shape_cast %56 : vector<16x16x8xf32> to vector<256x8xf32>
    %58 = vector.extract_strided_slice %43 {offsets = [2, 0, 0], sizes = [16, 16, 8], strides = [1, 1, 1]} : vector<18x16x8xf32> to vector<16x16x8xf32>
    %59 = vector.shape_cast %58 : vector<16x16x8xf32> to vector<256x8xf32>
    %60 = vector.extract_strided_slice %44 {offsets = [2, 0, 0], sizes = [16, 16, 8], strides = [1, 1, 1]} : vector<18x16x8xf32> to vector<16x16x8xf32>
    %61 = vector.shape_cast %60 : vector<16x16x8xf32> to vector<256x8xf32>
    %62 = vector.extract_strided_slice %45 {offsets = [2, 0, 0], sizes = [16, 16, 8], strides = [1, 1, 1]} : vector<18x16x8xf32> to vector<16x16x8xf32>
    %63 = vector.shape_cast %62 : vector<16x16x8xf32> to vector<256x8xf32>
    %64 = vector.shape_cast %1 : vector<16x16x4xf32> to vector<256x4xf32>
    %65 = tpu.concatenate %47, %49, %51, %53, %55, %57, %59, %61, %63, %64 in 1 : vector<256x8xf32>, vector<256x8xf32>, vector<256x8xf32>, vector<256x8xf32>, vector<256x8xf32>, vector<256x8xf32>, vector<256x8xf32>, vector<256x8xf32>, vector<256x8xf32>, vector<256x4xf32> -> vector<256x76xf32>
    %c0_7 = arith.constant 0 : index
    %c0_8 = arith.constant 0 : index
    %66 = vector.load %arg3[%c0_7, %c0_8] : memref<8x76xf32, #tpu.memory_space<vmem>>, vector<8x76xf32>
    %cst_9 = arith.constant dense<0.000000e+00> : vector<8x256xf32>
    %67 = tpu.matmul %66, %65, %cst_9 {dimension_numbers = #tpu.dot_dimension_numbers<[1], [1], [0], [0], [0, 0, 1, 0], [], []>} : vector<8x76xf32>, vector<256x76xf32>, vector<8x256xf32> -> vector<8x256xf32>
    %c0_10 = arith.constant 0 : index
    %c0_11 = arith.constant 0 : index
    %c0_12 = arith.constant 0 : index
    %68 = vector.load %arg4[%c0_10, %c0_11, %c0_12] : memref<1x8x256xf32, #tpu.memory_space<vmem>>, vector<1x8x256xf32>
    %69 = vector.shape_cast %68 : vector<1x8x256xf32> to vector<8x256xf32>
    %70 = vector.shape_cast %67 : vector<8x256xf32> to vector<1x8x256xf32>
    tpu.vector_store %arg4[%c0_10, %c0_11, %c0_12], %70 {strides = array<i32>} : memref<1x8x256xf32, #tpu.memory_space<vmem>>, vector<1x8x256xf32>,
    return
  }
  func.func @transform_0(%arg0: i32) -> (i32, i32, i32, i32) {
    %c0_i32 = arith.constant 0 : i32
    %c0_i32_0 = arith.constant 0 : i32
    %c0_i32_1 = arith.constant 0 : i32
    %c0_i32_2 = arith.constant 0 : i32
    return %arg0, %c0_i32, %c0_i32_0, %c0_i32_1 : i32, i32, i32, i32
  }
  func.func @transform_1(%arg0: i32) -> (i32, i32) {
    %c0_i32 = arith.constant 0 : i32
    %c0_i32_0 = arith.constant 0 : i32
    %c0_i32_1 = arith.constant 0 : i32
    return %c0_i32, %c0_i32_0 : i32, i32
  }
  func.func @transform_2(%arg0: i32) -> (i32, i32) {
    %c0_i32 = arith.constant 0 : i32
    %c0_i32_0 = arith.constant 0 : i32
    %c0_i32_1 = arith.constant 0 : i32
    return %c0_i32, %c0_i32_0 : i32, i32
  }
  func.func @transform_3(%arg0: i32) -> (i32, i32, i32) {
    %c0_i32 = arith.constant 0 : i32
    %c0_i32_0 = arith.constant 0 : i32
    %c0_i32_1 = arith.constant 0 : i32
    return %arg0, %c0_i32, %c0_i32_0 : i32, i32, i32
  }
}

</mosaic_0001>

<bundles_post_ra>
// kernel: tpu_custom_call.1
= control target key start
LH: loop header
LB: loop body
LE: loop exit
PB: predicated region body
PF: predicated region fallthrough
CT: control target
= control target key end

     0   :  { %8 = vsyncpa [#allocation3], 0  ;;  %s8237_s0 = inlined_call_operand.vmem [shape: f32[2,16,16,4], index: 0, kind: input, shape index: {}]   ;;  %s8238_s1 = inlined_call_operand.vmem [shape: f32[36,8], index: 1, kind: input, shape index: {}]   ;;  %s8239_s2 = inlined_call_operand.vmem [shape: f32[8,76], index: 2, kind: input, shape index: {}]   ;;  %s8240_s3 = inlined_call_operand.hbm [shape: f32[2,8,256], index: 3, kind: output, shape index: {}]  }
   0x1   :  { %10 = vsyncpa [#allocation3 + $0x1], 0  ;;  %s4908_s12 = smov 0   ;;  %s4910_s13 = smov 0  }
   0x2   :  { %s4912_s14 = smov 0   ;;  %s4914_s15 = smov 0  }
   0x3 LB: > { %s4929_s16 = sadd.s32 4294967295, %s4872_s15   ;;  %s3766_s17 = sadd.s32 4294967294, %s4872_s15   ;;  %s4872_s15 = sphi %s4914_s15, %s8938_s15   ;;  %s4868_s14 = sphi %s4912_s14, %s8937_s14   ;;  %s4864_s13 = sphi %s4910_s13, %s8936_s13   ;;  %s4860_s12 = sphi %s4908_s12, %s8935_s12  }
   0x4   : > { %s4933_s18 = sadd.s32 1, %s4872_s15   ;;  %s91_s19 = sadd.s32 1, %s4868_s14 }
   0x5   : > { %s88_s20 = ssub.s32 %s4872_s15, %s4933_s18  ;;  %p101_p0 = scmp.ne.s32.totalorder %s4868_s14, %s4864_s13 }
   0x6   : > { %p89_p1 = scmp.eq.s32.totalorder %s88_s20, 0  ;;  %p102_p2 = scmp.eq.s32.totalorder %s4929_s16, 1 }
   0x7   : > { %p107_p3 = scmp.ne.s32.totalorder %s4864_s13, %s4860_s12  ;;  %p108_p4 = scmp.eq.s32.totalorder %s3766_s17, 1 }
   0x8   : > { %s4944_s21 = scalar_select %p89_p1, %s4868_s14, %s91_s19  }
   0x9   : > { %p4946_p5 = por %p102_p2, %p101_p0  ;;  %p4950_p6 = por %p108_p4, %p107_p3 }
   0xa   : > { %p3769_p7 = scmp.ge.s32.totalorder %s4872_s15, 1  ;;  %p140_p8 = scmp.lt.s32.totalorder %s4872_s15, 3 }
   0xc   : > { %p141_p9 = pnand %p3769_p7, %p140_p8 }
   0xe   : > { %144 = sbr.rel (%p141_p9) target bundleno = 1467 (0x5bb), region = 32 }
  0x15   : > { %p164_p10 = scmp.lt.s32.totalorder %s4929_s16, 1  ;;  %vm265_vm0 = vcmask 1040384   ;;  %vm455_vm1 = vcmask 1046528   ;;  %s4874_s29 = smov 4   ;;  %vm531_vm2 = vcmask 1045504   ;;  %vm1357_vm3 = vcmask 31744  }
  0x16   : > { %s4875_s30 = smov 8   ;;  %s4876_s4 = smov 12   ;;  %vm1388_vm4 = vcmask 64512   ;;  %vm1419_vm5 = vcmask 97280   ;;  %vm1719_vm6 = vcmask 1043456   ;;  %vm1452_vm7 = vcmask 130048  }
  0x17   : > { %s165_s24 = scalar_select %p164_p10, %s4929_s16, 1  ;;  %vm1485_vm8 = vcmask 162816   ;;  %vm1518_vm9 = vcmask 195584   ;;  %vm1551_vm10 = vcmask 228352   ;;  %vm1584_vm11 = vcmask 261120  }
  0x18   : > { %s4877_s5 = smov 16   ;;  %s4878_s6 = smov 20   ;;  %vm1622_vm12 = vcmask 293888   ;;  %vm3353_vm13 = vcmask 326656   ;;  %vm3386_vm14 = vcmask 392192   ;;  %vm3419_vm15 = vcmask 457728  }
  0x19   : > { %s3844_s25 = sshll.u32 %s165_s24, 8  ;;  %s4879_s7 = smov 24  }
  0x1a   : > { %s4961_s28 = scalar_lea.vmem %s8237_s0, %s3844_s25  ;;  %s4880_s17 = smov 28  }
  0x1b   : > { %v171_v0 = vld [vmem:[%s4961_s28 + $0x10] sm:$0xff]  ;;  %v172_v1 = vld [vmem:[%s4961_s28 + $0x18] sm:$0xff]  ;;  %v169_v2 = vld [vmem:[%s4961_s28] sm:$0xff]  ;;  %s3845_s19 = sshll.u32 %s4929_s16, 8  ;;  %s4887_s16 = smov [#allocation2]  }
  0x1c   : > { %v203_v3 = vmax.f32 %v171_v0, 0.0  ;;  %v204_v4 = vmax.f32 %v172_v1, 0.0  ;;  %v170_v5 = vld [vmem:[%s4961_s28 + $0x8] sm:$0xff]  ;;  %v201_v6 = vmax.f32 %v169_v2, 0.0  ;;  %v173_v7 = vld [vmem:[%s4961_s28 + $0x20] sm:$0xff]  ;;  %v175_v28 = vld [vmem:[%s4961_s28 + $0x30] sm:$0xff]  ;;  %s8197_s25 = scalar_lea.hbm %s8240_s3, %s3845_s19 }
  0x1d   : > { %v174_v8 = vld [vmem:[%s4961_s28 + $0x28] sm:$0xff]  ;;  %v202_v9 = vmax.f32 %v170_v5, 0.0  ;;  %v205_v10 = vmax.f32 %v173_v7, 0.0  ;;  %v176_v33 = vld [vmem:[%s4961_s28 + $0x38] sm:$0xff]  ;;  %v177_v38 = vld [vmem:[%s4961_s28 + $0x40] sm:$0xff]  ;;  %v207_v43 = vmax.f32 %v175_v28, 0.0 }
  0x1e   : > { %v206_v11 = vmax.f32 %v174_v8, 0.0  ;;  %v269_v12 = vrot.slane %v203_v3, 7  ;;  %v270_v13 = vrot.slane %v204_v4, 7  ;;  %v266_v14 = vrot.slane %v201_v6, 7  ;;  %v178_v39 = vld [vmem:[%s4961_s28 + $0x48] sm:$0xff]  ;;  %v179_v44 = vld [vmem:[%s4961_s28 + $0x50] sm:$0xff] }
  0x1f   : > { %v362_v15 = vrot.slane %v204_v4, 6  ;;  %v267_v16 = vrot.slane %v202_v9, 7  ;;  %v361_v17 = vrot.slane %v202_v9, 6  ;;  %v272_v18 = vrot.slane %v205_v10, 7  ;;  %v180_v61 = vld [vmem:[%s4961_s28 + $0x58] sm:$0xff] }
  0x20   : > { %v273_v19 = vrot.slane %v206_v11, 7  ;;  %v4970_v20 = vsel %vm265_vm0, %v269_v12, %v270_v13  ;;  %v4973_v21 = vsel %vm265_vm0, %v203_v3, %v269_v12  ;;  %v4976_v22 = vsel %vm265_vm0, %v201_v6, %v266_v14  ;;  %v181_v6 = vld [vmem:[%s4961_s28 + $0x60] sm:$0xff]  ;;  %v184_v28 = vld [vmem:[%s4961_s28 + $0x78] sm:$0xff] }
  0x21   : > { %8439 = vst [vmem:[#allocation5_spill] sm:$0xff] %v4970_v20  ;;  %8440 = vst [vmem:[#allocation6_spill] sm:$0xff] %v4973_v21  ;;  %v4979_v23 = vsel %vm265_vm0, %v270_v13, %v362_v15  ;;  %v461_v24 = vrot.slane %v4973_v21, 1  ;;  %v462_v25 = vrot.slane %v4970_v20, 1  ;;  %v4984_v26 = vsel %vm265_vm0, %v266_v14, %v267_v16 }
  0x22   : > { %8441 = vst [vmem:[#allocation7_spill] sm:$0xff] %v4976_v22  ;;  %8442 = vst [vmem:[#allocation8_spill] sm:$0xff] %v4984_v26  ;;  %v456_v27 = vrot.slane %v4976_v22, 1  ;;  %v457_v29 = vrot.slane %v4984_v26, 1  ;;  %v464_v30 = vrot.slane %v4979_v23, 1  ;;  %v4991_v31 = vsel %vm265_vm0, %v267_v16, %v361_v17 }
  0x23   : > { %v4994_v32 = vsel %vm265_vm0, %v272_v18, %v273_v19  ;;  %v4998_v34 = vsel %vm455_vm1, %v461_v24, %v462_v25  ;;  %v459_v35 = vrot.slane %v4991_v31, 1  ;;  %v363_v36 = vrot.slane %v206_v11, 6  ;;  %v183_v11 = vld [vmem:[%s4961_s28 + $0x70] sm:$0xff] }
  0x24   : > { %8443 = vst [vmem:[#allocation9_spill] sm:$0xff] %v4994_v32  ;;  %8444 = vst [vmem:[#allocation10_spill] sm:$0xff] %v4998_v34  ;;  %v467_v37 = vrot.slane %v4994_v32, 1  ;;  %623 = vrot.lane.b32.xlu1 %v4998_v34, %s4874_s29  ;;  %v5007_v40 = vsel %vm455_vm1, %v456_v27, %v457_v29  ;;  %v5010_v41 = vsel %vm455_vm1, %v462_v25, %v464_v30  ;;  %v208_v48 = vmax.f32 %v176_v33, 0.0  ;;  %v185_v30 = vld [vmem:[%s4961_s28 + $0x80] sm:$0xff] }
  0x25   : > { %8445 = vst [vmem:[#allocation11_spill] sm:$0xff] %v5010_v41  ;;  %v5013_v42 = vsel %vm265_vm0, %v205_v10, %v272_v18  ;;  %619 = vrot.lane.b32.xlu0 %v5007_v40, %s4874_s29  ;;  %v5019_v45 = vsel %vm455_vm1, %v457_v29, %v459_v35  ;;  %v5022_v46 = vsel %vm265_vm0, %v273_v19, %v363_v36  ;;  %v275_v50 = vrot.slane %v207_v43, 7  ;;  %v182_v10 = vld [vmem:[%s4961_s28 + $0x68] sm:$0xff] }
  0x26   : > { %8446 = vst [vmem:[#allocation12_spill] sm:$0xff] %v5013_v42  ;;  %v466_v47 = vrot.slane %v5013_v42, 1  ;;  %v469_v49 = vrot.slane %v5022_v46, 1  ;;  %v209_v51 = vmax.f32 %v177_v38, 0.0  ;;  %v210_v52 = vmax.f32 %v178_v39, 0.0 }
  0x27   : > { %v276_v54 = vrot.slane %v208_v48, 7  ;;  %v364_v55 = vrot.slane %v208_v48, 6  ;;  %v211_v56 = vmax.f32 %v179_v44, 0.0  ;;  %v5035_v58 = vsel %vm265_vm0, %v207_v43, %v275_v50 }
  0x28   : > { %v5027_v53 = vsel %vm455_vm1, %v466_v47, %v467_v37  ;;  %625 = vrot.lane.b32.xlu1 %v5010_v41, %s4874_s29  ;;  %v5032_v57 = vsel %vm455_vm1, %v467_v37, %v469_v49  ;;  %8449 = vst [vmem:[#allocation15_spill] sm:$0xff] %v5035_v58  ;;  %v278_v59 = vrot.slane %v209_v51, 7  ;;  %v279_v60 = vrot.slane %v210_v52, 7 }
  0x29   : > { %8447 = vst [vmem:[#allocation13_spill] sm:$0xff] %v5027_v53  ;;  %8448 = vst [vmem:[#allocation14_spill] sm:$0xff] %v5032_v57  ;;  %621 = vrot.lane.b32.xlu0 %v5019_v45, %s4874_s29  ;;  %v5041_v62 = vsel %vm265_vm0, %v275_v50, %v276_v54  ;;  %v5044_v63 = vsel %vm265_vm0, %v276_v54, %v364_v55  ;;  %v471_v0 = vrot.slane %v5035_v58, 1  ;;  %v365_v1 = vrot.slane %v210_v52, 6  ;;  %v186_v50 = vld [vmem:[%s4961_s28 + $0x88] sm:$0xff] }
  0x2a   : > { %8450 = vst [vmem:[#allocation16_spill] sm:$0xff] %v5041_v62  ;;  %v472_v2 = vrot.slane %v5041_v62, 1  ;;  %v474_v3 = vrot.slane %v5044_v63, 1  ;;  %v5050_v4 = vsel %vm265_vm0, %v278_v59, %v279_v60  ;;  %v5053_v5 = vsel %vm265_vm0, %v209_v51, %v278_v59 }
  0x2b   : > { %8451 = vst [vmem:[#allocation17_spill] sm:$0xff] %v5050_v4  ;;  %8452 = vst [vmem:[#allocation18_spill] sm:$0xff] %v5053_v5  ;;  %v5057_v7 = vsel %vm265_vm0, %v279_v60, %v365_v1  ;;  %v477_v8 = vrot.slane %v5050_v4, 1  ;;  %v212_v9 = vmax.f32 %v180_v61, 0.0  ;;  %v476_v14 = vrot.slane %v5053_v5, 1 }
  0x2c   : > { %629 = vrot.lane.b32.xlu1 %v5032_v57, %s4874_s29  ;;  %v5065_v12 = vsel %vm455_vm1, %v472_v2, %v474_v3  ;;  %v479_v13 = vrot.slane %v5057_v7, 1  ;;  %v281_v15 = vrot.slane %v211_v56, 7  ;;  %v5072_v16 = vsel %vm455_vm1, %v471_v0, %v472_v2  ;;  %v187_v2 = vld [vmem:[%s4961_s28 + $0x90] sm:$0xff]  ;;  %v188_v3 = vld [vmem:[%s4961_s28 + $0x98] sm:$0xff] }
  0x2d   : > { %8453 = vst [vmem:[#allocation19_spill] sm:$0xff] %v5065_v12  ;;  %627 = vrot.lane.b32.xlu0 %v5027_v53, %s4874_s29  ;;  %8454 = vst [vmem:[#allocation20_spill] sm:$0xff] %v5072_v16  ;;  %v282_v17 = vrot.slane %v212_v9, 7  ;;  %v366_v18 = vrot.slane %v212_v9, 6  ;;  %v213_v19 = vmax.f32 %v181_v6, 0.0  ;;  %v214_v27 = vmax.f32 %v182_v10, 0.0 }
  0x2e   : > { %v5075_v24 = vsel %vm455_vm1, %v477_v8, %v479_v13  ;;  %v5078_v25 = vsel %vm265_vm0, %v211_v56, %v281_v15  ;;  %v215_v29 = vmax.f32 %v183_v11, 0.0  ;;  %v216_v48 = vmax.f32 %v184_v28, 0.0  ;;  %v197_v53 = vld [vmem:[%s4961_s28 + $0xe0] sm:$0xff] }
  0x2f   : > { %8455 = vst [vmem:[#allocation21_spill] sm:$0xff] %v5075_v24  ;;  %8456 = vst [vmem:[#allocation22_spill] sm:$0xff] %v5078_v25  ;;  %v5083_v33 = vsel %vm265_vm0, %v281_v15, %v282_v17  ;;  %v5086_v35 = vsel %vm265_vm0, %v282_v17, %v366_v18  ;;  %v481_v36 = vrot.slane %v5078_v25, 1  ;;  %v284_v37 = vrot.slane %v213_v19, 7 }
  0x30   : > { %8457 = vst [vmem:[#allocation23_spill] sm:$0xff] %v5083_v33  ;;  %633 = vrot.lane.b32.xlu1 %v5065_v12, %s4874_s29  ;;  %v482_v38 = vrot.slane %v5083_v33, 1  ;;  %v484_v39 = vrot.slane %v5086_v35, 1  ;;  %v285_v43 = vrot.slane %v214_v27, 7  ;;  %v367_v44 = vrot.slane %v214_v27, 6  ;;  %v190_v27 = vld [vmem:[%s4961_s28 + $0xa8] sm:$0xff] }
  0x31   : > { %631 = vrot.lane.b32.xlu0 %v5072_v16, %s4874_s29  ;;  %v5096_v47 = vsel %vm265_vm0, %v213_v19, %v284_v37  ;;  %v287_v49 = vrot.slane %v215_v29, 7  ;;  %v217_v51 = vmax.f32 %v185_v30, 0.0  ;;  %v5100_v52 = vsel %vm455_vm1, %v476_v14, %v477_v8  ;;  %v189_v19 = vld [vmem:[%s4961_s28 + $0xa0] sm:$0xff] }
  0x32   : > { %8458 = vst [vmem:[#allocation24_spill] sm:$0xff] %v5096_v47  ;;  %8459 = vst [vmem:[#allocation25_spill] sm:$0xff] %v5100_v52  ;;  %v5103_v54 = vsel %vm265_vm0, %v284_v37, %v285_v43  ;;  %v5106_v55 = vsel %vm265_vm0, %v285_v43, %v367_v44  ;;  %v288_v59 = vrot.slane %v216_v48, 7  ;;  %v486_v61 = vrot.slane %v5096_v47, 1  ;;  %v191_v37 = vld [vmem:[%s4961_s28 + $0xb0] sm:$0xff] }
  0x33   : > { %8460 = vst [vmem:[#allocation26_spill] sm:$0xff] %v5103_v54  ;;  %v487_v56 = vrot.slane %v5103_v54, 1  ;;  %v489_v60 = vrot.slane %v5106_v55, 1  ;;  %v368_v0 = vrot.slane %v216_v48, 6  ;;  %v218_v1 = vmax.f32 %v186_v50, 0.0 }
  0x34   : > { %637 = vrot.lane.b32.xlu1 %v5075_v24, %s4874_s29  ;;  %v5118_v6 = vsel %vm455_vm1, %v482_v38, %v484_v39  ;;  %v5121_v8 = vsel %vm455_vm1, %v481_v36, %v482_v38  ;;  %v5124_v9 = vsel %vm265_vm0, %v287_v49, %v288_v59  ;;  %v290_v10 = vrot.slane %v217_v51, 7 }
  0x35   : > { %635 = vrot.lane.b32.xlu0 %v5100_v52, %s4874_s29  ;;  %8461 = vst [vmem:[#allocation27_spill] sm:$0xff] %v5118_v6  ;;  %8462 = vst [vmem:[#allocation28_spill] sm:$0xff] %v5121_v8  ;;  %v5127_v11 = vsel %vm265_vm0, %v288_v59, %v368_v0  ;;  %v5130_v13 = vsel %vm265_vm0, %v215_v29, %v287_v49  ;;  %v291_v14 = vrot.slane %v218_v1, 7  ;;  %v369_v15 = vrot.slane %v218_v1, 6 }
  0x36   : > { %8463 = vst [vmem:[#allocation29_spill] sm:$0xff] %v5124_v9  ;;  %8464 = vst [vmem:[#allocation30_spill] sm:$0xff] %v5130_v13  ;;  %v219_v17 = vmax.f32 %v187_v2, 0.0  ;;  %v220_v18 = vmax.f32 %v188_v3, 0.0  ;;  %v5137_v28 = vsel %vm455_vm1, %v487_v56, %v489_v60  ;;  %v5140_v30 = vsel %vm455_vm1, %v486_v61, %v487_v56  ;;  %v192_v60 = vld [vmem:[%s4961_s28 + $0xb8] sm:$0xff] }
  0x37   : > { %8465 = vst [vmem:[#allocation31_spill] sm:$0xff] %v5137_v28  ;;  %8466 = vst [vmem:[#allocation32_spill] sm:$0xff] %v5140_v30  ;;  %v492_v36 = vrot.slane %v5124_v9, 1  ;;  %v494_v29 = vrot.slane %v5127_v11, 1  ;;  %v491_v38 = vrot.slane %v5130_v13, 1  ;;  %v5149_v39 = vsel %vm265_vm0, %v290_v10, %v291_v14 }
  0x38   : > { %641 = vrot.lane.b32.xlu1 %v5118_v6, %s4874_s29  ;;  %8467 = vst [vmem:[#allocation33_spill] sm:$0xff] %v5149_v39  ;;  %v5152_v43 = vsel %vm265_vm0, %v291_v14, %v369_v15  ;;  %v293_v44 = vrot.slane %v219_v17, 7  ;;  %v294_v48 = vrot.slane %v220_v18, 7  ;;  %v370_v49 = vrot.slane %v220_v18, 6  ;;  %v193_v18 = vld [vmem:[%s4961_s28 + $0xc0] sm:$0xff] }
  0x39   : > { %639 = vrot.lane.b32.xlu0 %v5121_v8, %s4874_s29  ;;  %v221_v50 = vmax.f32 %v189_v19, 0.0  ;;  %v222_v56 = vmax.f32 %v190_v27, 0.0  ;;  %v5155_v59 = vsel %vm265_vm0, %v217_v51, %v290_v10  ;;  %v223_v61 = vmax.f32 %v191_v37, 0.0  ;;  %v194_v37 = vld [vmem:[%s4961_s28 + $0xc8] sm:$0xff] }
  0x3a   : > { %8468 = vst [vmem:[#allocation34_spill] sm:$0xff] %v5155_v59  ;;  %v5161_v0 = vsel %vm455_vm1, %v492_v36, %v494_v29  ;;  %v5164_v1 = vsel %vm265_vm0, %v293_v44, %v294_v48  ;;  %v5167_v2 = vsel %vm265_vm0, %v294_v48, %v370_v49  ;;  %v497_v51 = vrot.slane %v5149_v39, 1 }
  0x3b   : > { %8469 = vst [vmem:[#allocation35_spill] sm:$0xff] %v5161_v0  ;;  %v296_v3 = vrot.slane %v221_v50, 7  ;;  %v499_v10 = vrot.slane %v5152_v43, 1  ;;  %v297_v14 = vrot.slane %v222_v56, 7  ;;  %v371_v15 = vrot.slane %v222_v56, 6 }
  0x3c   : > { %645 = vrot.lane.b32.xlu1 %v5137_v28, %s4874_s29  ;;  %v5175_v19 = vsel %vm455_vm1, %v491_v38, %v492_v36  ;;  %v496_v27 = vrot.slane %v5155_v59, 1  ;;  %v224_v29 = vmax.f32 %v192_v60, 0.0  ;;  %v502_v48 = vrot.slane %v5164_v1, 1 }
  0x3d   : > { %643 = vrot.lane.b32.xlu0 %v5140_v30, %s4874_s29  ;;  %8470 = vst [vmem:[#allocation36_spill] sm:$0xff] %v5175_v19  ;;  %v504_v49 = vrot.slane %v5167_v2, 1  ;;  %v5182_v30 = vsel %vm265_vm0, %v219_v17, %v293_v44  ;;  %v299_v28 = vrot.slane %v223_v61, 7  ;;  %v5187_v36 = vsel %vm265_vm0, %v296_v3, %v297_v14 }
  0x3e   : > { %v5190_v38 = vsel %vm265_vm0, %v297_v14, %v371_v15  ;;  %v300_v56 = vrot.slane %v224_v29, 7  ;;  %v225_v60 = vmax.f32 %v193_v18, 0.0  ;;  %v5195_v8 = vsel %vm455_vm1, %v497_v51, %v499_v10  ;;  %v195_v14 = vld [vmem:[%s4961_s28 + $0xd0] sm:$0xff]  ;;  %v196_v15 = vld [vmem:[%s4961_s28 + $0xd8] sm:$0xff] }
  0x3f   : > { %8471 = vst [vmem:[#allocation37_spill] sm:$0xff] %v5195_v8  ;;  %v5198_v17 = vsel %vm265_vm0, %v221_v50, %v296_v3  ;;  %v372_v44 = vrot.slane %v224_v29, 6  ;;  %v226_v6 = vmax.f32 %v194_v37, 0.0  ;;  %v501_v52 = vrot.slane %v5182_v30, 1 }
  0x40   : > { %649 = vrot.lane.b32.xlu1 %v5161_v0, %s4874_s29  ;;  %v5201_v0 = vsel %vm455_vm1, %v496_v27, %v497_v51  ;;  %v5207_v18 = vsel %vm455_vm1, %v502_v48, %v504_v49  ;;  %v509_v10 = vrot.slane %v5190_v38, 1  ;;  %v506_v50 = vrot.slane %v5198_v17, 1 }
  0x41   : > { %647 = vrot.lane.b32.xlu0 %v5175_v19, %s4874_s29  ;;  %8472 = vst [vmem:[#allocation38_spill] sm:$0xff] %v5201_v0  ;;  %8473 = vst [vmem:[#allocation39_spill] sm:$0xff] %v5207_v18  ;;  %v507_v19 = vrot.slane %v5187_v36, 1  ;;  %v5215_v3 = vsel %vm265_vm0, %v299_v28, %v300_v56  ;;  %v5218_v51 = vsel %vm265_vm0, %v223_v61, %v299_v28  ;;  %v302_v27 = vrot.slane %v225_v60, 7  ;;  %v198_v28 = vld [vmem:[%s4961_s28 + $0xe8] sm:$0xff] }
  0x42   : > { %v5223_v29 = vsel %vm265_vm0, %v300_v56, %v372_v44  ;;  %v303_v37 = vrot.slane %v226_v6, 7  ;;  %v227_v49 = vmax.f32 %v195_v14, 0.0  ;;  %v228_v24 = vmax.f32 %v196_v15, 0.0 }
  0x43   : > { %v373_v16 = vrot.slane %v226_v6, 6  ;;  %v5229_v12 = vsel %vm455_vm1, %v507_v19, %v509_v10  ;;  %v5236_v61 = vsel %vm455_vm1, %v506_v50, %v507_v19  ;;  %v512_v56 = vrot.slane %v5215_v3, 1 }
  0x44   : > { %653 = vrot.lane.b32.xlu1 %v5195_v8, %s4874_s29  ;;  %v5226_v8 = vsel %vm455_vm1, %v501_v52, %v502_v48  ;;  %8475 = vst [vmem:[#allocation41_spill] sm:$0xff] %v5229_v12  ;;  %8476 = vst [vmem:[#allocation42_spill] sm:$0xff] %v5236_v61  ;;  %v514_v44 = vrot.slane %v5223_v29, 1  ;;  %v511_v14 = vrot.slane %v5218_v51, 1  ;;  %v5244_v52 = vsel %vm265_vm0, %v302_v27, %v303_v37 }
  0x45   : > { %651 = vrot.lane.b32.xlu0 %v5201_v0, %s4874_s29  ;;  %8474 = vst [vmem:[#allocation40_spill] sm:$0xff] %v5226_v8  ;;  %v5247_v6 = vsel %vm265_vm0, %v225_v60, %v302_v27  ;;  %v305_v48 = vrot.slane %v227_v49, 7  ;;  %v306_v15 = vrot.slane %v228_v24, 7  ;;  %v5250_v19 = vsel %vm265_vm0, %v303_v37, %v373_v16 }
  0x46   : > { %v374_v10 = vrot.slane %v228_v24, 6  ;;  %v229_v50 = vmax.f32 %v197_v53, 0.0  ;;  %v5255_v0 = vsel %vm455_vm1, %v511_v14, %v512_v56  ;;  %v5261_v60 = vsel %vm455_vm1, %v512_v56, %v514_v44 }
  0x47   : > { %8477 = vst [vmem:[#allocation43_spill] sm:$0xff] %v5255_v0  ;;  %8478 = vst [vmem:[#allocation44_spill] sm:$0xff] %v5261_v60  ;;  %v517_v16 = vrot.slane %v5244_v52, 1  ;;  %v519_v24 = vrot.slane %v5250_v19, 1  ;;  %v5266_v53 = vsel %vm265_vm0, %v305_v48, %v306_v15 }
  0x48   : > { %657 = vrot.lane.b32.xlu1 %v5207_v18, %s4874_s29  ;;  %v230_v18 = vmax.f32 %v198_v28, 0.0  ;;  %v5269_v27 = vsel %vm265_vm0, %v306_v15, %v374_v10  ;;  %v308_v37 = vrot.slane %v229_v50, 7  ;;  %v522_v44 = vrot.slane %v5266_v53, 1 }
  0x49   : > { %655 = vrot.lane.b32.xlu0 %v5226_v8, %s4874_s29  ;;  %v516_v8 = vrot.slane %v5247_v6, 1  ;;  %v5279_v56 = vsel %vm455_vm1, %v517_v16, %v519_v24  ;;  %v524_v15 = vrot.slane %v5269_v27, 1 }
  0x4a   : > { %v309_v28 = vrot.slane %v230_v18, 7  ;;  %v375_v14 = vrot.slane %v230_v18, 6  ;;  %8479 = vst [vmem:[#allocation45_spill] sm:$0xff] %v5279_v56 }
  0x4b   : > { %v5284_v10 = vsel %vm455_vm1, %v516_v8, %v517_v16  ;;  %v5301_v8 = vsel %vm455_vm1, %v522_v44, %v524_v15 }
  0x4c   : > { %661 = vrot.lane.b32.xlu1 %v5229_v12, %s4874_s29  ;;  %v5272_v12 = vsel %vm265_vm0, %v227_v49, %v305_v48  ;;  %8480 = vst [vmem:[#allocation46_spill] sm:$0xff] %v5284_v10  ;;  %v5288_v49 = vsel %vm265_vm0, %v308_v37, %v309_v28  ;;  %v5291_v48 = vsel %vm265_vm0, %v309_v28, %v375_v14  ;;  %8481 = vst [vmem:[#allocation47_spill] sm:$0xff] %v5301_v8 }
  0x4d   : > { %659 = vrot.lane.b32.xlu0 %v5236_v61, %s4874_s29  ;;  %v521_v18 = vrot.slane %v5272_v12, 1  ;;  %v527_v16 = vrot.slane %v5288_v49, 1  ;;  %v529_v24 = vrot.slane %v5291_v48, 1  ;;  %v535_v14 = vrot.slane %v4991_v31, 2 }
  0x50   : > { %665 = vrot.lane.b32.xlu1 %v5261_v60, %s4874_s29  ;;  %v5306_v60 = vsel %vm455_vm1, %v521_v18, %v522_v44  ;;  %v532_v44 = vrot.slane %v4976_v22, 2 }
  0x51   : > { %663 = vrot.lane.b32.xlu0 %v5255_v0, %s4874_s29  ;;  %v5294_v0 = vsel %vm265_vm0, %v229_v50, %v308_v37  ;;  %8482 = vst [vmem:[#allocation48_spill] sm:$0xff] %v5306_v60  ;;  %v5314_v50 = vsel %vm455_vm1, %v527_v16, %v529_v24  ;;  %v533_v37 = vrot.slane %v4984_v26, 2  ;;  %v538_v24 = vrot.slane %v4970_v20, 2 }
  0x52   : > { %v526_v28 = vrot.slane %v5294_v0, 1  ;;  %8483 = vst [vmem:[#allocation49_spill] sm:$0xff] %v5314_v50 }
  0x53   : > { %v5327_v18 = vsel %vm531_vm2, %v533_v37, %v535_v14  ;;  %v5332_v31 = vsel %vm531_vm2, %v532_v44, %v533_v37  ;;  %v543_v14 = vrot.slane %v4994_v32, 2  ;;  %v542_v37 = vrot.slane %v5013_v42, 2 }
  0x54   : > { %669 = vrot.lane.b32.xlu1 %v5279_v56, %s4874_s29  ;;  %v5319_v15 = vsel %vm455_vm1, %v526_v28, %v527_v16  ;;  %8485 = vst [vmem:[#allocation51_spill] sm:$0xff] %v5332_v31  ;;  %v537_v16 = vrot.slane %v4973_v21, 2 }
  0x55   : > { %667 = vrot.lane.b32.xlu0 %v5284_v10, %s4874_s29  ;;  %8484 = vst [vmem:[#allocation50_spill] sm:$0xff] %v5319_v15 }
  0x58   : > { %673 = vrot.lane.b32.xlu1 %v5301_v8, %s4874_s29 }
  0x59   : > { %671 = vrot.lane.b32.xlu0 %v5306_v60, %s4874_s29  ;;  %v540_v60 = vrot.slane %v4979_v23, 2  ;;  %v5345_v23 = vsel %vm531_vm2, %v537_v16, %v538_v24 }
  0x5a   : > { %8486 = vst [vmem:[#allocation52_spill] sm:$0xff] %v5345_v23 }
  0x5b   : > { %v5340_v28 = vsel %vm531_vm2, %v538_v24, %v540_v60  ;;  %v548_v60 = vrot.slane %v5041_v62, 2  ;;  %v547_v24 = vrot.slane %v5035_v58, 2 }
  0x5c   : > { %677 = vrot.lane.b32.xlu1 %v5314_v50, %s4874_s29 }
  0x5d   : > { %675 = vrot.lane.b32.xlu0 %v5319_v15, %s4874_s29  ;;  %v545_v15 = vrot.slane %v5022_v46, 2  ;;  %v5358_v46 = vsel %vm531_vm2, %v542_v37, %v543_v14  ;;  %s4881_s29 = smov 32  }
  0x5e   : > { %8487 = vst [vmem:[#allocation53_spill] sm:$0xff] %v5358_v46 }
  0x5f   : > { %v5353_v44 = vsel %vm531_vm2, %v543_v14, %v545_v15  ;;  %v553_v15 = vrot.slane %v5050_v4, 2  ;;  %v552_v14 = vrot.slane %v5053_v5, 2 }
  0x60   : > { %711 = vrot.lane.b32.xlu1 %v5327_v18, %s4875_s30 }
  0x61   : > { %709 = vrot.lane.b32.xlu0 %v5332_v31, %s4875_s30  ;;  %v550_v31 = vrot.slane %v5044_v63, 2  ;;  %v5371_v63 = vsel %vm531_vm2, %v547_v24, %v548_v60 }
  0x62   : > { %8488 = vst [vmem:[#allocation54_spill] sm:$0xff] %v5371_v63 }
  0x63   : > { %v5366_v16 = vsel %vm531_vm2, %v548_v60, %v550_v31  ;;  %v558_v31 = vrot.slane %v5083_v33, 2  ;;  %v557_v60 = vrot.slane %v5078_v25, 2 }
  0x64   : > { %715 = vrot.lane.b32.xlu1 %v5340_v28, %s4875_s30 }
  0x65   : > { %713 = vrot.lane.b32.xlu0 %v5345_v23, %s4875_s30  ;;  %v555_v23 = vrot.slane %v5057_v7, 2  ;;  %v5384_v7 = vsel %vm531_vm2, %v552_v14, %v553_v15 }
  0x66   : > { %8489 = vst [vmem:[#allocation55_spill] sm:$0xff] %v5384_v7 }
  0x67   : > { %v5379_v37 = vsel %vm531_vm2, %v553_v15, %v555_v23  ;;  %v563_v23 = vrot.slane %v5103_v54, 2  ;;  %v562_v15 = vrot.slane %v5096_v47, 2 }
  0x68   : > { %719 = vrot.lane.b32.xlu1 %v5353_v44, %s4875_s30 }
  0x69   : > { %717 = vrot.lane.b32.xlu0 %v5358_v46, %s4875_s30  ;;  %v560_v46 = vrot.slane %v5086_v35, 2  ;;  %v5397_v35 = vsel %vm531_vm2, %v557_v60, %v558_v31 }
  0x6a   : > { %8490 = vst [vmem:[#allocation56_spill] sm:$0xff] %v5397_v35 }
  0x6b   : > { %v5392_v24 = vsel %vm531_vm2, %v558_v31, %v560_v46  ;;  %v568_v46 = vrot.slane %v5124_v9, 2  ;;  %v567_v31 = vrot.slane %v5130_v13, 2 }
  0x6c   : > { %723 = vrot.lane.b32.xlu1 %v5366_v16, %s4875_s30 }
  0x6d   : > { %721 = vrot.lane.b32.xlu0 %v5371_v63, %s4875_s30  ;;  %v565_v63 = vrot.slane %v5106_v55, 2  ;;  %v5410_v55 = vsel %vm531_vm2, %v562_v15, %v563_v23 }
  0x6e   : > { %8492 = vst [vmem:[#allocation58_spill] sm:$0xff] %v5410_v55 }
  0x6f   : > { %v5405_v14 = vsel %vm531_vm2, %v563_v23, %v565_v63  ;;  %v573_v63 = vrot.slane %v5149_v39, 2  ;;  %v572_v23 = vrot.slane %v5155_v59, 2 }
  0x70   : > { %727 = vrot.lane.b32.xlu1 %v5379_v37, %s4875_s30  ;;  %8491 = vst [vmem:[#allocation57_spill] sm:$0xff] %v5405_v14 }
  0x71   : > { %725 = vrot.lane.b32.xlu0 %v5384_v7, %s4875_s30  ;;  %v570_v7 = vrot.slane %v5127_v11, 2  ;;  %v5423_v11 = vsel %vm531_vm2, %v567_v31, %v568_v46 }
  0x72   : > { %8493 = vst [vmem:[#allocation59_spill] sm:$0xff] %v5423_v11 }
  0x73   : > { %v5418_v60 = vsel %vm531_vm2, %v568_v46, %v570_v7  ;;  %v578_v7 = vrot.slane %v5164_v1, 2  ;;  %v577_v46 = vrot.slane %v5182_v30, 2 }
  0x74   : > { %731 = vrot.lane.b32.xlu1 %v5392_v24, %s4875_s30 }
  0x75   : > { %729 = vrot.lane.b32.xlu0 %v5397_v35, %s4875_s30  ;;  %v575_v35 = vrot.slane %v5152_v43, 2  ;;  %v5436_v43 = vsel %vm531_vm2, %v572_v23, %v573_v63 }
  0x76   : > { %8494 = vst [vmem:[#allocation60_spill] sm:$0xff] %v5436_v43 }
  0x77   : > { %v5431_v15 = vsel %vm531_vm2, %v573_v63, %v575_v35  ;;  %v583_v35 = vrot.slane %v5187_v36, 2  ;;  %v582_v63 = vrot.slane %v5198_v17, 2 }
  0x78   : > { %735 = vrot.lane.b32.xlu1 %v5405_v14, %s4875_s30 }
  0x79   : > { %733 = vrot.lane.b32.xlu0 %v5410_v55, %s4875_s30  ;;  %v580_v55 = vrot.slane %v5167_v2, 2  ;;  %v5449_v2 = vsel %vm531_vm2, %v577_v46, %v578_v7 }
  0x7a   : > { %8495 = vst [vmem:[#allocation61_spill] sm:$0xff] %v5449_v2 }
  0x7b   : > { %v5444_v31 = vsel %vm531_vm2, %v578_v7, %v580_v55  ;;  %v588_v55 = vrot.slane %v5215_v3, 2  ;;  %v587_v7 = vrot.slane %v5218_v51, 2 }
  0x7c   : > { %739 = vrot.lane.b32.xlu1 %v5418_v60, %s4875_s30 }
  0x7d   : > { %737 = vrot.lane.b32.xlu0 %v5423_v11, %s4875_s30  ;;  %v585_v11 = vrot.slane %v5190_v38, 2  ;;  %v5462_v38 = vsel %vm531_vm2, %v582_v63, %v583_v35 }
  0x7e   : > { %8496 = vst [vmem:[#allocation62_spill] sm:$0xff] %v5462_v38 }
  0x7f   : > { %v5457_v23 = vsel %vm531_vm2, %v583_v35, %v585_v11  ;;  %v593_v11 = vrot.slane %v5244_v52, 2  ;;  %v592_v35 = vrot.slane %v5247_v6, 2 }
  0x80   : > { %743 = vrot.lane.b32.xlu1 %v5431_v15, %s4875_s30 }
  0x81   : > { %741 = vrot.lane.b32.xlu0 %v5436_v43, %s4875_s30  ;;  %v590_v43 = vrot.slane %v5223_v29, 2  ;;  %v5475_v29 = vsel %vm531_vm2, %v587_v7, %v588_v55 }
  0x82   : > { %8497 = vst [vmem:[#allocation63_spill] sm:$0xff] %v5475_v29 }
  0x83   : > { %v5470_v46 = vsel %vm531_vm2, %v588_v55, %v590_v43  ;;  %v598_v43 = vrot.slane %v5266_v53, 2  ;;  %v597_v55 = vrot.slane %v5272_v12, 2 }
  0x84   : > { %747 = vrot.lane.b32.xlu1 %v5444_v31, %s4875_s30 }
  0x85   : > { %745 = vrot.lane.b32.xlu0 %v5449_v2, %s4875_s30  ;;  %v595_v2 = vrot.slane %v5250_v19, 2  ;;  %v5488_v19 = vsel %vm531_vm2, %v592_v35, %v593_v11 }
  0x86   : > { %8498 = vst [vmem:[#allocation64_spill] sm:$0xff] %v5488_v19 }
  0x87   : > { %v5483_v63 = vsel %vm531_vm2, %v593_v11, %v595_v2  ;;  %v603_v2 = vrot.slane %v5288_v49, 2  ;;  %v602_v11 = vrot.slane %v5294_v0, 2 }
  0x88   : > { %751 = vrot.lane.b32.xlu1 %v5457_v23, %s4875_s30 }
  0x89   : > { %749 = vrot.lane.b32.xlu0 %v5462_v38, %s4875_s30  ;;  %v600_v38 = vrot.slane %v5269_v27, 2  ;;  %v5501_v27 = vsel %vm531_vm2, %v597_v55, %v598_v43 }
  0x8a   : > { %8499 = vst [vmem:[#allocation65_spill] sm:$0xff] %v5501_v27 }
  0x8b   : > { %v5496_v7 = vsel %vm531_vm2, %v598_v43, %v600_v38 }
  0x8c   : > { %755 = vrot.lane.b32.xlu1 %v5470_v46, %s4875_s30 }
  0x8d   : > { %753 = vrot.lane.b32.xlu0 %v5475_v29, %s4875_s30  ;;  %v605_v29 = vrot.slane %v5291_v48, 2 }
  0x8f   : > { %v5509_v35 = vsel %vm531_vm2, %v603_v2, %v605_v29 }
  0x90   : > { %759 = vrot.lane.b32.xlu1 %v5483_v63, %s4875_s30  ;;  %8500 = vst [vmem:[#allocation66_spill] sm:$0xff] %v5509_v35 }
  0x91   : > { %757 = vrot.lane.b32.xlu0 %v5488_v19, %s4875_s30  ;;  %v5514_v19 = vsel %vm531_vm2, %v602_v11, %v603_v2 }
  0x92   : > { %8502 = vst [vmem:[#allocation68_spill] sm:$0xff] %v5514_v19 }
  0x94   : > { %763 = vrot.lane.b32.xlu1 %v5496_v7, %s4875_s30 }
  0x95   : > { %761 = vrot.lane.b32.xlu0 %v5501_v27, %s4875_s30 }
  0x96   : > { %v5511_v38 = vpop.permute.xlu1 %623 }
  0x97   : > { %8501 = vst [vmem:[#allocation67_spill] sm:$0xff] %v5511_v38  ;;  %v5516_v48 = vpop.permute.xlu0 %619 }
  0x98   : > { %8503 = vst [vmem:[#allocation69_spill] sm:$0xff] %v5516_v48  ;;  %767 = vrot.lane.b32.xlu1 %v5509_v35, %s4875_s30 }
  0x99   : > { %765 = vrot.lane.b32.xlu0 %v5514_v19, %s4875_s30 }
  0x9a   : > { %v5522_v43 = vpop.permute.xlu1 %625 }
  0x9b   : > { %8504 = vst [vmem:[#allocation70_spill] sm:$0xff] %v5522_v43  ;;  %v5524_v55 = vpop.permute.xlu0 %621 }
  0x9c   : > { %8505 = vst [vmem:[#allocation71_spill] sm:$0xff] %v5524_v55  ;;  %801 = vrot.lane.b32.xlu1 %v4984_v26, %s4876_s4 }
  0x9d   : > { %799 = vrot.lane.b32.xlu0 %v4976_v22, %s4876_s4 }
  0x9e   : > { %v5530_v29 = vpop.permute.xlu1 %629 }
  0x9f   : > { %8506 = vst [vmem:[#allocation72_spill] sm:$0xff] %v5530_v29  ;;  %v5532_v2 = vpop.permute.xlu0 %627 }
  0xa0   : > { %8507 = vst [vmem:[#allocation73_spill] sm:$0xff] %v5532_v2  ;;  %805 = vrot.lane.b32.xlu1 %v4970_v20, %s4876_s4  ;;  %v8554_v20 = vld [vmem:[#allocation44_spill] sm:$0xff] }
  0xa1   : > { %803 = vrot.lane.b32.xlu0 %v4973_v21, %s4876_s4  ;;  %v8553_v21 = vld [vmem:[#allocation41_spill] sm:$0xff] }
  0xa2   : > { %v5538_v11 = vpop.permute.xlu1 %633 }
  0xa3   : > { %8508 = vst [vmem:[#allocation74_spill] sm:$0xff] %v5538_v11  ;;  %v5540_v43 = vpop.permute.xlu0 %631 }
  0xa4   : > { %8509 = vst [vmem:[#allocation75_spill] sm:$0xff] %v5540_v43  ;;  %809 = vrot.lane.b32.xlu1 %v4994_v32, %s4876_s4 }
  0xa5   : > { %807 = vrot.lane.b32.xlu0 %v5013_v42, %s4876_s4 }
  0xa6   : > { %v5546_v38 = vpop.permute.xlu1 %637 }
  0xa7   : > { %8510 = vst [vmem:[#allocation76_spill] sm:$0xff] %v5546_v38  ;;  %v5548_v29 = vpop.permute.xlu0 %635 }
  0xa8   : > { %8511 = vst [vmem:[#allocation77_spill] sm:$0xff] %v5548_v29  ;;  %813 = vrot.lane.b32.xlu1 %v5041_v62, %s4876_s4 }
  0xa9   : > { %811 = vrot.lane.b32.xlu0 %v5035_v58, %s4876_s4 }
  0xaa   : > { %v5554_v2 = vpop.permute.xlu1 %641 }
  0xab   : > { %8512 = vst [vmem:[#allocation78_spill] sm:$0xff] %v5554_v2  ;;  %v5556_v11 = vpop.permute.xlu0 %639 }
  0xac   : > { %8513 = vst [vmem:[#allocation79_spill] sm:$0xff] %v5556_v11  ;;  %817 = vrot.lane.b32.xlu1 %v5050_v4, %s4876_s4 }
  0xad   : > { %815 = vrot.lane.b32.xlu0 %v5053_v5, %s4876_s4 }
  0xae   : > { %v5562_v43 = vpop.permute.xlu1 %645 }
  0xaf   : > { %8514 = vst [vmem:[#allocation80_spill] sm:$0xff] %v5562_v43  ;;  %v5564_v38 = vpop.permute.xlu0 %643 }
  0xb0   : > { %8515 = vst [vmem:[#allocation81_spill] sm:$0xff] %v5564_v38  ;;  %821 = vrot.lane.b32.xlu1 %v5083_v33, %s4876_s4 }
  0xb1   : > { %819 = vrot.lane.b32.xlu0 %v5078_v25, %s4876_s4 }
  0xb2   : > { %v5570_v29 = vpop.permute.xlu1 %649 }
  0xb3   : > { %8516 = vst [vmem:[#allocation82_spill] sm:$0xff] %v5570_v29  ;;  %v5572_v2 = vpop.permute.xlu0 %647 }
  0xb4   : > { %8517 = vst [vmem:[#allocation83_spill] sm:$0xff] %v5572_v2  ;;  %825 = vrot.lane.b32.xlu1 %v5103_v54, %s4876_s4 }
  0xb5   : > { %823 = vrot.lane.b32.xlu0 %v5096_v47, %s4876_s4 }
  0xb6   : > { %v5578_v11 = vpop.permute.xlu1 %653 }
  0xb7   : > { %8518 = vst [vmem:[#allocation84_spill] sm:$0xff] %v5578_v11  ;;  %v5580_v43 = vpop.permute.xlu0 %651 }
  0xb8   : > { %8519 = vst [vmem:[#allocation85_spill] sm:$0xff] %v5580_v43  ;;  %829 = vrot.lane.b32.xlu1 %v5124_v9, %s4876_s4 }
  0xb9   : > { %827 = vrot.lane.b32.xlu0 %v5130_v13, %s4876_s4 }
  0xba   : > { %v5586_v38 = vpop.permute.xlu1 %657 }
  0xbb   : > { %v5588_v29 = vpop.permute.xlu0 %655 }
  0xbc   : > { %833 = vrot.lane.b32.xlu1 %v5149_v39, %s4876_s4  ;;  %v5622_v39 = vld [vmem:[%s4961_s28 + $0xf8] sm:$0xff] }
  0xbd   : > { %831 = vrot.lane.b32.xlu0 %v5155_v59, %s4876_s4  ;;  %v199_v59 = vld [vmem:[%s4961_s28 + $0xf0] sm:$0xff]  ;;  %v8334_v47 = vmax.f32 %v5622_v39, 0.0 }
  0xbe   : > { %v5594_v11 = vpop.permute.xlu1 %661  ;;  %v231_v9 = vmax.f32 %v199_v59, 0.0 }
  0xbf   : > { %v5596_v43 = vpop.permute.xlu0 %659  ;;  %v5641_v5 = vrot.slane %v8334_v47, 7 }
  0xc0   : > { %837 = vrot.lane.b32.xlu1 %v5164_v1, %s4876_s4  ;;  %v311_v33 = vrot.slane %v231_v9, 7 }
  0xc1   : > { %835 = vrot.lane.b32.xlu0 %v5182_v30, %s4876_s4 }
  0xc2   : > { %v5602_v2 = vpop.permute.xlu1 %665  ;;  %v5653_v58 = vsel %vm265_vm0, %v311_v33, %v5641_v5  ;;  %v5658_v42 = vsel %vm265_vm0, %v231_v9, %v311_v33 }
  0xc3   : > { %v5604_v26 = vpop.permute.xlu0 %663 }
  0xc4   : > { %841 = vrot.lane.b32.xlu1 %v5187_v36, %s4876_s4 }
  0xc5   : > { %839 = vrot.lane.b32.xlu0 %v5198_v17, %s4876_s4 }
  0xc6   : > { %v5610_v55 = vpop.permute.xlu1 %669 }
  0xc7   : > { %v5612_v22 = vpop.permute.xlu0 %667 }
  0xc8   : > { %845 = vrot.lane.b32.xlu1 %v5215_v3, %s4876_s4 }
  0xc9   : > { %843 = vrot.lane.b32.xlu0 %v5218_v51, %s4876_s4 }
  0xca   : > { %v5618_v48 = vpop.permute.xlu1 %673 }
  0xcb   : > { %v5624_v13 = vpop.permute.xlu0 %671 }
  0xcc   : > { %849 = vrot.lane.b32.xlu1 %v5244_v52, %s4876_s4 }
  0xcd   : > { %847 = vrot.lane.b32.xlu0 %v5247_v6, %s4876_s4 }
  0xce   : > { %v5631_v54 = vpop.permute.xlu1 %677 }
  0xcf   : > { %v5633_v25 = vpop.permute.xlu0 %675 }
  0xd0   : > { %853 = vrot.lane.b32.xlu1 %v5266_v53, %s4876_s4 }
  0xd1   : > { %851 = vrot.lane.b32.xlu0 %v5272_v12, %s4876_s4 }
  0xd2   : > { %v5643_v4 = vpop.permute.xlu1 %711 }
  0xd3   : > { %8520 = vst [vmem:[#allocation86_spill] sm:$0xff] %v5643_v4  ;;  %v5645_v59 = vpop.permute.xlu0 %709 }
  0xd4   : > { %8521 = vst [vmem:[#allocation87_spill] sm:$0xff] %v5645_v59  ;;  %857 = vrot.lane.b32.xlu1 %v5288_v49, %s4876_s4 }
  0xd5   : > { %855 = vrot.lane.b32.xlu0 %v5294_v0, %s4876_s4 }
  0xd6   : > { %v5655_v62 = vpop.permute.xlu1 %715 }
  0xd7   : > { %8522 = vst [vmem:[#allocation88_spill] sm:$0xff] %v5655_v62  ;;  %v5660_v47 = vpop.permute.xlu0 %713 }
  0xd8   : > { %8523 = vst [vmem:[#allocation89_spill] sm:$0xff] %v5660_v47  ;;  %861 = vrot.lane.b32.xlu1 %v5653_v58, %s4876_s4 }
  0xd9   : > { %859 = vrot.lane.b32.xlu0 %v5658_v42, %s4876_s4  ;;  %s4883_s4 = smov 48  }
  0xda   : > { %v5666_v4 = vpop.permute.xlu1 %719 }
  0xdb   : > { %8524 = vst [vmem:[#allocation90_spill] sm:$0xff] %v5666_v4  ;;  %v5668_v59 = vpop.permute.xlu0 %717 }
  0xdc   : > { %8525 = vst [vmem:[#allocation91_spill] sm:$0xff] %v5668_v59  ;;  %897 = vrot.lane.b32.xlu1 %v5019_v45, %s4877_s5  ;;  %v8530_v45 = vld [vmem:[#allocation13_spill] sm:$0xff]  ;;  %v8534_v59 = vld [vmem:[#allocation20_spill] sm:$0xff] }
  0xdd   : > { %895 = vrot.lane.b32.xlu0 %v5007_v40, %s4877_s5 }
  0xde   : > { %v5674_v33 = vpop.permute.xlu1 %723 }
  0xdf   : > { %8526 = vst [vmem:[#allocation92_spill] sm:$0xff] %v5674_v33  ;;  %v5676_v9 = vpop.permute.xlu0 %721 }
  0xe0   : > { %8527 = vst [vmem:[#allocation93_spill] sm:$0xff] %v5676_v9  ;;  %901 = vrot.lane.b32.xlu1 %v5010_v41, %s4877_s5  ;;  %v8533_v9 = vld [vmem:[#allocation19_spill] sm:$0xff] }
  0xe1   : > { %899 = vrot.lane.b32.xlu0 %v4998_v34, %s4877_s5  ;;  %v8551_v41 = vld [vmem:[#allocation39_spill] sm:$0xff] }
  0xe2   : > { %v5682_v4 = vpop.permute.xlu1 %727 }
  0xe3   : > { %8528 = vst [vmem:[#allocation94_spill] sm:$0xff] %v5682_v4  ;;  %v5684_v62 = vpop.permute.xlu0 %725 }
  0xe4   : > { %8529 = vst [vmem:[#allocation95_spill] sm:$0xff] %v5684_v62  ;;  %905 = vrot.lane.b32.xlu1 %v5032_v57, %s4877_s5  ;;  %v8537_v62 = vld [vmem:[#allocation21_spill] sm:$0xff] }
  0xe5   : > { %903 = vrot.lane.b32.xlu0 %v8530_v45, %s4877_s5  ;;  %v8538_v57 = vld [vmem:[#allocation25_spill] sm:$0xff] }
  0xe6   : > { %v5690_v40 = vpop.permute.xlu1 %731 }
  0xe7   : > { %8531 = vst [vmem:[#allocation96_spill] sm:$0xff] %v5690_v40  ;;  %v5692_v33 = vpop.permute.xlu0 %729 }
  0xe8   : > { %8532 = vst [vmem:[#allocation97_spill] sm:$0xff] %v5692_v33  ;;  %909 = vrot.lane.b32.xlu1 %v8533_v9, %s4877_s5  ;;  %v8541_v33 = vld [vmem:[#allocation27_spill] sm:$0xff]  ;;  %v8542_v9 = vld [vmem:[#allocation28_spill] sm:$0xff] }
  0xe9   : > { %907 = vrot.lane.b32.xlu0 %v8534_v59, %s4877_s5 }
  0xea   : > { %v5698_v47 = vpop.permute.xlu1 %735 }
  0xeb   : > { %8535 = vst [vmem:[#allocation98_spill] sm:$0xff] %v5698_v47  ;;  %v5700_v4 = vpop.permute.xlu0 %733 }
  0xec   : > { %8536 = vst [vmem:[#allocation99_spill] sm:$0xff] %v5700_v4  ;;  %913 = vrot.lane.b32.xlu1 %v8537_v62, %s4877_s5  ;;  %v8545_v4 = vld [vmem:[#allocation31_spill] sm:$0xff]  ;;  %v8546_v62 = vld [vmem:[#allocation32_spill] sm:$0xff] }
  0xed   : > { %911 = vrot.lane.b32.xlu0 %v8538_v57, %s4877_s5 }
  0xee   : > { %v5706_v45 = vpop.permute.xlu1 %739 }
  0xef   : > { %8539 = vst [vmem:[#allocation100_spill] sm:$0xff] %v5706_v45  ;;  %v5708_v40 = vpop.permute.xlu0 %737 }
  0xf0   : > { %8540 = vst [vmem:[#allocation101_spill] sm:$0xff] %v5708_v40  ;;  %917 = vrot.lane.b32.xlu1 %v8541_v33, %s4877_s5  ;;  %v8547_v40 = vld [vmem:[#allocation35_spill] sm:$0xff]  ;;  %v8548_v33 = vld [vmem:[#allocation36_spill] sm:$0xff] }
  0xf1   : > { %915 = vrot.lane.b32.xlu0 %v8542_v9, %s4877_s5 }
  0xf2   : > { %v5714_v59 = vpop.permute.xlu1 %743 }
  0xf3   : > { %8543 = vst [vmem:[#allocation102_spill] sm:$0xff] %v5714_v59  ;;  %v5716_v47 = vpop.permute.xlu0 %741 }
  0xf4   : > { %8544 = vst [vmem:[#allocation103_spill] sm:$0xff] %v5716_v47  ;;  %921 = vrot.lane.b32.xlu1 %v8545_v4, %s4877_s5  ;;  %v8549_v47 = vld [vmem:[#allocation37_spill] sm:$0xff]  ;;  %v8550_v4 = vld [vmem:[#allocation38_spill] sm:$0xff] }
  0xf5   : > { %919 = vrot.lane.b32.xlu0 %v8546_v62, %s4877_s5 }
  0xf6   : > { %v5722_v57 = vpop.permute.xlu1 %747 }
  0xf7   : > { %v5724_v45 = vpop.permute.xlu0 %745 }
  0xf8   : > { %925 = vrot.lane.b32.xlu1 %v8547_v40, %s4877_s5  ;;  %v8552_v40 = vld [vmem:[#allocation40_spill] sm:$0xff] }
  0xf9   : > { %923 = vrot.lane.b32.xlu0 %v8548_v33, %s4877_s5 }
  0xfa   : > { %v5730_v9 = vpop.permute.xlu1 %751 }
  0xfb   : > { %v5732_v59 = vpop.permute.xlu0 %749 }
  0xfc   : > { %929 = vrot.lane.b32.xlu1 %v8549_v47, %s4877_s5 }
  0xfd   : > { %927 = vrot.lane.b32.xlu0 %v8550_v4, %s4877_s5 }
  0xfe   : > { %v5738_v62 = vpop.permute.xlu1 %755 }
  0xff   : > { %v5740_v34 = vpop.permute.xlu0 %753 }
 0x100   : > { %933 = vrot.lane.b32.xlu1 %v8551_v41, %s4877_s5  ;;  %v8555_v41 = vld [vmem:[#allocation43_spill] sm:$0xff] }
 0x101   : > { %931 = vrot.lane.b32.xlu0 %v8552_v40, %s4877_s5  ;;  %v8556_v40 = vmax.f32 %v5622_v39, 0.0  ;;  %v610_v39 = vrot.slane %v5653_v58, 1 }
 0x102   : > { %v5746_v33 = vpop.permute.xlu1 %759 }
 0x103   : > { %v5748_v32 = vpop.permute.xlu0 %757  ;;  %v376_v19 = vrot.slane %v8556_v40, 6  ;;  %v8559_v40 = vld [vmem:[#allocation48_spill] sm:$0xff] }
 0x104   : > { %937 = vrot.lane.b32.xlu1 %v8553_v21, %s4877_s5 }
 0x105   : > { %935 = vrot.lane.b32.xlu0 %v5236_v61, %s4877_s5 }
 0x106   : > { %v5754_v4 = vpop.permute.xlu1 %763 }
 0x107   : > { %v5756_v47 = vpop.permute.xlu0 %761 }
 0x108   : > { %941 = vrot.lane.b32.xlu1 %v8554_v20, %s4877_s5  ;;  %v5776_v20 = vsel %vm265_vm0, %v5641_v5, %v376_v19  ;;  %v8562_v5 = vld [vmem:[#allocation50_spill] sm:$0xff] }
 0x109   : > { %939 = vrot.lane.b32.xlu0 %v8555_v41, %s4877_s5 }
 0x10a   : > { %v5764_v35 = vpop.permute.xlu1 %767 }
 0x10b   : > { %v5766_v27 = vpop.permute.xlu0 %765 }
 0x10c   : > { %945 = vrot.lane.b32.xlu1 %v5279_v56, %s4877_s5  ;;  %v612_v56 = vrot.slane %v5776_v20, 1 }
 0x10d   : > { %943 = vrot.lane.b32.xlu0 %v5284_v10, %s4877_s5  ;;  %v609_v10 = vrot.slane %v5658_v42, 1 }
 0x10e   : > { %v5772_v61 = vpop.permute.xlu1 %801  ;;  %v5796_v19 = vsel %vm455_vm1, %v610_v39, %v612_v56  ;;  %v8569_v56 = vld [vmem:[#allocation51_spill] sm:$0xff] }
 0x10f   : > { %8557 = vst [vmem:[#allocation104_spill] sm:$0xff] %v5772_v61  ;;  %v5778_v41 = vpop.permute.xlu0 %799  ;;  %8563 = vst [vmem:[#allocation108_spill] sm:$0xff] %v5796_v19 }
 0x110   : > { %8558 = vst [vmem:[#allocation105_spill] sm:$0xff] %v5778_v41  ;;  %949 = vrot.lane.b32.xlu1 %v5301_v8, %s4877_s5 }
 0x111   : > { %947 = vrot.lane.b32.xlu0 %v8559_v40, %s4877_s5  ;;  %v5801_v40 = vsel %vm455_vm1, %v609_v10, %v610_v39 }
 0x112   : > { %v5787_v21 = vpop.permute.xlu1 %805  ;;  %8565 = vst [vmem:[#allocation110_spill] sm:$0xff] %v5801_v40 }
 0x113   : > { %8560 = vst [vmem:[#allocation106_spill] sm:$0xff] %v5787_v21  ;;  %v5789_v61 = vpop.permute.xlu0 %803 }
 0x114   : > { %8561 = vst [vmem:[#allocation107_spill] sm:$0xff] %v5789_v61  ;;  %953 = vrot.lane.b32.xlu1 %v5314_v50, %s4877_s5 }
 0x115   : > { %951 = vrot.lane.b32.xlu0 %v8562_v5, %s4877_s5 }
 0x116   : > { %v5798_v41 = vpop.permute.xlu1 %809 }
 0x117   : > { %8564 = vst [vmem:[#allocation109_spill] sm:$0xff] %v5798_v41  ;;  %v5803_v8 = vpop.permute.xlu0 %807  ;;  %v8572_v41 = vld [vmem:[#allocation52_spill] sm:$0xff] }
 0x118   : > { %8566 = vst [vmem:[#allocation111_spill] sm:$0xff] %v5803_v8  ;;  %957 = vrot.lane.b32.xlu1 %v5796_v19, %s4877_s5 }
 0x119   : > { %955 = vrot.lane.b32.xlu0 %v5801_v40, %s4877_s5 }
 0x11a   : > { %v5809_v21 = vpop.permute.xlu1 %813 }
 0x11b   : > { %8567 = vst [vmem:[#allocation112_spill] sm:$0xff] %v5809_v21  ;;  %v5811_v61 = vpop.permute.xlu0 %811 }
 0x11c   : > { %8568 = vst [vmem:[#allocation113_spill] sm:$0xff] %v5811_v61  ;;  %993 = vrot.lane.b32.xlu1 %v5327_v18, %s4878_s6  ;;  %v8575_v18 = vld [vmem:[#allocation53_spill] sm:$0xff] }
 0x11d   : > { %991 = vrot.lane.b32.xlu0 %v8569_v56, %s4878_s6 }
 0x11e   : > { %v5817_v10 = vpop.permute.xlu1 %817 }
 0x11f   : > { %8570 = vst [vmem:[#allocation51_spill] sm:$0xff] %v5817_v10  ;;  %v5819_v39 = vpop.permute.xlu0 %815 }
 0x120   : > { %8571 = vst [vmem:[#allocation114_spill] sm:$0xff] %v5819_v39  ;;  %997 = vrot.lane.b32.xlu1 %v5340_v28, %s4878_s6  ;;  %v8578_v39 = vld [vmem:[#allocation54_spill] sm:$0xff] }
 0x121   : > { %995 = vrot.lane.b32.xlu0 %v8572_v41, %s4878_s6 }
 0x122   : > { %v5825_v21 = vpop.permute.xlu1 %821 }
 0x123   : > { %8573 = vst [vmem:[#allocation52_spill] sm:$0xff] %v5825_v21  ;;  %v5827_v61 = vpop.permute.xlu0 %819 }
 0x124   : > { %8574 = vst [vmem:[#allocation115_spill] sm:$0xff] %v5827_v61  ;;  %1001 = vrot.lane.b32.xlu1 %v5353_v44, %s4878_s6  ;;  %v8581_v61 = vld [vmem:[#allocation55_spill] sm:$0xff] }
 0x125   : > { %999 = vrot.lane.b32.xlu0 %v8575_v18, %s4878_s6 }
 0x126   : > { %v5833_v56 = vpop.permute.xlu1 %825 }
 0x127   : > { %8576 = vst [vmem:[#allocation53_spill] sm:$0xff] %v5833_v56  ;;  %v5835_v10 = vpop.permute.xlu0 %823 }
 0x128   : > { %8577 = vst [vmem:[#allocation116_spill] sm:$0xff] %v5835_v10  ;;  %1005 = vrot.lane.b32.xlu1 %v5366_v16, %s4878_s6  ;;  %v8584_v10 = vld [vmem:[#allocation56_spill] sm:$0xff] }
 0x129   : > { %1003 = vrot.lane.b32.xlu0 %v8578_v39, %s4878_s6 }
 0x12a   : > { %v5841_v8 = vpop.permute.xlu1 %829 }
 0x12b   : > { %8579 = vst [vmem:[#allocation54_spill] sm:$0xff] %v5841_v8  ;;  %v5843_v21 = vpop.permute.xlu0 %827 }
 0x12c   : > { %8580 = vst [vmem:[#allocation117_spill] sm:$0xff] %v5843_v21  ;;  %1009 = vrot.lane.b32.xlu1 %v5379_v37, %s4878_s6  ;;  %v1376_v21 = vsel %vm1357_vm3, %v5182_v30, %v5588_v29  ;;  %v1379_v29 = vsel %vm1357_vm3, %v5187_v36, %v5594_v11 }
 0x12d   : > { %1007 = vrot.lane.b32.xlu0 %v8581_v61, %s4878_s6  ;;  %v1407_v5 = vsel %vm1388_vm4, %v1376_v21, %v5724_v45  ;;  %v1378_v21 = vsel %vm1357_vm3, %v5198_v17, %v5596_v43  ;;  %v1381_v43 = vsel %vm1357_vm3, %v5215_v3, %v5602_v2 }
 0x12e   : > { %v5849_v40 = vpop.permute.xlu1 %833 }
 0x12f   : > { %8582 = vst [vmem:[#allocation55_spill] sm:$0xff] %v5849_v40  ;;  %v5851_v56 = vpop.permute.xlu0 %831  ;;  %v1377_v40 = vsel %vm1357_vm3, %v5164_v1, %v5586_v38 }
 0x130   : > { %8583 = vst [vmem:[#allocation118_spill] sm:$0xff] %v5851_v56  ;;  %1013 = vrot.lane.b32.xlu1 %v5392_v24, %s4878_s6  ;;  %v8587_v56 = vld [vmem:[#allocation58_spill] sm:$0xff] }
 0x131   : > { %1011 = vrot.lane.b32.xlu0 %v8584_v10, %s4878_s6 }
 0x132   : > { %v5857_v19 = vpop.permute.xlu1 %837 }
 0x133   : > { %8585 = vst [vmem:[#allocation56_spill] sm:$0xff] %v5857_v19  ;;  %v5859_v8 = vpop.permute.xlu0 %835  ;;  %v1408_v19 = vsel %vm1388_vm4, %v1377_v40, %v5722_v57  ;;  %v8588_v57 = vld [vmem:[#allocation59_spill] sm:$0xff]  ;;  %v1409_v40 = vsel %vm1388_vm4, %v1378_v21, %v5732_v59  ;;  %v1380_v59 = vsel %vm1357_vm3, %v5218_v51, %v5604_v26  ;;  %v1383_v26 = vsel %vm1357_vm3, %v5244_v52, %v5610_v55 }
 0x134   : > { %8586 = vst [vmem:[#allocation119_spill] sm:$0xff] %v5859_v8  ;;  %1017 = vrot.lane.b32.xlu1 %v5405_v14, %s4878_s6  ;;  %v1411_v21 = vsel %vm1388_vm4, %v1380_v59, %v5740_v34  ;;  %v1382_v34 = vsel %vm1357_vm3, %v5247_v6, %v5612_v22  ;;  %v1385_v22 = vsel %vm1357_vm3, %v5266_v53, %v5618_v48 }
 0x135   : > { %1015 = vrot.lane.b32.xlu0 %v8587_v56, %s4878_s6 }
 0x136   : > { %v842_v8 = vpop.permute.xlu1 %841 }
 0x137   : > { %v5876_v50 = vsel %vm1419_vm5, %v1408_v19, %v842_v8  ;;  %v840_v38 = vpop.permute.xlu0 %839  ;;  %v1410_v8 = vsel %vm1388_vm4, %v1379_v29, %v5730_v9  ;;  %v8589_v9 = vld [vmem:[#allocation60_spill] sm:$0xff] }
 0x138   : > { %v5879_v14 = vsel %vm1419_vm5, %v1407_v5, %v840_v38  ;;  %1021 = vrot.lane.b32.xlu1 %v5418_v60, %s4878_s6  ;;  %v1412_v38 = vsel %vm1388_vm4, %v1381_v43, %v5738_v62  ;;  %v8590_v62 = vld [vmem:[#allocation61_spill] sm:$0xff]  ;;  %v1413_v43 = vsel %vm1388_vm4, %v1382_v34, %v5748_v32  ;;  %v1384_v32 = vsel %vm1357_vm3, %v5272_v12, %v5624_v13 }
 0x139   : > { %1019 = vrot.lane.b32.xlu0 %v8588_v57, %s4878_s6  ;;  %v1387_v13 = vsel %vm1357_vm3, %v5288_v49, %v5631_v54 }
 0x13a   : > { %v846_v45 = vpop.permute.xlu1 %845 }
 0x13b   : > { %v5896_v5 = vsel %vm1419_vm5, %v1410_v8, %v846_v45  ;;  %v844_v19 = vpop.permute.xlu0 %843 }
 0x13c   : > { %v5899_v11 = vsel %vm1419_vm5, %v1409_v40, %v844_v19  ;;  %1025 = vrot.lane.b32.xlu1 %v5431_v15, %s4878_s6  ;;  %v1414_v40 = vsel %vm1388_vm4, %v1383_v26, %v5746_v33  ;;  %v8591_v33 = vld [vmem:[#allocation62_spill] sm:$0xff] }
 0x13d   : > { %1023 = vrot.lane.b32.xlu0 %v8589_v9, %s4878_s6 }
 0x13e   : > { %v850_v29 = vpop.permute.xlu1 %849 }
 0x13f   : > { %v5916_v8 = vsel %vm1419_vm5, %v1412_v38, %v850_v29  ;;  %v848_v45 = vpop.permute.xlu0 %847  ;;  %v1416_v29 = vsel %vm1388_vm4, %v1385_v22, %v5754_v4  ;;  %v8592_v4 = vld [vmem:[#allocation63_spill] sm:$0xff] }
 0x140   : > { %v5919_v2 = vsel %vm1419_vm5, %v1411_v21, %v848_v45  ;;  %1029 = vrot.lane.b32.xlu1 %v5444_v31, %s4878_s6  ;;  %v1415_v45 = vsel %vm1388_vm4, %v1384_v32, %v5756_v47  ;;  %v1386_v47 = vsel %vm1357_vm3, %v5294_v0, %v5633_v25  ;;  %v8593_v32 = vld [vmem:[#allocation64_spill] sm:$0xff] }
 0x141   : > { %1027 = vrot.lane.b32.xlu0 %v8590_v62, %s4878_s6 }
 0x142   : > { %v854_v19 = vpop.permute.xlu1 %853 }
 0x143   : > { %v5936_v59 = vsel %vm1419_vm5, %v1414_v40, %v854_v19  ;;  %v852_v38 = vpop.permute.xlu0 %851  ;;  %v1418_v40 = vsel %vm1388_vm4, %v1387_v13, %v5764_v35 }
 0x144   : > { %v5939_v55 = vsel %vm1419_vm5, %v1413_v43, %v852_v38  ;;  %1033 = vrot.lane.b32.xlu1 %v5457_v23, %s4878_s6  ;;  %v1417_v43 = vsel %vm1388_vm4, %v1386_v47, %v5766_v27  ;;  %v615_v27 = vrot.slane %v5653_v58, 2  ;;  %v8599_v47 = vld [vmem:[#allocation66_spill] sm:$0xff] }
 0x145   : > { %1031 = vrot.lane.b32.xlu0 %v8591_v33, %s4878_s6 }
 0x146   : > { %v858_v21 = vpop.permute.xlu1 %857 }
 0x147   : > { %v5956_v26 = vsel %vm1419_vm5, %v1416_v29, %v858_v21  ;;  %v856_v34 = vpop.permute.xlu0 %855  ;;  %v8596_v29 = vld [vmem:[#allocation65_spill] sm:$0xff]  ;;  %v617_v21 = vrot.slane %v5776_v20, 2 }
 0x148   : > { %v5959_v48 = vsel %vm1419_vm5, %v1415_v45, %v856_v34  ;;  %1037 = vrot.lane.b32.xlu1 %v5470_v46, %s4878_s6  ;;  %v614_v45 = vrot.slane %v5658_v42, 2 }
 0x149   : > { %1035 = vrot.lane.b32.xlu0 %v8592_v4, %s4878_s6 }
 0x14a   : > { %v862_v19 = vpop.permute.xlu1 %861 }
 0x14b   : > { %v5976_v38 = vsel %vm1419_vm5, %v1418_v40, %v862_v19  ;;  %v860_v22 = vpop.permute.xlu0 %859  ;;  %v8600_v40 = vld [vmem:[#allocation68_spill] sm:$0xff]  ;;  %v6005_v19 = vsel %vm531_vm2, %v615_v27, %v617_v21  ;;  %v8605_v21 = vld [vmem:[#allocation5_spill] sm:$0xff] }
 0x14c   : > { %v5979_v54 = vsel %vm1419_vm5, %v1417_v43, %v860_v22  ;;  %1041 = vrot.lane.b32.xlu1 %v5483_v63, %s4878_s6  ;;  %v6010_v22 = vsel %vm531_vm2, %v614_v45, %v615_v27 }
 0x14d   : > { %1039 = vrot.lane.b32.xlu0 %v8593_v32, %s4878_s6 }
 0x14e   : > { %v5985_v25 = vpop.permute.xlu1 %897 }
 0x14f   : > { %8594 = vst [vmem:[#allocation58_spill] sm:$0xff] %v5985_v25  ;;  %v5987_v35 = vpop.permute.xlu0 %895 }
 0x150   : > { %8595 = vst [vmem:[#allocation59_spill] sm:$0xff] %v5987_v35  ;;  %1045 = vrot.lane.b32.xlu1 %v5496_v7, %s4878_s6  ;;  %v8613_v35 = vld [vmem:[#allocation16_spill] sm:$0xff] }
 0x151   : > { %1043 = vrot.lane.b32.xlu0 %v8596_v29, %s4878_s6 }
 0x152   : > { %v5996_v34 = vpop.permute.xlu1 %901 }
 0x153   : > { %8597 = vst [vmem:[#allocation60_spill] sm:$0xff] %v5996_v34  ;;  %v5998_v13 = vpop.permute.xlu0 %899 }
 0x154   : > { %8598 = vst [vmem:[#allocation61_spill] sm:$0xff] %v5998_v13  ;;  %1049 = vrot.lane.b32.xlu1 %v8599_v47, %s4878_s6  ;;  %v8610_v13 = vld [vmem:[#allocation12_spill] sm:$0xff] }
 0x155   : > { %1047 = vrot.lane.b32.xlu0 %v8600_v40, %s4878_s6 }
 0x156   : > { %v6007_v43 = vpop.permute.xlu1 %905 }
 0x157   : > { %8601 = vst [vmem:[#allocation62_spill] sm:$0xff] %v6007_v43  ;;  %v6012_v20 = vpop.permute.xlu0 %903  ;;  %v8606_v43 = vld [vmem:[#allocation6_spill] sm:$0xff] }
 0x158   : > { %8602 = vst [vmem:[#allocation63_spill] sm:$0xff] %v6012_v20  ;;  %1053 = vrot.lane.b32.xlu1 %v6005_v19, %s4878_s6  ;;  %v8609_v20 = vld [vmem:[#allocation9_spill] sm:$0xff] }
 0x159   : > { %1051 = vrot.lane.b32.xlu0 %v6010_v22, %s4878_s6  ;;  %s4885_s6 = smov 64  }
 0x15a   : > { %v6018_v34 = vpop.permute.xlu1 %909 }
 0x15b   : > { %8603 = vst [vmem:[#allocation64_spill] sm:$0xff] %v6018_v34  ;;  %v6020_v25 = vpop.permute.xlu0 %907 }
 0x15c   : > { %8604 = vst [vmem:[#allocation65_spill] sm:$0xff] %v6020_v25  ;;  %1089 = vrot.lane.b32.xlu1 %v8605_v21, %s4879_s7  ;;  %v8614_v21 = vld [vmem:[#allocation15_spill] sm:$0xff] }
 0x15d   : > { %1087 = vrot.lane.b32.xlu0 %v8606_v43, %s4879_s7 }
 0x15e   : > { %v6026_v27 = vpop.permute.xlu1 %913 }
 0x15f   : > { %8607 = vst [vmem:[#allocation66_spill] sm:$0xff] %v6026_v27  ;;  %v6028_v45 = vpop.permute.xlu0 %911 }
 0x160   : > { %8608 = vst [vmem:[#allocation68_spill] sm:$0xff] %v6028_v45  ;;  %1093 = vrot.lane.b32.xlu1 %v8609_v20, %s4879_s7  ;;  %v8617_v45 = vld [vmem:[#allocation17_spill] sm:$0xff]  ;;  %v8618_v20 = vld [vmem:[#allocation18_spill] sm:$0xff] }
 0x161   : > { %1091 = vrot.lane.b32.xlu0 %v8610_v13, %s4879_s7 }
 0x162   : > { %v6034_v34 = vpop.permute.xlu1 %917 }
 0x163   : > { %8611 = vst [vmem:[#allocation120_spill] sm:$0xff] %v6034_v34  ;;  %v6036_v25 = vpop.permute.xlu0 %915 }
 0x164   : > { %8612 = vst [vmem:[#allocation121_spill] sm:$0xff] %v6036_v25  ;;  %1097 = vrot.lane.b32.xlu1 %v8613_v35, %s4879_s7  ;;  %v8621_v25 = vld [vmem:[#allocation23_spill] sm:$0xff]  ;;  %v8622_v35 = vld [vmem:[#allocation22_spill] sm:$0xff] }
 0x165   : > { %1095 = vrot.lane.b32.xlu0 %v8614_v21, %s4879_s7 }
 0x166   : > { %v6042_v43 = vpop.permute.xlu1 %921 }
 0x167   : > { %8615 = vst [vmem:[#allocation122_spill] sm:$0xff] %v6042_v43  ;;  %v6044_v27 = vpop.permute.xlu0 %919 }
 0x168   : > { %8616 = vst [vmem:[#allocation123_spill] sm:$0xff] %v6044_v27  ;;  %1101 = vrot.lane.b32.xlu1 %v8617_v45, %s4879_s7  ;;  %v8625_v27 = vld [vmem:[#allocation26_spill] sm:$0xff]  ;;  %v8626_v45 = vld [vmem:[#allocation24_spill] sm:$0xff] }
 0x169   : > { %1099 = vrot.lane.b32.xlu0 %v8618_v20, %s4879_s7 }
 0x16a   : > { %v6050_v13 = vpop.permute.xlu1 %925 }
 0x16b   : > { %8619 = vst [vmem:[#allocation124_spill] sm:$0xff] %v6050_v13  ;;  %v6052_v34 = vpop.permute.xlu0 %923 }
 0x16c   : > { %8620 = vst [vmem:[#allocation125_spill] sm:$0xff] %v6052_v34  ;;  %1105 = vrot.lane.b32.xlu1 %v8621_v25, %s4879_s7  ;;  %v8629_v34 = vld [vmem:[#allocation29_spill] sm:$0xff]  ;;  %v8630_v25 = vld [vmem:[#allocation30_spill] sm:$0xff] }
 0x16d   : > { %1103 = vrot.lane.b32.xlu0 %v8622_v35, %s4879_s7 }
 0x16e   : > { %v6058_v21 = vpop.permute.xlu1 %929 }
 0x16f   : > { %8623 = vst [vmem:[#allocation126_spill] sm:$0xff] %v6058_v21  ;;  %v6060_v43 = vpop.permute.xlu0 %927 }
 0x170   : > { %8624 = vst [vmem:[#allocation127_spill] sm:$0xff] %v6060_v43  ;;  %1109 = vrot.lane.b32.xlu1 %v8625_v27, %s4879_s7  ;;  %v8631_v43 = vld [vmem:[#allocation33_spill] sm:$0xff]  ;;  %v8632_v27 = vld [vmem:[#allocation34_spill] sm:$0xff] }
 0x171   : > { %1107 = vrot.lane.b32.xlu0 %v8626_v45, %s4879_s7 }
 0x172   : > { %v6066_v20 = vpop.permute.xlu1 %933 }
 0x173   : > { %8627 = vst [vmem:[#allocation128_spill] sm:$0xff] %v6066_v20  ;;  %v6068_v13 = vpop.permute.xlu0 %931 }
 0x174   : > { %8628 = vst [vmem:[#allocation129_spill] sm:$0xff] %v6068_v13  ;;  %1113 = vrot.lane.b32.xlu1 %v8629_v34, %s4879_s7 }
 0x175   : > { %1111 = vrot.lane.b32.xlu0 %v8630_v25, %s4879_s7 }
 0x176   : > { %v6074_v35 = vpop.permute.xlu1 %937 }
 0x177   : > { %v6076_v21 = vpop.permute.xlu0 %935 }
 0x178   : > { %1117 = vrot.lane.b32.xlu1 %v8631_v43, %s4879_s7 }
 0x179   : > { %1115 = vrot.lane.b32.xlu0 %v8632_v27, %s4879_s7 }
 0x17a   : > { %v6082_v45 = vpop.permute.xlu1 %941 }
 0x17b   : > { %v6084_v20 = vpop.permute.xlu0 %939 }
 0x17c   : > { %1121 = vrot.lane.b32.xlu1 %v5164_v1, %s4879_s7 }
 0x17d   : > { %1119 = vrot.lane.b32.xlu0 %v5182_v30, %s4879_s7 }
 0x17e   : > { %v6090_v13 = vpop.permute.xlu1 %945 }
 0x17f   : > { %v6092_v25 = vpop.permute.xlu0 %943 }
 0x180   : > { %1125 = vrot.lane.b32.xlu1 %v5187_v36, %s4879_s7 }
 0x181   : > { %1123 = vrot.lane.b32.xlu0 %v5198_v17, %s4879_s7 }
 0x182   : > { %v6098_v27 = vpop.permute.xlu1 %949 }
 0x183   : > { %v6100_v43 = vpop.permute.xlu0 %947 }
 0x184   : > { %1129 = vrot.lane.b32.xlu1 %v5215_v3, %s4879_s7 }
 0x185   : > { %1127 = vrot.lane.b32.xlu0 %v5218_v51, %s4879_s7 }
 0x186   : > { %v6106_v30 = vpop.permute.xlu1 %953 }
 0x187   : > { %v6108_v1 = vpop.permute.xlu0 %951 }
 0x188   : > { %1133 = vrot.lane.b32.xlu1 %v5244_v52, %s4879_s7 }
 0x189   : > { %1131 = vrot.lane.b32.xlu0 %v5247_v6, %s4879_s7 }
 0x18a   : > { %v6114_v36 = vpop.permute.xlu1 %957 }
 0x18b   : > { %v6116_v17 = vpop.permute.xlu0 %955 }
 0x18c   : > { %1137 = vrot.lane.b32.xlu1 %v5266_v53, %s4879_s7  ;;  %v1618_v53 = vld [vmem:[%s8238_s1 + $0x8] sm:$0xff] }
 0x18d   : > { %1135 = vrot.lane.b32.xlu0 %v5272_v12, %s4879_s7  ;;  %v1617_v12 = vld [vmem:[%s8238_s1] sm:$0xff] }
 0x18e   : > { %v6122_v3 = vpop.permute.xlu1 %993 }
 0x18f   : > { %8633 = vst [vmem:[#allocation130_spill] sm:$0xff] %v6122_v3  ;;  %v6124_v51 = vpop.permute.xlu0 %991  ;;  %v1620_v3 = vld [vmem:[%s8238_s1 + $0x18] sm:$0xff] }
 0x190   : > { %1141 = vrot.lane.b32.xlu1 %v5288_v49, %s4879_s7  ;;  %v3975_v49 = vpack.c.bf16 %v1618_v53, %v1617_v12 }
 0x191   : > { %1139 = vrot.lane.b32.xlu0 %v5294_v0, %s4879_s7 }
 0x192   : > { %v6130_v52 = vpop.permute.xlu1 %997  ;;  %3976 = vmatprep.subr.bf16.mxu0 %v3975_v49 }
 0x193   : > { %8634 = vst [vmem:[#allocation131_spill] sm:$0xff] %v6130_v52  ;;  %v6132_v6 = vpop.permute.xlu0 %995  ;;  %3978 = vmatpush3.bf16.msra.mxu0 %v3975_v49  ;;  %v1619_v52 = vld [vmem:[%s8238_s1 + $0x10] sm:$0xff]  ;;  %v1621_v49 = vld [vmem:[%s8238_s1 + $0x20] sm:$0xf] }
 0x194   : > { %1145 = vrot.lane.b32.xlu1 %v5653_v58, %s4879_s7  ;;  %v8637_v58 = vld [vmem:[#allocation11_spill] sm:$0xff]  ;;  %v3979_v12 = vpack.c.bf16 %v1620_v3, %v1619_v52 }
 0x195   : > { %1143 = vrot.lane.b32.xlu0 %v5658_v42, %s4879_s7  ;;  %v8638_v42 = vld [vmem:[#allocation10_spill] sm:$0xff]  ;;  %v8645_v52 = vld [vmem:[#allocation19_spill] sm:$0xff] }
 0x196   : > { %v6144_v0 = vpop.permute.xlu1 %1001  ;;  %3980 = vmatprep.subr.bf16.mxu0 %v3979_v12 }
 0x197   : > { %8635 = vst [vmem:[#allocation132_spill] sm:$0xff] %v6144_v0  ;;  %v6146_v34 = vpop.permute.xlu0 %999  ;;  %3982 = vmatpush3.bf16.msra.mxu0 %v3979_v12 }
 0x198   : > { %8636 = vst [vmem:[#allocation133_spill] sm:$0xff] %v6146_v34  ;;  %1179 = vrot.lane.b32.xlu1 %v8637_v58, %s4880_s17  ;;  %v8641_v58 = vld [vmem:[#allocation14_spill] sm:$0xff]  ;;  %v8642_v34 = vld [vmem:[#allocation13_spill] sm:$0xff]  ;;  %3925 = vmatprep.subr.msk.mxu0 %vm1719_vm6, %v1621_v49 }
 0x199   : > { %1177 = vrot.lane.b32.xlu0 %v8638_v42, %s4880_s17 }
 0x19a   : > { %v6158_v53 = vpop.permute.xlu1 %1005 }
 0x19b   : > { %8639 = vst [vmem:[#allocation11_spill] sm:$0xff] %v6158_v53  ;;  %v6160_v0 = vpop.permute.xlu0 %1003  ;;  %3926 = vmatpush3.msk.msra.mxu0 %vm1719_vm6, %v1621_v49  ;;  %v8649_v49 = vld [vmem:[#allocation28_spill] sm:$0xff] }
 0x19c   : > { %8640 = vst [vmem:[#allocation10_spill] sm:$0xff] %v6160_v0  ;;  %1183 = vrot.lane.b32.xlu1 %v8641_v58, %s4880_s17  ;;  %v8646_v58 = vld [vmem:[#allocation20_spill] sm:$0xff]  ;;  %v8647_v0 = vld [vmem:[#allocation21_spill] sm:$0xff] }
 0x19d   : > { %1181 = vrot.lane.b32.xlu0 %v8642_v34, %s4880_s17  ;;  %v8648_v34 = vld [vmem:[#allocation25_spill] sm:$0xff] }
 0x19e   : > { %v6169_v42 = vpop.permute.xlu1 %1009 }
 0x19f   : > { %8643 = vst [vmem:[#allocation14_spill] sm:$0xff] %v6169_v42  ;;  %v6171_v3 = vpop.permute.xlu0 %1007 }
 0x1a0   : > { %8644 = vst [vmem:[#allocation13_spill] sm:$0xff] %v6171_v3  ;;  %1187 = vrot.lane.b32.xlu1 %v8645_v52, %s4880_s17 }
 0x1a1   : > { %1185 = vrot.lane.b32.xlu0 %v8646_v58, %s4880_s17 }
 0x1a2   : > { %v6177_v12 = vpop.permute.xlu1 %1013 }
 0x1a3   : > { %v6179_v53 = vpop.permute.xlu0 %1011 }
 0x1a4   : > { %1191 = vrot.lane.b32.xlu1 %v8647_v0, %s4880_s17 }
 0x1a5   : > { %1189 = vrot.lane.b32.xlu0 %v8648_v34, %s4880_s17 }
 0x1a6   : > { %v6185_v42 = vpop.permute.xlu1 %1017 }
 0x1a7   : > { %v6187_v3 = vpop.permute.xlu0 %1015 }
 0x1a8   : > { %1267 = vrot.lane.b32.xlu1 %v8572_v41, %s4881_s29 }
 0x1a9   : > { %1193 = vrot.lane.b32.xlu0 %v8649_v49, %s4880_s17 }
 0x1aa   : > { %v6193_v52 = vpop.permute.xlu1 %1021 }
 0x1ab   : > { %v6195_v58 = vpop.permute.xlu0 %1019 }
 0x1ac   : > { %1271 = vrot.lane.b32.xlu1 %v8575_v18, %s4881_s29 }
 0x1ad   : > { %1269 = vrot.lane.b32.xlu0 %v5340_v28, %s4881_s29  ;;  %v1474_v28 = vsel %vm1452_vm7, %v5876_v50, %v6074_v35  ;;  %v1476_v50 = vsel %vm1452_vm7, %v5896_v5, %v6082_v45 }
 0x1ae   : > { %v6201_v0 = vpop.permute.xlu1 %1025 }
 0x1af   : > { %v6203_v34 = vpop.permute.xlu0 %1023 }
 0x1b0   : > { %1275 = vrot.lane.b32.xlu1 %v8578_v39, %s4881_s29 }
 0x1b1   : > { %1273 = vrot.lane.b32.xlu0 %v5353_v44, %s4881_s29  ;;  %v1473_v44 = vsel %vm1452_vm7, %v5879_v14, %v6076_v21  ;;  %v1475_v14 = vsel %vm1452_vm7, %v5899_v11, %v6084_v20  ;;  %v1477_v11 = vsel %vm1452_vm7, %v5919_v2, %v6092_v25  ;;  %v1479_v2 = vsel %vm1452_vm7, %v5939_v55, %v6100_v43 }
 0x1b2   : > { %v6209_v41 = vpop.permute.xlu1 %1029  ;;  %v1481_v55 = vsel %vm1452_vm7, %v5959_v48, %v6108_v1  ;;  %v1483_v48 = vsel %vm1452_vm7, %v5979_v54, %v6116_v17  ;;  %v8666_v54 = vld [vmem:[#allocation38_spill] sm:$0xff] }
 0x1b3   : > { %8650 = vst [vmem:[#allocation19_spill] sm:$0xff] %v6209_v41  ;;  %v6211_v49 = vpop.permute.xlu0 %1027  ;;  %v8652_v41 = vld [vmem:[#allocation27_spill] sm:$0xff] }
 0x1b4   : > { %8651 = vst [vmem:[#allocation20_spill] sm:$0xff] %v6211_v49  ;;  %1279 = vrot.lane.b32.xlu1 %v8581_v61, %s4881_s29 }
 0x1b5   : > { %1277 = vrot.lane.b32.xlu0 %v5366_v16, %s4881_s29 }
 0x1b6   : > { %v1034_v39 = vpop.permute.xlu1 %1033 }
 0x1b7   : > { %v6224_v18 = vsel %vm1485_vm8, %v1474_v28, %v1034_v39  ;;  %v1032_v49 = vpop.permute.xlu0 %1031 }
 0x1b8   : > { %v6227_v61 = vsel %vm1485_vm8, %v1473_v44, %v1032_v49  ;;  %1195 = vrot.lane.b32.xlu1 %v8652_v41, %s4880_s17  ;;  %v8658_v44 = vld [vmem:[#allocation57_spill] sm:$0xff] }
 0x1b9   : > { %1281 = vrot.lane.b32.xlu0 %v5379_v37, %s4881_s29  ;;  %v1478_v37 = vsel %vm1452_vm7, %v5916_v8, %v6090_v13  ;;  %v1480_v8 = vsel %vm1452_vm7, %v5936_v59, %v6098_v27  ;;  %v1482_v59 = vsel %vm1452_vm7, %v5956_v26, %v6106_v30  ;;  %v1484_v26 = vsel %vm1452_vm7, %v5976_v38, %v6114_v36  ;;  %v8665_v36 = vld [vmem:[#allocation37_spill] sm:$0xff] }
 0x1ba   : > { %v1038_v16 = vpop.permute.xlu1 %1037 }
 0x1bb   : > { %v6240_v35 = vsel %vm1485_vm8, %v1476_v50, %v1038_v16  ;;  %v1036_v21 = vpop.permute.xlu0 %1035 }
 0x1bc   : > { %v6243_v49 = vsel %vm1485_vm8, %v1475_v14, %v1036_v21  ;;  %1285 = vrot.lane.b32.xlu1 %v5392_v24, %s4881_s29  ;;  %v8654_v24 = vld [vmem:[#allocation31_spill] sm:$0xff] }
 0x1bd   : > { %1283 = vrot.lane.b32.xlu0 %v8584_v10, %s4881_s29  ;;  %v8655_v10 = vld [vmem:[#allocation32_spill] sm:$0xff]  ;;  %v8661_v14 = vld [vmem:[#allocation35_spill] sm:$0xff] }
 0x1be   : > { %v1042_v5 = vpop.permute.xlu1 %1041 }
 0x1bf   : > { %v6256_v20 = vsel %vm1485_vm8, %v1478_v37, %v1042_v5  ;;  %v1040_v45 = vpop.permute.xlu0 %1039 }
 0x1c0   : > { %v6259_v41 = vsel %vm1485_vm8, %v1477_v11, %v1040_v45  ;;  %1199 = vrot.lane.b32.xlu1 %v8654_v24, %s4880_s17  ;;  %v8667_v45 = vld [vmem:[#allocation39_spill] sm:$0xff]  ;;  %v8668_v24 = vld [vmem:[#allocation40_spill] sm:$0xff] }
 0x1c1   : > { %8653 = vst [vmem:[#allocation21_spill] sm:$0xff] %v6259_v41  ;;  %1197 = vrot.lane.b32.xlu0 %v8655_v10, %s4880_s17 }
 0x1c2   : > { %v1046_v13 = vpop.permute.xlu1 %1045 }
 0x1c3   : > { %v6272_v25 = vsel %vm1485_vm8, %v1480_v8, %v1046_v13  ;;  %v1044_v28 = vpop.permute.xlu0 %1043  ;;  %v8669_v13 = vld [vmem:[#allocation41_spill] sm:$0xff] }
 0x1c4   : > { %8656 = vst [vmem:[#allocation25_spill] sm:$0xff] %v6272_v25  ;;  %v6275_v39 = vsel %vm1485_vm8, %v1479_v2, %v1044_v28  ;;  %1289 = vrot.lane.b32.xlu1 %v8658_v44, %s4881_s29  ;;  %v8670_v2 = vld [vmem:[#allocation42_spill] sm:$0xff] }
 0x1c5   : > { %8657 = vst [vmem:[#allocation28_spill] sm:$0xff] %v6275_v39  ;;  %1287 = vrot.lane.b32.xlu0 %v8587_v56, %s4881_s29  ;;  %v8662_v56 = vld [vmem:[#allocation36_spill] sm:$0xff]  ;;  %v8690_v39 = vld [vmem:[#allocation71_spill] sm:$0xff] }
 0x1c6   : > { %v1050_v27 = vpop.permute.xlu1 %1049 }
 0x1c7   : > { %v6288_v43 = vsel %vm1485_vm8, %v1482_v59, %v1050_v27  ;;  %v1048_v50 = vpop.permute.xlu0 %1047  ;;  %v8671_v59 = vld [vmem:[#allocation44_spill] sm:$0xff]  ;;  %v8672_v27 = vld [vmem:[#allocation43_spill] sm:$0xff] }
 0x1c8   : > { %8659 = vst [vmem:[#allocation27_spill] sm:$0xff] %v6288_v43  ;;  %v6291_v16 = vsel %vm1485_vm8, %v1481_v55, %v1048_v50  ;;  %1203 = vrot.lane.b32.xlu1 %v8661_v14, %s4880_s17  ;;  %v8673_v14 = vld [vmem:[#allocation45_spill] sm:$0xff] }
 0x1c9   : > { %8660 = vst [vmem:[#allocation31_spill] sm:$0xff] %v6291_v16  ;;  %1201 = vrot.lane.b32.xlu0 %v8662_v56, %s4880_s17  ;;  %v8674_v56 = vld [vmem:[#allocation46_spill] sm:$0xff] }
 0x1ca   : > { %v1054_v30 = vpop.permute.xlu1 %1053 }
 0x1cb   : > { %v6304_v1 = vsel %vm1485_vm8, %v1484_v26, %v1054_v30  ;;  %v1052_v21 = vpop.permute.xlu0 %1051 }
 0x1cc   : > { %8663 = vst [vmem:[#allocation32_spill] sm:$0xff] %v6304_v1  ;;  %v6307_v37 = vsel %vm1485_vm8, %v1483_v48, %v1052_v21  ;;  %1293 = vrot.lane.b32.xlu1 %v5418_v60, %s4881_s29  ;;  %v8675_v48 = vld [vmem:[#allocation47_spill] sm:$0xff]  ;;  %v8676_v21 = vld [vmem:[#allocation48_spill] sm:$0xff] }
 0x1cd   : > { %8664 = vst [vmem:[#allocation57_spill] sm:$0xff] %v6307_v37  ;;  %1291 = vrot.lane.b32.xlu0 %v8588_v57, %s4881_s29  ;;  %v8687_v1 = vld [vmem:[#allocation87_spill] sm:$0xff]  ;;  %v8688_v37 = vld [vmem:[#allocation105_spill] sm:$0xff] }
 0x1ce   : > { %v6313_v5 = vpop.permute.xlu1 %1089 }
 0x1cf   : > { %v6315_v38 = vpop.permute.xlu0 %1087 }
 0x1d0   : > { %1207 = vrot.lane.b32.xlu1 %v8665_v36, %s4880_s17 }
 0x1d1   : > { %1205 = vrot.lane.b32.xlu0 %v8666_v54, %s4880_s17 }
 0x1d2   : > { %v6321_v17 = vpop.permute.xlu1 %1093 }
 0x1d3   : > { %v6323_v11 = vpop.permute.xlu0 %1091 }
 0x1d4   : > { %1297 = vrot.lane.b32.xlu1 %v5431_v15, %s4881_s29 }
 0x1d5   : > { %1295 = vrot.lane.b32.xlu0 %v8589_v9, %s4881_s29 }
 0x1d6   : > { %v6329_v60 = vpop.permute.xlu1 %1097 }
 0x1d7   : > { %v6331_v57 = vpop.permute.xlu0 %1095 }
 0x1d8   : > { %1211 = vrot.lane.b32.xlu1 %v8667_v45, %s4880_s17  ;;  %v8677_v45 = vld [vmem:[#allocation49_spill] sm:$0xff] }
 0x1d9   : > { %1209 = vrot.lane.b32.xlu0 %v8668_v24, %s4880_s17  ;;  %v8678_v24 = vld [vmem:[#allocation50_spill] sm:$0xff] }
 0x1da   : > { %v6337_v10 = vpop.permute.xlu1 %1101 }
 0x1db   : > { %v6339_v8 = vpop.permute.xlu0 %1099 }
 0x1dc   : > { %1301 = vrot.lane.b32.xlu1 %v5444_v31, %s4881_s29 }
 0x1dd   : > { %1299 = vrot.lane.b32.xlu0 %v8590_v62, %s4881_s29 }
 0x1de   : > { %v6345_v15 = vpop.permute.xlu1 %1105 }
 0x1df   : > { %v6347_v9 = vpop.permute.xlu0 %1103 }
 0x1e0   : > { %1215 = vrot.lane.b32.xlu1 %v8669_v13, %s4880_s17 }
 0x1e1   : > { %1213 = vrot.lane.b32.xlu0 %v8670_v2, %s4880_s17 }
 0x1e2   : > { %v6353_v28 = vpop.permute.xlu1 %1109 }
 0x1e3   : > { %v6355_v44 = vpop.permute.xlu0 %1107 }
 0x1e4   : > { %1305 = vrot.lane.b32.xlu1 %v5457_v23, %s4881_s29 }
 0x1e5   : > { %1303 = vrot.lane.b32.xlu0 %v8591_v33, %s4881_s29 }
 0x1e6   : > { %v6361_v31 = vpop.permute.xlu1 %1113 }
 0x1e7   : > { %v6363_v62 = vpop.permute.xlu0 %1111 }
 0x1e8   : > { %1219 = vrot.lane.b32.xlu1 %v8671_v59, %s4880_s17  ;;  %v8683_v59 = vld [vmem:[#allocation108_spill] sm:$0xff] }
 0x1e9   : > { %1217 = vrot.lane.b32.xlu0 %v8672_v27, %s4880_s17  ;;  %v8684_v27 = vld [vmem:[#allocation110_spill] sm:$0xff] }
 0x1ea   : > { %v6369_v55 = vpop.permute.xlu1 %1117 }
 0x1eb   : > { %v6371_v50 = vpop.permute.xlu0 %1115 }
 0x1ec   : > { %1309 = vrot.lane.b32.xlu1 %v5470_v46, %s4881_s29 }
 0x1ed   : > { %1307 = vrot.lane.b32.xlu0 %v8592_v4, %s4881_s29 }
 0x1ee   : > { %v6377_v23 = vpop.permute.xlu1 %1121 }
 0x1ef   : > { %v6379_v33 = vpop.permute.xlu0 %1119 }
 0x1f0   : > { %1223 = vrot.lane.b32.xlu1 %v8673_v14, %s4880_s17 }
 0x1f1   : > { %1221 = vrot.lane.b32.xlu0 %v8674_v56, %s4880_s17 }
 0x1f2   : > { %v6385_v26 = vpop.permute.xlu1 %1125 }
 0x1f3   : > { %v6387_v30 = vpop.permute.xlu0 %1123 }
 0x1f4   : > { %1313 = vrot.lane.b32.xlu1 %v5483_v63, %s4881_s29 }
 0x1f5   : > { %1311 = vrot.lane.b32.xlu0 %v8593_v32, %s4881_s29 }
 0x1f6   : > { %v6393_v46 = vpop.permute.xlu1 %1129 }
 0x1f7   : > { %v6395_v4 = vpop.permute.xlu0 %1127 }
 0x1f8   : > { %1227 = vrot.lane.b32.xlu1 %v8675_v48, %s4880_s17 }
 0x1f9   : > { %1225 = vrot.lane.b32.xlu0 %v8676_v21, %s4880_s17 }
 0x1fa   : > { %v6401_v36 = vpop.permute.xlu1 %1133 }
 0x1fb   : > { %v6403_v54 = vpop.permute.xlu0 %1131 }
 0x1fc   : > { %1317 = vrot.lane.b32.xlu1 %v5496_v7, %s4881_s29 }
 0x1fd   : > { %1315 = vrot.lane.b32.xlu0 %v8596_v29, %s4881_s29 }
 0x1fe   : > { %v6409_v63 = vpop.permute.xlu1 %1137 }
 0x1ff   : > { %v6411_v32 = vpop.permute.xlu0 %1135 }
 0x200   : > { %1231 = vrot.lane.b32.xlu1 %v8677_v45, %s4880_s17  ;;  %v8685_v45 = vld [vmem:[#allocation69_spill] sm:$0xff] }
 0x201   : > { %1229 = vrot.lane.b32.xlu0 %v8678_v24, %s4880_s17  ;;  %v8686_v24 = vld [vmem:[#allocation7_spill] sm:$0xff] }
 0x202   : > { %v6417_v13 = vpop.permute.xlu1 %1141 }
 0x203   : > { %8679 = vst [vmem:[#allocation35_spill] sm:$0xff] %v6417_v13  ;;  %v6419_v2 = vpop.permute.xlu0 %1139  ;;  %v8694_v13 = vld [vmem:[#allocation104_spill] sm:$0xff] }
 0x204   : > { %8680 = vst [vmem:[#allocation36_spill] sm:$0xff] %v6419_v2  ;;  %1321 = vrot.lane.b32.xlu1 %v8599_v47, %s4881_s29  ;;  %v8693_v2 = vld [vmem:[#allocation107_spill] sm:$0xff] }
 0x205   : > { %1319 = vrot.lane.b32.xlu0 %v8600_v40, %s4881_s29 }
 0x206   : > { %v6425_v7 = vpop.permute.xlu1 %1145 }
 0x207   : > { %8681 = vst [vmem:[#allocation37_spill] sm:$0xff] %v6425_v7  ;;  %v6427_v29 = vpop.permute.xlu0 %1143 }
 0x208   : > { %8682 = vst [vmem:[#allocation38_spill] sm:$0xff] %v6427_v29  ;;  %1235 = vrot.lane.b32.xlu1 %v8683_v59, %s4880_s17  ;;  %v1358_v59 = vsel %vm1357_vm3, %v8686_v24, %v8685_v45  ;;  %v8689_v29 = vld [vmem:[#allocation59_spill] sm:$0xff]  ;;  %v8691_v45 = vld [vmem:[#allocation8_spill] sm:$0xff] }
 0x209   : > { %1233 = vrot.lane.b32.xlu0 %v8684_v27, %s4880_s17  ;;  %v1389_v27 = vsel %vm1388_vm4, %v1358_v59, %v8687_v1  ;;  %v1359_v24 = vsel %vm1357_vm3, %v8691_v45, %v8690_v39  ;;  %v8697_v45 = vld [vmem:[#allocation6_spill] sm:$0xff] }
 0x20a   : > { %v1180_v14 = vpop.permute.xlu1 %1179  ;;  %v1420_v16 = vsel %vm1419_vm5, %v1389_v27, %v8688_v37  ;;  %v8692_v37 = vld [vmem:[#allocation86_spill] sm:$0xff] }
 0x20b   : > { %v1178_v56 = vpop.permute.xlu0 %1177  ;;  %v1390_v59 = vsel %vm1388_vm4, %v1359_v24, %v8692_v37  ;;  %v8698_v37 = vld [vmem:[#allocation58_spill] sm:$0xff] }
 0x20c   : > { %1325 = vrot.lane.b32.xlu1 %v6005_v19, %s4881_s29 }
 0x20d   : > { %1323 = vrot.lane.b32.xlu0 %v6010_v22, %s4881_s29  ;;  %v1453_v22 = vsel %vm1452_vm7, %v1420_v16, %v8689_v29  ;;  %v1422_v16 = vsel %vm1419_vm5, %v1389_v27, %v8693_v2 }
 0x20e   : > { %v1184_v47 = vpop.permute.xlu1 %1183  ;;  %v1486_v7 = vsel %vm1485_vm8, %v1453_v22, %v6124_v51  ;;  %v1421_v51 = vsel %vm1419_vm5, %v1390_v59, %v8694_v13  ;;  %v8695_v22 = vld [vmem:[#allocation61_spill] sm:$0xff] }
 0x20f   : > { %v1182_v40 = vpop.permute.xlu0 %1181  ;;  %v1519_v1 = vsel %vm1518_vm9, %v1486_v7, %v6315_v38  ;;  %v1455_v41 = vsel %vm1452_vm7, %v1422_v16, %v8695_v22  ;;  %v8696_v7 = vld [vmem:[#allocation67_spill] sm:$0xff]  ;;  %v1454_v2 = vsel %vm1452_vm7, %v1421_v51, %v8698_v37  ;;  %v8699_v13 = vld [vmem:[#allocation89_spill] sm:$0xff] }
 0x210   : > { %v1552_v29 = vsel %vm1551_vm10, %v1519_v1, %v1178_v56  ;;  %v1360_v24 = vsel %vm1357_vm3, %v8697_v45, %v8696_v7  ;;  %v1488_v56 = vsel %vm1485_vm8, %v1455_v41, %v6132_v6  ;;  %v8700_v1 = vld [vmem:[#allocation130_spill] sm:$0xff]  ;;  %v8703_v45 = vld [vmem:[#allocation63_spill] sm:$0xff] }
 0x211   : > { %v1391_v27 = vsel %vm1388_vm4, %v1360_v24, %v8699_v13  ;;  %v1487_v16 = vsel %vm1485_vm8, %v1454_v2, %v8700_v1  ;;  %v8702_v41 = vld [vmem:[#allocation106_spill] sm:$0xff]  ;;  %v8705_v13 = vld [vmem:[#allocation12_spill] sm:$0xff] }
 0x212   : > { %v6437_v48 = vpop.permute.xlu1 %1187  ;;  %v1520_v51 = vsel %vm1518_vm9, %v1487_v16, %v6313_v5  ;;  %v8706_v1 = vld [vmem:[#allocation60_spill] sm:$0xff] }
 0x213   : > { %v1186_v21 = vpop.permute.xlu0 %1185  ;;  %v1553_v37 = vsel %vm1551_vm10, %v1520_v51, %v1180_v14  ;;  %v8710_v14 = vld [vmem:[#allocation91_spill] sm:$0xff] }
 0x216   : > { %v6446_v19 = vpop.permute.xlu1 %1191 }
 0x217   : > { %v1190_v43 = vpop.permute.xlu0 %1189 }
 0x21a   : > { %v1268_v25 = vpop.permute.xlu1 %1267 }
 0x21b   : > { %v6466_v39 = vpop.permute.xlu0 %1193  ;;  %v1585_v38 = vsel %vm1584_vm11, %v1552_v29, %v1268_v25  ;;  %v1521_v25 = vsel %vm1518_vm9, %v1488_v56, %v6323_v11  ;;  %v8701_v29 = vld [vmem:[#allocation111_spill] sm:$0xff]  ;;  %v8704_v56 = vld [vmem:[#allocation73_spill] sm:$0xff] }
 0x21c   : > { %3927 = vmatprep.mubr.msk.f32.mxu0 %vm1622_vm12, %v1585_v38  ;;  %v1424_v22 = vsel %vm1419_vm5, %v1391_v27, %v8701_v29  ;;  %v1554_v7 = vsel %vm1551_vm10, %v1521_v25, %v1182_v40  ;;  %v1423_v38 = vsel %vm1419_vm5, %v1390_v59, %v8702_v41  ;;  %v1362_v27 = vsel %vm1357_vm3, %v8705_v13, %v8704_v56  ;;  %v8707_v40 = vld [vmem:[#allocation133_spill] sm:$0xff]  ;;  %v8708_v25 = vld [vmem:[#allocation70_spill] sm:$0xff] }
 0x21d   : > { %v1457_v24 = vsel %vm1452_vm7, %v1424_v22, %v8703_v45  ;;  %v1456_v5 = vsel %vm1452_vm7, %v1423_v38, %v8706_v1  ;;  %v8709_v29 = vld [vmem:[#allocation5_spill] sm:$0xff]  ;;  %v1393_v51 = vsel %vm1388_vm4, %v1362_v27, %v8710_v14  ;;  %v8712_v38 = vld [vmem:[#allocation88_spill] sm:$0xff] }
 0x21e   : > { %v1272_v6 = vpop.permute.xlu1 %1271  ;;  %v1490_v16 = vsel %vm1485_vm8, %v1457_v24, %v8707_v40  ;;  %v1361_v22 = vsel %vm1357_vm3, %v8709_v29, %v8708_v25  ;;  %v8713_v24 = vld [vmem:[#allocation113_spill] sm:$0xff]  ;;  %v8716_v25 = vld [vmem:[#allocation62_spill] sm:$0xff] }
 0x21f   : > { %v1587_v2 = vsel %vm1584_vm11, %v1554_v7, %v1272_v6  ;;  %v1270_v11 = vpop.permute.xlu0 %1269  ;;  %v8711_v7 = vld [vmem:[#allocation131_spill] sm:$0xff]  ;;  %v1523_v41 = vsel %vm1518_vm9, %v1490_v16, %v6331_v57  ;;  %v1392_v45 = vsel %vm1388_vm4, %v1361_v22, %v8712_v38  ;;  %v8714_v27 = vld [vmem:[#allocation109_spill] sm:$0xff]  ;;  %v8718_v22 = vld [vmem:[#allocation72_spill] sm:$0xff] }
 0x220   : > { %v1586_v59 = vsel %vm1584_vm11, %v1553_v37, %v1270_v11  ;;  %v1489_v6 = vsel %vm1485_vm8, %v1456_v5, %v8711_v7  ;;  %v1426_v37 = vsel %vm1419_vm5, %v1393_v51, %v8713_v24  ;;  %v1556_v56 = vsel %vm1551_vm10, %v1523_v41, %v1186_v21  ;;  %v8715_v57 = vld [vmem:[#allocation65_spill] sm:$0xff]  ;;  %v8720_v7 = vld [vmem:[#allocation132_spill] sm:$0xff]  ;;  %v8721_v41 = vld [vmem:[#allocation90_spill] sm:$0xff] }
 0x221   : > { %3928 = vmatmul.mubr.msk.f32.vlgmr.msra.gmra.mrb[0].mxu0 %vm1622_vm12, %v1586_v59  ;;  %v1522_v11 = vsel %vm1518_vm9, %v1489_v6, %v6321_v17  ;;  %v1425_v1 = vsel %vm1419_vm5, %v1392_v45, %v8714_v27  ;;  %v1459_v5 = vsel %vm1452_vm7, %v1426_v37, %v8715_v57  ;;  %v8717_v17 = vld [vmem:[#allocation10_spill] sm:$0xff]  ;;  %v8719_v14 = vld [vmem:[#allocation9_spill] sm:$0xff]  ;;  %v8724_v57 = vld [vmem:[#allocation16_spill] sm:$0xff] }
 0x222   : > { %3930 = vmatprep.mubr.msk.f32.mxu0 %vm1622_vm12, %v1587_v2  ;;  %v1276_v13 = vpop.permute.xlu1 %1275  ;;  %v1555_v40 = vsel %vm1551_vm10, %v1522_v11, %v1184_v47  ;;  %v1458_v29 = vsel %vm1452_vm7, %v1425_v1, %v8716_v25  ;;  %v1492_v21 = vsel %vm1485_vm8, %v1459_v5, %v8717_v17  ;;  %v1363_v51 = vsel %vm1357_vm3, %v8719_v14, %v8718_v22  ;;  %v8722_v11 = vld [vmem:[#allocation112_spill] sm:$0xff]  ;;  %v8723_v1 = vld [vmem:[#allocation74_spill] sm:$0xff]  ;;  %v8731_v14 = vld [vmem:[#allocation51_spill] sm:$0xff] }
 0x223   : > { %v1589_v16 = vsel %vm1584_vm11, %v1556_v56, %v1276_v13  ;;  %v1274_v59 = vpop.permute.xlu0 %1273  ;;  %v1491_v6 = vsel %vm1485_vm8, %v1458_v29, %v8720_v7  ;;  %v1525_v47 = vsel %vm1518_vm9, %v1492_v21, %v6339_v8  ;;  %v1394_v38 = vsel %vm1388_vm4, %v1363_v51, %v8721_v41  ;;  %v8728_v29 = vld [vmem:[#allocation92_spill] sm:$0xff] }
 0x224   : > { %v1588_v2 = vsel %vm1584_vm11, %v1555_v40, %v1274_v59  ;;  %v1524_v45 = vsel %vm1518_vm9, %v1491_v6, %v6329_v60  ;;  %v1558_v24 = vsel %vm1551_vm10, %v1525_v47, %v1190_v43  ;;  %v1427_v56 = vsel %vm1419_vm5, %v1394_v38, %v8722_v11  ;;  %v8725_v40 = vld [vmem:[#allocation64_spill] sm:$0xff]  ;;  %v8727_v59 = vld [vmem:[#allocation15_spill] sm:$0xff]  ;;  %v8732_v47 = vld [vmem:[#allocation114_spill] sm:$0xff] }
 0x225   : > { %3931 = vmatmul.mubr.msk.f32.gmra.mrb[2].mxu0 %vm1622_vm12, %v1588_v2  ;;  %v1557_v13 = vsel %vm1551_vm10, %v1524_v45, %v6437_v48  ;;  %v1365_v5 = vsel %vm1357_vm3, %v8724_v57, %v8723_v1  ;;  %v1460_v60 = vsel %vm1452_vm7, %v1427_v56, %v8725_v40  ;;  %v8729_v48 = vld [vmem:[#allocation11_spill] sm:$0xff]  ;;  %v8730_v2 = vld [vmem:[#allocation93_spill] sm:$0xff]  ;;  %v8733_v38 = vld [vmem:[#allocation66_spill] sm:$0xff] }
 0x226   : > { %3933 = vmatprep.mubr.msk.f32.mxu0 %vm1622_vm12, %v1589_v16  ;;  %v1280_v37 = vpop.permute.xlu1 %1279  ;;  %v8726_v16 = vld [vmem:[#allocation75_spill] sm:$0xff]  ;;  %v1396_v17 = vsel %vm1388_vm4, %v1365_v5, %v8728_v29  ;;  %v1493_v21 = vsel %vm1485_vm8, %v1460_v60, %v8729_v48  ;;  %v8734_v11 = vld [vmem:[#allocation68_spill] sm:$0xff]  ;;  %v8740_v48 = vld [vmem:[#allocation18_spill] sm:$0xff] }
 0x227   : > { %v1591_v8 = vsel %vm1584_vm11, %v1558_v24, %v1280_v37  ;;  %v1278_v27 = vpop.permute.xlu0 %1277  ;;  %v1364_v25 = vsel %vm1357_vm3, %v8727_v59, %v8726_v16  ;;  %v1429_v51 = vsel %vm1419_vm5, %v1396_v17, %v8731_v14  ;;  %v1526_v7 = vsel %vm1518_vm9, %v1493_v21, %v6337_v10  ;;  %v8737_v59 = vld [vmem:[#allocation76_spill] sm:$0xff]  ;;  %v8739_v17 = vld [vmem:[#allocation77_spill] sm:$0xff] }
 0x228   : > { %v1590_v43 = vsel %vm1584_vm11, %v1557_v13, %v1278_v27  ;;  %v1395_v22 = vsel %vm1388_vm4, %v1364_v25, %v8730_v2  ;;  %v1462_v45 = vsel %vm1452_vm7, %v1429_v51, %v8733_v38  ;;  %v1559_v24 = vsel %vm1551_vm10, %v1526_v7, %v6446_v19  ;;  %v8735_v13 = vld [vmem:[#allocation14_spill] sm:$0xff]  ;;  %v8738_v25 = vld [vmem:[#allocation17_spill] sm:$0xff]  ;;  %v8743_v14 = vld [vmem:[#allocation52_spill] sm:$0xff] }
 0x229   : > { %3934 = vmatmul.mubr.msk.f32.gmra.mrb[4].mxu0 %vm1622_vm12, %v1590_v43  ;;  %v1428_v41 = vsel %vm1419_vm5, %v1395_v22, %v8732_v47  ;;  %v1495_v27 = vsel %vm1485_vm8, %v1462_v45, %v8735_v13  ;;  %v1367_v29 = vsel %vm1357_vm3, %v8738_v25, %v8737_v59  ;;  %v1366_v21 = vsel %vm1357_vm3, %v8740_v48, %v8739_v17  ;;  %v8742_v22 = vld [vmem:[#allocation95_spill] sm:$0xff]  ;;  %v8752_v59 = vld [vmem:[#allocation97_spill] sm:$0xff]  ;;  %v8754_v48 = vld [vmem:[#allocation116_spill] sm:$0xff] }
 0x22a   : > { %3936 = vmatprep.mubr.msk.f32.mxu0 %vm1622_vm12, %v1591_v8  ;;  %v1196_v6 = vpop.permute.xlu1 %1195  ;;  %v1461_v56 = vsel %vm1452_vm7, %v1428_v41, %v8734_v11  ;;  %v8736_v8 = vld [vmem:[#allocation13_spill] sm:$0xff]  ;;  %v1528_v57 = vsel %vm1518_vm9, %v1495_v27, %v6345_v15  ;;  %v8745_v41 = vld [vmem:[#allocation120_spill] sm:$0xff] }
 0x22b   : > { %v1282_v37 = vpop.permute.xlu0 %1281  ;;  %v1494_v1 = vsel %vm1485_vm8, %v1461_v56, %v8736_v8  ;;  %v1561_v5 = vsel %vm1551_vm10, %v1528_v57, %v1196_v6  ;;  %v8744_v6 = vld [vmem:[#allocation115_spill] sm:$0xff] }
 0x22c   : > { %v1592_v10 = vsel %vm1584_vm11, %v1559_v24, %v1282_v37  ;;  %v1527_v19 = vsel %vm1518_vm9, %v1494_v1, %v6347_v9  ;;  %v8741_v9 = vld [vmem:[#allocation94_spill] sm:$0xff]  ;;  %v8746_v24 = vld [vmem:[#allocation121_spill] sm:$0xff] }
 0x22d   : > { %3937 = vmatmul.mubr.msk.f32.gmra.mrb[6].mxu0 %vm1622_vm12, %v1592_v10  ;;  %v1560_v60 = vsel %vm1551_vm10, %v1527_v19, %v6466_v39  ;;  %v1398_v2 = vsel %vm1388_vm4, %v1367_v29, %v8741_v9  ;;  %v1397_v39 = vsel %vm1388_vm4, %v1366_v21, %v8742_v22  ;;  %v8753_v29 = vld [vmem:[#allocation53_spill] sm:$0xff]  ;;  %v8755_v9 = vld [vmem:[#allocation122_spill] sm:$0xff] }
 0x22e   : > { %v1286_v40 = vpop.permute.xlu1 %1285  ;;  %v1431_v51 = vsel %vm1419_vm5, %v1398_v2, %v8743_v14  ;;  %v1430_v47 = vsel %vm1419_vm5, %v1397_v39, %v8744_v6  ;;  %v8756_v39 = vld [vmem:[#allocation123_spill] sm:$0xff] }
 0x22f   : > { %v1594_v43 = vsel %vm1584_vm11, %v1561_v5, %v1286_v40  ;;  %v1284_v16 = vpop.permute.xlu0 %1283  ;;  %v1464_v38 = vsel %vm1452_vm7, %v1431_v51, %v8745_v41  ;;  %v1463_v37 = vsel %vm1452_vm7, %v1430_v47, %v8746_v24  ;;  %v8747_v5 = vld [vmem:[#allocation78_spill] sm:$0xff]  ;;  %v8748_v40 = vld [vmem:[#allocation23_spill] sm:$0xff] }
 0x230   : > { %v1593_v15 = vsel %vm1584_vm11, %v1560_v60, %v1284_v16  ;;  %v1497_v11 = vsel %vm1485_vm8, %v1464_v38, %v6177_v12  ;;  %v1496_v56 = vsel %vm1485_vm8, %v1463_v37, %v6179_v53  ;;  %v1369_v12 = vsel %vm1357_vm3, %v8748_v40, %v8747_v5  ;;  %v8749_v60 = vld [vmem:[#allocation79_spill] sm:$0xff]  ;;  %v8751_v16 = vld [vmem:[#allocation96_spill] sm:$0xff]  ;;  %v8764_v40 = vld [vmem:[#allocation117_spill] sm:$0xff] }
 0x231   : > { %3939 = vmatprep.mubr.msk.f32.mxu0 %vm1622_vm12, %v1593_v15  ;;  %v1530_v13 = vsel %vm1518_vm9, %v1497_v11, %v6353_v28  ;;  %v1529_v27 = vsel %vm1518_vm9, %v1496_v56, %v6355_v44  ;;  %v1400_v44 = vsel %vm1388_vm4, %v1369_v12, %v8751_v16  ;;  %v8757_v11 = vld [vmem:[#allocation80_spill] sm:$0xff]  ;;  %v8758_v56 = vld [vmem:[#allocation26_spill] sm:$0xff] }
 0x232   : > { %3940 = vmatmul.mubr.msk.f32.gmra.mrb[8].mxu0 %vm1622_vm12, %v1594_v43  ;;  %v1200_v7 = vpop.permute.xlu1 %1199  ;;  %v8750_v43 = vld [vmem:[#allocation22_spill] sm:$0xff]  ;;  %v1433_v15 = vsel %vm1419_vm5, %v1400_v44, %v8753_v29 }
 0x233   : > { %v1198_v45 = vpop.permute.xlu0 %1197  ;;  %v1563_v10 = vsel %vm1551_vm10, %v1530_v13, %v1200_v7  ;;  %v1368_v28 = vsel %vm1357_vm3, %v8750_v43, %v8749_v60  ;;  %v1466_v2 = vsel %vm1452_vm7, %v1433_v15, %v8755_v9  ;;  %v8759_v13 = vld [vmem:[#allocation81_spill] sm:$0xff] }
 0x234   : > { %v1562_v1 = vsel %vm1551_vm10, %v1529_v27, %v1198_v45  ;;  %v1399_v25 = vsel %vm1388_vm4, %v1368_v28, %v8752_v59  ;;  %v1499_v51 = vsel %vm1485_vm8, %v1466_v2, %v6185_v42  ;;  %v1371_v42 = vsel %vm1357_vm3, %v8758_v56, %v8757_v11  ;;  %v8760_v27 = vld [vmem:[#allocation24_spill] sm:$0xff]  ;;  %v8766_v28 = vld [vmem:[#allocation125_spill] sm:$0xff]  ;;  %v8767_v2 = vld [vmem:[#allocation82_spill] sm:$0xff] }
 0x235   : > { %v1432_v21 = vsel %vm1419_vm5, %v1399_v25, %v8754_v48  ;;  %v1532_v6 = vsel %vm1518_vm9, %v1499_v51, %v6361_v31  ;;  %v1370_v31 = vsel %vm1357_vm3, %v8760_v27, %v8759_v13  ;;  %v8771_v51 = vld [vmem:[#allocation100_spill] sm:$0xff] }
 0x236   : > { %v1290_v8 = vpop.permute.xlu1 %1289  ;;  %v1465_v14 = vsel %vm1452_vm7, %v1432_v21, %v8756_v39  ;;  %v8769_v39 = vld [vmem:[#allocation83_spill] sm:$0xff] }
 0x237   : > { %v1596_v57 = vsel %vm1584_vm11, %v1563_v10, %v1290_v8  ;;  %v1288_v19 = vpop.permute.xlu0 %1287  ;;  %v1498_v7 = vsel %vm1485_vm8, %v1465_v14, %v6187_v3  ;;  %v8761_v10 = vld [vmem:[#allocation98_spill] sm:$0xff]  ;;  %v8762_v8 = vld [vmem:[#allocation99_spill] sm:$0xff] }
 0x238   : > { %v1595_v53 = vsel %vm1584_vm11, %v1562_v1, %v1288_v19  ;;  %v1531_v47 = vsel %vm1518_vm9, %v1498_v7, %v6363_v62  ;;  %v1402_v62 = vsel %vm1388_vm4, %v1371_v42, %v8761_v10  ;;  %v1401_v1 = vsel %vm1388_vm4, %v1370_v31, %v8762_v8  ;;  %v8770_v14 = vld [vmem:[#allocation30_spill] sm:$0xff]  ;;  %v8772_v7 = vld [vmem:[#allocation101_spill] sm:$0xff]  ;;  %v8776_v42 = vld [vmem:[#allocation127_spill] sm:$0xff] }
 0x239   : > { %3942 = vmatprep.mubr.msk.f32.mxu0 %vm1622_vm12, %v1595_v53  ;;  %v1434_v12 = vsel %vm1419_vm5, %v1401_v1, %v8764_v40  ;;  %v8765_v53 = vld [vmem:[#allocation124_spill] sm:$0xff]  ;;  %v8778_v40 = vld [vmem:[#allocation33_spill] sm:$0xff] }
 0x23a   : > { %3943 = vmatmul.mubr.msk.f32.gmra.mrb[10].mxu0 %vm1622_vm12, %v1596_v57  ;;  %v1204_v17 = vpop.permute.xlu1 %1203  ;;  %v8763_v57 = vld [vmem:[#allocation54_spill] sm:$0xff]  ;;  %v1467_v16 = vsel %vm1452_vm7, %v1434_v12, %v8766_v28  ;;  %v8779_v12 = vld [vmem:[#allocation85_spill] sm:$0xff] }
 0x23b   : > { %v1202_v22 = vpop.permute.xlu0 %1201  ;;  %v1565_v41 = vsel %vm1551_vm10, %v1532_v6, %v1204_v17  ;;  %v1435_v19 = vsel %vm1419_vm5, %v1402_v62, %v8763_v57  ;;  %v1500_v59 = vsel %vm1485_vm8, %v1467_v16, %v6195_v58  ;;  %v8783_v16 = vld [vmem:[#allocation56_spill] sm:$0xff] }
 0x23c   : > { %v1564_v45 = vsel %vm1551_vm10, %v1531_v47, %v1202_v22  ;;  %v1468_v60 = vsel %vm1452_vm7, %v1435_v19, %v8765_v53  ;;  %v1533_v29 = vsel %vm1518_vm9, %v1500_v59, %v6371_v50  ;;  %v8768_v22 = vld [vmem:[#allocation29_spill] sm:$0xff]  ;;  %v8773_v47 = vld [vmem:[#allocation55_spill] sm:$0xff]  ;;  %v8780_v53 = vld [vmem:[#allocation34_spill] sm:$0xff] }
 0x23d   : > { %v1501_v44 = vsel %vm1485_vm8, %v1468_v60, %v6193_v52  ;;  %v1373_v52 = vsel %vm1357_vm3, %v8768_v22, %v8767_v2  ;;  %v8781_v60 = vld [vmem:[#allocation102_spill] sm:$0xff]  ;;  %v8787_v2 = vld [vmem:[#allocation19_spill] sm:$0xff] }
 0x23e   : > { %v1294_v38 = vpop.permute.xlu1 %1293  ;;  %v1534_v25 = vsel %vm1518_vm9, %v1501_v44, %v6369_v55  ;;  %v1372_v55 = vsel %vm1357_vm3, %v8770_v14, %v8769_v39  ;;  %v1404_v50 = vsel %vm1388_vm4, %v1373_v52, %v8771_v51  ;;  %v8788_v52 = vld [vmem:[#allocation20_spill] sm:$0xff] }
 0x23f   : > { %v1598_v24 = vsel %vm1584_vm11, %v1565_v41, %v1294_v38  ;;  %v1292_v37 = vpop.permute.xlu0 %1291  ;;  %v1403_v6 = vsel %vm1388_vm4, %v1372_v55, %v8772_v7  ;;  %v1437_v41 = vsel %vm1419_vm5, %v1404_v50, %v8773_v47 }
 0x240   : > { %v1597_v3 = vsel %vm1584_vm11, %v1564_v45, %v1292_v37  ;;  %v8774_v45 = vld [vmem:[#allocation118_spill] sm:$0xff] }
 0x241   : > { %3945 = vmatprep.mubr.msk.f32.mxu0 %vm1622_vm12, %v1597_v3  ;;  %v8775_v37 = vld [vmem:[#allocation126_spill] sm:$0xff] }
 0x242   : > { %3946 = vmatmul.mubr.msk.f32.gmra.mrb[12].mxu0 %vm1622_vm12, %v1598_v24  ;;  %v1208_v5 = vpop.permute.xlu1 %1207  ;;  %v1436_v24 = vsel %vm1419_vm5, %v1403_v6, %v8774_v45  ;;  %v1470_v11 = vsel %vm1452_vm7, %v1437_v41, %v8775_v37 }
 0x243   : > { %v1206_v43 = vpop.permute.xlu0 %1205  ;;  %v1567_v15 = vsel %vm1551_vm10, %v1534_v25, %v1208_v5  ;;  %v1469_v3 = vsel %vm1452_vm7, %v1436_v24, %v8776_v42  ;;  %v1503_v13 = vsel %vm1485_vm8, %v1470_v11, %v6201_v0  ;;  %v8777_v5 = vld [vmem:[#allocation84_spill] sm:$0xff]  ;;  %v8784_v25 = vld [vmem:[#allocation119_spill] sm:$0xff] }
 0x244   : > { %v1566_v48 = vsel %vm1551_vm10, %v1533_v29, %v1206_v43  ;;  %v1502_v27 = vsel %vm1485_vm8, %v1469_v3, %v6203_v34  ;;  %v1536_v31 = vsel %vm1518_vm9, %v1503_v13, %v6377_v23  ;;  %v1375_v0 = vsel %vm1357_vm3, %v8778_v40, %v8777_v5  ;;  %v8782_v43 = vld [vmem:[#allocation103_spill] sm:$0xff] }
 0x245   : > { %v1535_v10 = vsel %vm1518_vm9, %v1502_v27, %v6379_v33  ;;  %v1374_v23 = vsel %vm1357_vm3, %v8780_v53, %v8779_v12  ;;  %v1406_v33 = vsel %vm1388_vm4, %v1375_v0, %v8781_v60  ;;  %v8791_v12 = vld [vmem:[#allocation25_spill] sm:$0xff]  ;;  %v8792_v53 = vld [vmem:[#allocation36_spill] sm:$0xff] }
 0x246   : > { %v1298_v17 = vpop.permute.xlu1 %1297  ;;  %v1405_v28 = vsel %vm1388_vm4, %v1374_v23, %v8782_v43  ;;  %v1439_v44 = vsel %vm1419_vm5, %v1406_v33, %v8783_v16  ;;  %v8793_v23 = vld [vmem:[#allocation28_spill] sm:$0xff] }
 0x247   : > { %v1600_v21 = vsel %vm1584_vm11, %v1567_v15, %v1298_v17  ;;  %v1296_v9 = vpop.permute.xlu0 %1295  ;;  %v1438_v29 = vsel %vm1419_vm5, %v1405_v28, %v8784_v25  ;;  %v8785_v15 = vld [vmem:[#allocation128_spill] sm:$0xff]  ;;  %v1545_v60 = vsel %vm1518_vm9, %v8793_v23, %v8792_v53 }
 0x248   : > { %v1599_v58 = vsel %vm1584_vm11, %v1566_v48, %v1296_v9  ;;  %v1472_v17 = vsel %vm1452_vm7, %v1439_v44, %v8785_v15  ;;  %v8794_v15 = vld [vmem:[#allocation37_spill] sm:$0xff] }
 0x249   : > { %3948 = vmatprep.mubr.msk.f32.mxu0 %vm1622_vm12, %v1599_v58  ;;  %v1505_v22 = vsel %vm1485_vm8, %v1472_v17, %v8787_v2  ;;  %v8795_v17 = vld [vmem:[#allocation27_spill] sm:$0xff] }
 0x24a   : > { %3949 = vmatmul.mubr.msk.f32.gmra.mrb[14].mxu0 %vm1622_vm12, %v1600_v21  ;;  %v1212_v38 = vpop.permute.xlu1 %1211  ;;  %v8786_v21 = vld [vmem:[#allocation129_spill] sm:$0xff]  ;;  %v1538_v39 = vsel %vm1518_vm9, %v1505_v22, %v6385_v26  ;;  %v1540_v26 = vsel %vm1518_vm9, %v6224_v18, %v6393_v46  ;;  %v1541_v46 = vsel %vm1518_vm9, %v6243_v49, %v6403_v54  ;;  %v1544_v49 = vsel %vm1518_vm9, %v6256_v20, %v6409_v63  ;;  %v8790_v63 = vld [vmem:[#allocation35_spill] sm:$0xff] }
 0x24b   : > { %v1210_v56 = vpop.permute.xlu0 %1209  ;;  %v1569_v62 = vsel %vm1551_vm10, %v1536_v31, %v1212_v38  ;;  %v1471_v9 = vsel %vm1452_vm7, %v1438_v29, %v8786_v21  ;;  %v8796_v21 = vld [vmem:[#allocation38_spill] sm:$0xff] }
 0x24c   : > { %v1568_v1 = vsel %vm1551_vm10, %v1535_v10, %v1210_v56  ;;  %v1504_v58 = vsel %vm1485_vm8, %v1471_v9, %v8788_v52  ;;  %v8797_v9 = vld [vmem:[#allocation31_spill] sm:$0xff] }
 0x24d   : > { %v1537_v14 = vsel %vm1518_vm9, %v1504_v58, %v6387_v30  ;;  %v1539_v30 = vsel %vm1518_vm9, %v6227_v61, %v6395_v4  ;;  %v1542_v61 = vsel %vm1518_vm9, %v6240_v35, %v6401_v36  ;;  %v8789_v36 = vld [vmem:[#allocation21_spill] sm:$0xff]  ;;  %v1547_v2 = vsel %vm1518_vm9, %v8797_v9, %v8796_v21 }
 0x24e   : > { %v1302_v8 = vpop.permute.xlu1 %1301  ;;  %v1543_v54 = vsel %vm1518_vm9, %v8789_v36, %v6411_v32  ;;  %v1546_v32 = vsel %vm1518_vm9, %v8791_v12, %v8790_v63 }
 0x24f   : > { %v1602_v57 = vsel %vm1584_vm11, %v1569_v62, %v1302_v8  ;;  %v1300_v19 = vpop.permute.xlu0 %1299 }
 0x250   : > { %v1601_v34 = vsel %vm1584_vm11, %v1568_v1, %v1300_v19 }
 0x251   : > { %3951 = vmatprep.mubr.msk.f32.mxu0 %vm1622_vm12, %v1601_v34 }
 0x252   : > { %3952 = vmatmul.mubr.msk.f32.gmra.mrb[16].mxu0 %vm1622_vm12, %v1602_v57  ;;  %v1216_v59 = vpop.permute.xlu1 %1215 }
 0x253   : > { %v1214_v48 = vpop.permute.xlu0 %1213  ;;  %v1571_v55 = vsel %vm1551_vm10, %v1538_v39, %v1216_v59 }
 0x254   : > { %v1570_v50 = vsel %vm1551_vm10, %v1537_v14, %v1214_v48  ;;  %v1548_v48 = vsel %vm1518_vm9, %v8795_v17, %v8794_v15 }
 0x256   : > { %v1306_v51 = vpop.permute.xlu1 %1305 }
 0x257   : > { %v1604_v7 = vsel %vm1584_vm11, %v1571_v55, %v1306_v51  ;;  %v1304_v6 = vpop.permute.xlu0 %1303  ;;  %v8798_v55 = vld [vmem:[#allocation57_spill] sm:$0xff] }
 0x258   : > { %v1603_v47 = vsel %vm1584_vm11, %v1570_v50, %v1304_v6  ;;  %v1549_v51 = vsel %vm1518_vm9, %v8798_v55, %v8796_v21 }
 0x259   : > { %3954 = vmatprep.mubr.msk.f32.mxu0 %vm1622_vm12, %v1603_v47  ;;  %v8799_v47 = vld [vmem:[#allocation32_spill] sm:$0xff] }
 0x25a   : > { %3955 = vmatmul.mubr.msk.f32.gmra.mrb[18].mxu0 %vm1622_vm12, %v1604_v7  ;;  %v1220_v41 = vpop.permute.xlu1 %1219 }
 0x25b   : > { %v1218_v38 = vpop.permute.xlu0 %1217  ;;  %v1573_v45 = vsel %vm1551_vm10, %v1540_v26, %v1220_v41  ;;  %v1550_v41 = vsel %vm1518_vm9, %v8799_v47, %v8794_v15 }
 0x25c   : > { %v1572_v37 = vsel %vm1551_vm10, %v1539_v30, %v1218_v38 }
 0x25e   : > { %v1310_v24 = vpop.permute.xlu1 %1309 }
 0x25f   : > { %v1606_v11 = vsel %vm1584_vm11, %v1573_v45, %v1310_v24  ;;  %v1308_v56 = vpop.permute.xlu0 %1307 }
 0x260   : > { %v1605_v42 = vsel %vm1584_vm11, %v1572_v37, %v1308_v56 }
 0x261   : > { %3957 = vmatprep.mubr.msk.f32.mxu0 %vm1622_vm12, %v1605_v42 }
 0x262   : > { %3958 = vmatmul.mubr.msk.f32.gmra.mrb[20].mxu0 %vm1622_vm12, %v1606_v11  ;;  %v1224_v3 = vpop.permute.xlu1 %1223 }
 0x263   : > { %v1222_v18 = vpop.permute.xlu0 %1221  ;;  %v1575_v4 = vsel %vm1551_vm10, %v1542_v61, %v1224_v3 }
 0x264   : > { %v1574_v27 = vsel %vm1551_vm10, %v1541_v46, %v1222_v18 }
 0x266   : > { %v1314_v13 = vpop.permute.xlu1 %1313 }
 0x267   : > { %v1608_v31 = vsel %vm1584_vm11, %v1575_v4, %v1314_v13  ;;  %v1312_v10 = vpop.permute.xlu0 %1311 }
 0x268   : > { %v1607_v62 = vsel %vm1584_vm11, %v1574_v27, %v1312_v10 }
 0x269   : > { %3960 = vmatprep.mubr.msk.f32.mxu0 %vm1622_vm12, %v1607_v62 }
 0x26a   : > { %3961 = vmatmul.mubr.msk.f32.gmra.mrb[22].mxu0 %vm1622_vm12, %v1608_v31  ;;  %v1228_v8 = vpop.permute.xlu1 %1227 }
 0x26b   : > { %v1226_v35 = vpop.permute.xlu0 %1225  ;;  %v1577_v1 = vsel %vm1551_vm10, %v1544_v49, %v1228_v8 }
 0x26c   : > { %v1576_v19 = vsel %vm1551_vm10, %v1543_v54, %v1226_v35 }
 0x26e   : > { %v1318_v57 = vpop.permute.xlu1 %1317 }
 0x26f   : > { %v1610_v5 = vsel %vm1584_vm11, %v1577_v1, %v1318_v57  ;;  %v1316_v40 = vpop.permute.xlu0 %1315 }
 0x270   : > { %v1609_v0 = vsel %vm1584_vm11, %v1576_v19, %v1316_v40 }
 0x271   : > { %3963 = vmatprep.mubr.msk.f32.mxu0 %vm1622_vm12, %v1609_v0 }
 0x272   : > { %3964 = vmatmul.mubr.msk.f32.gmra.mrb[24].mxu0 %vm1622_vm12, %v1610_v5  ;;  %v1232_v34 = vpop.permute.xlu1 %1231 }
 0x273   : > { %v1230_v20 = vpop.permute.xlu0 %1229  ;;  %v1579_v33 = vsel %vm1551_vm10, %v1546_v32, %v1232_v34 }
 0x274   : > { %v1578_v28 = vsel %vm1551_vm10, %v1545_v60, %v1230_v20 }
 0x276   : > { %v1322_v43 = vpop.permute.xlu1 %1321 }
 0x277   : > { %v1612_v16 = vsel %vm1584_vm11, %v1579_v33, %v1322_v43  ;;  %v1320_v44 = vpop.permute.xlu0 %1319 }
 0x278   : > { %v1611_v59 = vsel %vm1584_vm11, %v1578_v28, %v1320_v44 }
 0x279   : > { %3966 = vmatprep.mubr.msk.f32.mxu0 %vm1622_vm12, %v1611_v59 }
 0x27a   : > { %3967 = vmatmul.mubr.msk.f32.gmra.mrb[26].mxu0 %vm1622_vm12, %v1612_v16  ;;  %v1236_v25 = vpop.permute.xlu1 %1235 }
 0x27b   : > { %v1234_v29 = vpop.permute.xlu0 %1233  ;;  %v1581_v22 = vsel %vm1551_vm10, %v1548_v48, %v1236_v25  ;;  %v1583_v38 = vsel %vm1551_vm10, %v1550_v41, %v1236_v25 }
 0x27c   : > { %v1580_v58 = vsel %vm1551_vm10, %v1547_v2, %v1234_v29  ;;  %v1582_v7 = vsel %vm1551_vm10, %v1549_v51, %v1234_v29 }
 0x27e   : > { %v1326_v52 = vpop.permute.xlu1 %1325 }
 0x27f   : > { %v1324_v39 = vpop.permute.xlu0 %1323  ;;  %v1614_v14 = vsel %vm1584_vm11, %v1581_v22, %v1326_v52  ;;  %v1616_v26 = vsel %vm1584_vm11, %v1583_v38, %v1326_v52 }
 0x280   : > { %v1613_v50 = vsel %vm1584_vm11, %v1580_v58, %v1324_v39  ;;  %v1615_v6 = vsel %vm1584_vm11, %v1582_v7, %v1324_v39 }
 0x281   : > { %3969 = vmatprep.mubr.msk.f32.mxu0 %vm1622_vm12, %v1613_v50 }
 0x282   : > { %3970 = vmatmul.mubr.msk.f32.gmra.mrb[28].mxu0 %vm1622_vm12, %v1614_v14 }
 0x283   : > { %3972 = vmatprep.mubr.msk.f32.mxu0 %vm1622_vm12, %v1615_v6 }
 0x286   : > { %3973 = vmatmul.mubr.msk.f32.gmra.mrb[30].mxu0 %vm1622_vm12, %v1616_v26 }
 0x2f4   : > { %v3929_v30 = vpop.f32.mrb[0].mxu0 }
 0x2f5   : > { %v1949_v45 = vmax.f32 %v3929_v30, 0.0  ;;  %v1789_v24 = vpop.f32.mrb[1].mxu0 }
 0x2f6   : > { %v1948_v37 = vmax.f32 %v1789_v24, 0.0 }
 0x2f7   : > { %v2013_v11 = vrot.slane %v1949_v45, 7  ;;  %v2107_v56 = vrot.slane %v1949_v45, 6 }
 0x2f8   : > { %v2012_v42 = vrot.slane %v1948_v37, 7  ;;  %v3932_v3 = vpop.f32.mrb[2].mxu0 }
 0x2f9   : > { %v6829_v18 = vsel %vm265_vm0, %v2013_v11, %v2107_v56  ;;  %v1951_v61 = vmax.f32 %v3932_v3, 0.0  ;;  %v1799_v46 = vpop.f32.mrb[3].mxu0 }
 0x2fa   : > { %v2204_v4 = vrot.slane %v6829_v18, 1  ;;  %v6833_v13 = vsel %vm265_vm0, %v2012_v42, %v2013_v11  ;;  %v6836_v27 = vsel %vm265_vm0, %v1948_v37, %v2012_v42  ;;  %v1950_v35 = vmax.f32 %v1799_v46, 0.0 }
 0x2fb   : > { %v2201_v31 = vrot.slane %v6836_v27, 1  ;;  %v2202_v10 = vrot.slane %v6833_v13, 1  ;;  %v2016_v62 = vrot.slane %v1951_v61, 7  ;;  %v2108_v8 = vrot.slane %v1951_v61, 6 }
 0x2fc   : > { %v3935_v49 = vpop.f32.mrb[4].mxu0  ;;  %v2015_v5 = vrot.slane %v1950_v35, 7  ;;  %v2279_v3 = vrot.slane %v6829_v18, 2 }
 0x2fd   : > { %v1953_v36 = vmax.f32 %v3935_v49, 0.0  ;;  %v1809_v54 = vpop.f32.mrb[5].mxu0  ;;  %v2203_v1 = vsel %vm455_vm1, %v2201_v31, %v2202_v10  ;;  %v2205_v57 = vsel %vm455_vm1, %v2202_v10, %v2204_v4  ;;  %v6843_v19 = vsel %vm265_vm0, %v2016_v62, %v2108_v8 }
 0x2fe   : > { %v1952_v40 = vmax.f32 %v1809_v54, 0.0  ;;  %v6845_v0 = vpack.i.bf16 %v2205_v57, %v2203_v1  ;;  %v6848_v63 = vsel %vm265_vm0, %v2015_v5, %v2016_v62  ;;  %v6851_v12 = vsel %vm265_vm0, %v1950_v35, %v2015_v5 }
 0x2ff   : > { %v2019_v34 = vrot.slane %v1953_v36, 7  ;;  %v2109_v20 = vrot.slane %v1953_v36, 6  ;;  %v2209_v23 = vrot.slane %v6843_v19, 1  ;;  %v2206_v60 = vrot.slane %v6851_v12, 1 }
 0x300   : > { %8800 = vst [vmem:[#allocation39_spill] sm:$0xff] %v6845_v0  ;;  %v2018_v32 = vrot.slane %v1952_v40, 7  ;;  %4084 = vrot.lane.b32.xlu0 %v6845_v0, %s4875_s30  ;;  %v3938_v53 = vpop.f32.mrb[6].mxu0  ;;  %v2207_v33 = vrot.slane %v6848_v63, 1  ;;  %v2276_v31 = vrot.slane %v6836_v27, 2  ;;  %v2277_v10 = vrot.slane %v6833_v13, 2 }
 0x301   : > { %v1819_v43 = vpop.f32.mrb[7].mxu0  ;;  %v6859_v28 = vsel %vm265_vm0, %v2019_v34, %v2109_v20  ;;  %v1955_v59 = vmax.f32 %v3938_v53, 0.0  ;;  %v2284_v20 = vrot.slane %v6843_v19, 2 }
 0x302   : > { %v6862_v16 = vsel %vm265_vm0, %v2018_v32, %v2019_v34  ;;  %v6865_v44 = vsel %vm265_vm0, %v1952_v40, %v2018_v32  ;;  %v2214_v25 = vrot.slane %v6859_v28, 1  ;;  %v1954_v21 = vmax.f32 %v1819_v43, 0.0 }
 0x303   : > { %8801 = vst [vmem:[#allocation40_spill] sm:$0xff] %v6862_v16  ;;  %8802 = vst [vmem:[#allocation41_spill] sm:$0xff] %v6865_v44  ;;  %v2211_v29 = vrot.slane %v6865_v44, 1  ;;  %v2212_v15 = vrot.slane %v6862_v16, 1  ;;  %v2022_v17 = vrot.slane %v1955_v59, 7  ;;  %v2110_v48 = vrot.slane %v1955_v59, 6 }
 0x304   : > { %v2208_v9 = vsel %vm455_vm1, %v2206_v60, %v2207_v33  ;;  %v2210_v2 = vsel %vm455_vm1, %v2207_v33, %v2209_v23  ;;  %v2021_v50 = vrot.slane %v1954_v21, 7  ;;  %v2278_v53 = vsel %vm531_vm2, %v2276_v31, %v2277_v10 }
 0x305   : > { %v3941_v22 = vpop.f32.mrb[8].mxu0  ;;  %v2213_v52 = vsel %vm455_vm1, %v2211_v29, %v2212_v15  ;;  %v6874_v58 = vsel %vm265_vm0, %v2022_v17, %v2110_v48  ;;  %v6876_v39 = vpack.i.bf16 %v2210_v2, %v2208_v9  ;;  %v2215_v51 = vsel %vm455_vm1, %v2212_v15, %v2214_v25 }
 0x306   : > { %v1957_v14 = vmax.f32 %v3941_v22, 0.0  ;;  %v1829_v55 = vpop.f32.mrb[9].mxu0  ;;  %v6881_v41 = vpack.i.bf16 %v2215_v51, %v2213_v52  ;;  %v2219_v38 = vrot.slane %v6874_v58, 1  ;;  %v6885_v26 = vsel %vm265_vm0, %v2021_v50, %v2022_v17 }
 0x307   : > { %8803 = vst [vmem:[#allocation42_spill] sm:$0xff] %v6876_v39  ;;  %v1956_v7 = vmax.f32 %v1829_v55, 0.0  ;;  %4089 = vrot.lane.b32.xlu1 %v6876_v39, %s4875_s30  ;;  %8805 = vst [vmem:[#allocation43_spill] sm:$0xff] %v6885_v26  ;;  %v6888_v30 = vsel %vm265_vm0, %v1954_v21, %v2021_v50  ;;  %v2217_v37 = vrot.slane %v6885_v26, 1  ;;  %v2281_v23 = vrot.slane %v6851_v12, 2 }
 0x308   : > { %v2025_v6 = vrot.slane %v1957_v14, 7  ;;  %v2111_v47 = vrot.slane %v1957_v14, 6  ;;  %8804 = vst [vmem:[#allocation44_spill] sm:$0xff] %v6881_v41  ;;  %8806 = vst [vmem:[#allocation45_spill] sm:$0xff] %v6888_v30  ;;  %v2216_v24 = vrot.slane %v6888_v30, 1  ;;  %4094 = vrot.lane.b32.xlu0 %v6881_v41, %s4875_s30  ;;  %v2282_v60 = vrot.slane %v6848_v63, 2 }
 0x309   : > { %v2024_v45 = vrot.slane %v1956_v7, 7  ;;  %v2220_v8 = vsel %vm455_vm1, %v2217_v37, %v2219_v38  ;;  %v2280_v43 = vsel %vm531_vm2, %v2277_v10, %v2279_v3  ;;  %v2289_v59 = vrot.slane %v6859_v28, 2 }
 0x30a   : > { %v6895_v11 = vsel %vm265_vm0, %v2025_v6, %v2111_v47  ;;  %v2218_v62 = vsel %vm455_vm1, %v2216_v24, %v2217_v37  ;;  %v2286_v15 = vrot.slane %v6865_v44, 2  ;;  %v2287_v17 = vrot.slane %v6862_v16, 2 }
 0x30b   : > { %v6898_v56 = vsel %vm265_vm0, %v2024_v45, %v2025_v6  ;;  %v6901_v42 = vsel %vm265_vm0, %v1956_v7, %v2024_v45  ;;  %v2224_v61 = vrot.slane %v6895_v11, 1  ;;  %v6911_v49 = vpack.i.bf16 %v2220_v8, %v2218_v62 }
 0x30c   : > { %8807 = vst [vmem:[#allocation46_spill] sm:$0xff] %v6898_v56  ;;  %8808 = vst [vmem:[#allocation47_spill] sm:$0xff] %v6901_v42  ;;  %v2221_v46 = vrot.slane %v6901_v42, 1  ;;  %v2222_v4 = vrot.slane %v6898_v56, 1  ;;  %v2294_v9 = vrot.slane %v6874_v58, 2  ;;  %v2291_v28 = vrot.slane %v6888_v30, 2 }
 0x30d   : > { %v3944_v35 = vpop.f32.mrb[10].mxu0  ;;  %8809 = vst [vmem:[#allocation48_spill] sm:$0xff] %v6911_v49  ;;  %4099 = vrot.lane.b32.xlu1 %v6911_v49, %s4875_s30  ;;  %v2292_v2 = vrot.slane %v6885_v26, 2  ;;  %v2299_v22 = vrot.slane %v6895_v11, 2  ;;  %v2296_v14 = vrot.slane %v6901_v42, 2  ;;  %v2297_v6 = vrot.slane %v6898_v56, 2 }
 0x30e   : > { %v1959_v36 = vmax.f32 %v3944_v35, 0.0  ;;  %v1839_v54 = vpop.f32.mrb[11].mxu0  ;;  %v2223_v18 = vsel %vm455_vm1, %v2221_v46, %v2222_v4  ;;  %v2225_v1 = vsel %vm455_vm1, %v2222_v4, %v2224_v61  ;;  %v2283_v58 = vsel %vm531_vm2, %v2281_v23, %v2282_v60 }
 0x30f   : > { %v1958_v57 = vmax.f32 %v1839_v54, 0.0  ;;  %v6915_v5 = vpack.i.bf16 %v2225_v1, %v2223_v18  ;;  %v2285_v37 = vsel %vm531_vm2, %v2282_v60, %v2284_v20  ;;  %v6956_v61 = vpack.i.bf16 %v2280_v43, %v2278_v53 }
 0x310   : > { %v2028_v40 = vrot.slane %v1959_v36, 7  ;;  %v2112_v34 = vrot.slane %v1959_v36, 6  ;;  %v2288_v10 = vsel %vm531_vm2, %v2286_v15, %v2287_v17  ;;  %v2290_v35 = vsel %vm531_vm2, %v2287_v17, %v2289_v59 }
 0x311   : > { %8810 = vst [vmem:[#allocation49_spill] sm:$0xff] %v6915_v5  ;;  %v2027_v32 = vrot.slane %v1958_v57, 7  ;;  %4104 = vrot.lane.b32.xlu0 %v6915_v5, %s4875_s30  ;;  %v2298_v36 = vsel %vm531_vm2, %v2296_v14, %v2297_v6  ;;  %v2300_v18 = vsel %vm531_vm2, %v2297_v6, %v2299_v22  ;;  %v2293_v1 = vsel %vm531_vm2, %v2291_v28, %v2292_v2 }
 0x312   : > { %v6926_v33 = vsel %vm265_vm0, %v2028_v40, %v2112_v34  ;;  %v2295_v53 = vsel %vm531_vm2, %v2292_v2, %v2294_v9 }
 0x313   : > { %v2229_v25 = vrot.slane %v6926_v33, 1  ;;  %v6932_v19 = vsel %vm265_vm0, %v2027_v32, %v2028_v40  ;;  %v6935_v29 = vsel %vm265_vm0, %v1958_v57, %v2027_v32  ;;  %v6971_v57 = vpack.i.bf16 %v2285_v37, %v2283_v58 }
 0x314   : > { %8811 = vst [vmem:[#allocation50_spill] sm:$0xff] %v6932_v19  ;;  %8812 = vst [vmem:[#allocation108_spill] sm:$0xff] %v6935_v29  ;;  %v2226_v48 = vrot.slane %v6935_v29, 1  ;;  %v2227_v21 = vrot.slane %v6932_v19, 1  ;;  %v2301_v23 = vrot.slane %v6935_v29, 2  ;;  %v2302_v59 = vrot.slane %v6932_v19, 2 }
 0x315   : > { %v3947_v52 = vpop.f32.mrb[12].mxu0  ;;  %v2304_v17 = vrot.slane %v6926_v33, 2  ;;  %v6999_v58 = vpack.i.bf16 %v2295_v53, %v2293_v1 }
 0x316   : > { %v1961_v55 = vmax.f32 %v3947_v52, 0.0  ;;  %v1849_v51 = vpop.f32.mrb[13].mxu0  ;;  %v2228_v50 = vsel %vm455_vm1, %v2226_v48, %v2227_v21  ;;  %v2230_v7 = vsel %vm455_vm1, %v2227_v21, %v2229_v25  ;;  %v6983_v21 = vpack.i.bf16 %v2290_v35, %v2288_v10 }
 0x317   : > { %v1960_v47 = vmax.f32 %v1849_v51, 0.0  ;;  %v6949_v38 = vpack.i.bf16 %v2230_v7, %v2228_v50  ;;  %v2303_v50 = vsel %vm531_vm2, %v2301_v23, %v2302_v59 }
 0x318   : > { %v2031_v45 = vrot.slane %v1961_v55, 7  ;;  %v2113_v24 = vrot.slane %v1961_v55, 6 }
 0x319   : > { %8813 = vst [vmem:[#allocation110_spill] sm:$0xff] %v6949_v38  ;;  %v2030_v11 = vrot.slane %v1960_v47, 7  ;;  %4109 = vrot.lane.b32.xlu1 %v6949_v38, %s4875_s30 }
 0x31a   : > { %v2161_v3 = vsel %vm265_vm0, %v2031_v45, %v2113_v24 }
 0x31b   : > { %v2234_v46 = vrot.slane %v2161_v3, 1  ;;  %v6959_v4 = vsel %vm265_vm0, %v2030_v11, %v2031_v45  ;;  %v6962_v31 = vsel %vm265_vm0, %v1960_v47, %v2030_v11  ;;  %v2309_v33 = vrot.slane %v2161_v3, 2 }
 0x31c   : > { %8814 = vst [vmem:[#allocation69_spill] sm:$0xff] %v6959_v4  ;;  %8815 = vst [vmem:[#allocation7_spill] sm:$0xff] %v6962_v31  ;;  %v2231_v62 = vrot.slane %v6962_v31, 1  ;;  %v2232_v8 = vrot.slane %v6959_v4, 1  ;;  %v2306_v28 = vrot.slane %v6962_v31, 2  ;;  %v2307_v2 = vrot.slane %v6959_v4, 2 }
 0x31d   : > { %v3950_v54 = vpop.f32.mrb[14].mxu0  ;;  %v2305_v47 = vsel %vm531_vm2, %v2302_v59, %v2304_v17 }
 0x31e   : > { %v1963_v40 = vmax.f32 %v3950_v54, 0.0  ;;  %v1859_v34 = vpop.f32.mrb[15].mxu0  ;;  %v2233_v20 = vsel %vm455_vm1, %v2231_v62, %v2232_v8  ;;  %v2235_v32 = vsel %vm455_vm1, %v2232_v8, %v2234_v46  ;;  %v2308_v62 = vsel %vm531_vm2, %v2306_v28, %v2307_v2 }
 0x31f   : > { %v1962_v60 = vmax.f32 %v1859_v34, 0.0  ;;  %v6977_v43 = vpack.i.bf16 %v2235_v32, %v2233_v20  ;;  %v2310_v54 = vsel %vm531_vm2, %v2307_v2, %v2309_v33  ;;  %v7014_v53 = vpack.i.bf16 %v2305_v47, %v2303_v50 }
 0x320   : > { %v2034_v25 = vrot.slane %v1963_v40, 7  ;;  %v2114_v15 = vrot.slane %v1963_v40, 6  ;;  %v7008_v40 = vpack.i.bf16 %v2300_v18, %v2298_v36 }
 0x321   : > { %8816 = vst [vmem:[#allocation87_spill] sm:$0xff] %v6977_v43  ;;  %v2033_v48 = vrot.slane %v1962_v60, 7  ;;  %4114 = vrot.lane.b32.xlu0 %v6977_v43, %s4875_s30 }
 0x322   : > { %v2162_v9 = vsel %vm265_vm0, %v2034_v25, %v2114_v15 }
 0x323   : > { %v2239_v22 = vrot.slane %v2162_v9, 1  ;;  %v6989_v52 = vsel %vm265_vm0, %v2033_v48, %v2034_v25  ;;  %v6992_v14 = vsel %vm265_vm0, %v1962_v60, %v2033_v48  ;;  %v2314_v1 = vrot.slane %v2162_v9, 2 }
 0x324   : > { %v2236_v55 = vrot.slane %v6992_v14, 1  ;;  %v2237_v51 = vrot.slane %v6989_v52, 1  ;;  %v2311_v7 = vrot.slane %v6992_v14, 2  ;;  %v2312_v45 = vrot.slane %v6989_v52, 2 }
 0x325   : > { %v3953_v6 = vpop.f32.mrb[16].mxu0  ;;  %v7027_v9 = vpack.i.bf16 %v2310_v54, %v2308_v62 }
 0x326   : > { %v1965_v24 = vmax.f32 %v3953_v6, 0.0  ;;  %v1869_v37 = vpop.f32.mrb[17].mxu0  ;;  %v2238_v11 = vsel %vm455_vm1, %v2236_v55, %v2237_v51  ;;  %v2240_v3 = vsel %vm455_vm1, %v2237_v51, %v2239_v22  ;;  %v2313_v32 = vsel %vm531_vm2, %v2311_v7, %v2312_v45 }
 0x327   : > { %v1964_v46 = vmax.f32 %v1869_v37, 0.0  ;;  %v7004_v10 = vpack.i.bf16 %v2240_v3, %v2238_v11  ;;  %v2315_v28 = vsel %vm531_vm2, %v2312_v45, %v2314_v1 }
 0x328   : > { %v2037_v8 = vrot.slane %v1965_v24, 7  ;;  %v2115_v35 = vrot.slane %v1965_v24, 6  ;;  %v7039_v11 = vpack.i.bf16 %v2315_v28, %v2313_v32 }
 0x329   : > { %8817 = vst [vmem:[#allocation105_spill] sm:$0xff] %v7004_v10  ;;  %v2036_v34 = vrot.slane %v1964_v46, 7  ;;  %4119 = vrot.lane.b32.xlu1 %v7004_v10, %s4875_s30 }
 0x32a   : > { %v2163_v20 = vsel %vm265_vm0, %v2037_v8, %v2115_v35 }
 0x32b   : > { %v2244_v23 = vrot.slane %v2163_v20, 1  ;;  %v2319_v60 = vrot.slane %v2163_v20, 2  ;;  %v7017_v59 = vsel %vm265_vm0, %v2036_v34, %v2037_v8  ;;  %v7020_v25 = vsel %vm265_vm0, %v1964_v46, %v2036_v34 }
 0x32c   : > { %v2241_v36 = vrot.slane %v7020_v25, 1  ;;  %v2242_v18 = vrot.slane %v7017_v59, 1  ;;  %v2316_v15 = vrot.slane %v7020_v25, 2  ;;  %v2317_v17 = vrot.slane %v7017_v59, 2 }
 0x32d   : > { %v3956_v48 = vpop.f32.mrb[18].mxu0 }
 0x32e   : > { %v1967_v2 = vmax.f32 %v3956_v48, 0.0  ;;  %v1879_v22 = vpop.f32.mrb[19].mxu0  ;;  %v2243_v33 = vsel %vm455_vm1, %v2241_v36, %v2242_v18  ;;  %v2245_v55 = vsel %vm455_vm1, %v2242_v18, %v2244_v23  ;;  %v2318_v51 = vsel %vm531_vm2, %v2316_v15, %v2317_v17 }
 0x32f   : > { %v1966_v50 = vmax.f32 %v1879_v22, 0.0  ;;  %v7032_v7 = vpack.i.bf16 %v2245_v55, %v2243_v33  ;;  %v2320_v6 = vsel %vm531_vm2, %v2317_v17, %v2319_v60 }
 0x330   : > { %v2040_v47 = vrot.slane %v1967_v2, 7  ;;  %v2116_v24 = vrot.slane %v1967_v2, 6  ;;  %v7035_v37 = vpack.i.bf16 %v2320_v6, %v2318_v51 }
 0x331   : > { %8818 = vst [vmem:[#allocation59_spill] sm:$0xff] %v7032_v7  ;;  %v2039_v45 = vrot.slane %v1966_v50, 7  ;;  %4124 = vrot.lane.b32.xlu0 %v7032_v7, %s4875_s30 }
 0x332   : > { %v2164_v3 = vsel %vm265_vm0, %v2040_v47, %v2116_v24 }
 0x333   : > { %v2249_v46 = vrot.slane %v2164_v3, 1  ;;  %v2324_v62 = vrot.slane %v2164_v3, 2  ;;  %v7043_v8 = vsel %vm265_vm0, %v2039_v45, %v2040_v47  ;;  %v7046_v35 = vsel %vm265_vm0, %v1966_v50, %v2039_v45 }
 0x334   : > { %v2246_v54 = vrot.slane %v7046_v35, 1  ;;  %v2247_v1 = vrot.slane %v7043_v8, 1  ;;  %v2321_v34 = vrot.slane %v7046_v35, 2  ;;  %v2322_v20 = vrot.slane %v7043_v8, 2 }
 0x335   : > { %v3959_v32 = vpop.f32.mrb[20].mxu0 }
 0x336   : > { %v1969_v23 = vmax.f32 %v3959_v32, 0.0  ;;  %v1889_v60 = vpop.f32.mrb[21].mxu0  ;;  %v2248_v36 = vsel %vm455_vm1, %v2246_v54, %v2247_v1  ;;  %v2250_v18 = vsel %vm455_vm1, %v2247_v1, %v2249_v46  ;;  %v2323_v15 = vsel %vm531_vm2, %v2321_v34, %v2322_v20 }
 0x337   : > { %v1968_v17 = vmax.f32 %v1889_v60, 0.0  ;;  %v7055_v48 = vpack.i.bf16 %v2250_v18, %v2248_v36  ;;  %v2325_v28 = vsel %vm531_vm2, %v2322_v20, %v2324_v62 }
 0x338   : > { %v2043_v2 = vrot.slane %v1969_v23, 7  ;;  %v2117_v22 = vrot.slane %v1969_v23, 6  ;;  %v7058_v33 = vpack.i.bf16 %v2325_v28, %v2323_v15 }
 0x339   : > { %8819 = vst [vmem:[#allocation71_spill] sm:$0xff] %v7055_v48  ;;  %v2042_v55 = vrot.slane %v1968_v17, 7  ;;  %4129 = vrot.lane.b32.xlu1 %v7055_v48, %s4875_s30 }
 0x33a   : > { %v2165_v51 = vsel %vm265_vm0, %v2043_v2, %v2117_v22 }
 0x33b   : > { %v2254_v50 = vrot.slane %v2165_v51, 1  ;;  %v2329_v6 = vrot.slane %v2165_v51, 2  ;;  %v7064_v47 = vsel %vm265_vm0, %v2042_v55, %v2043_v2  ;;  %v7067_v24 = vsel %vm265_vm0, %v1968_v17, %v2042_v55 }
 0x33c   : > { %8820 = vst [vmem:[#allocation8_spill] sm:$0xff] %v7067_v24  ;;  %v2251_v45 = vrot.slane %v7067_v24, 1  ;;  %v2252_v3 = vrot.slane %v7064_v47, 1  ;;  %v2326_v46 = vrot.slane %v7067_v24, 2  ;;  %v2327_v62 = vrot.slane %v7064_v47, 2 }
 0x33d   : > { %v3962_v54 = vpop.f32.mrb[22].mxu0 }
 0x33e   : > { %v1971_v1 = vmax.f32 %v3962_v54, 0.0  ;;  %v1899_v34 = vpop.f32.mrb[23].mxu0  ;;  %v2253_v20 = vsel %vm455_vm1, %v2251_v45, %v2252_v3  ;;  %v2255_v32 = vsel %vm455_vm1, %v2252_v3, %v2254_v50  ;;  %v2328_v23 = vsel %vm531_vm2, %v2326_v46, %v2327_v62 }
 0x33f   : > { %v1970_v60 = vmax.f32 %v1899_v34, 0.0  ;;  %v7076_v36 = vpack.i.bf16 %v2255_v32, %v2253_v20  ;;  %v2330_v18 = vsel %vm531_vm2, %v2327_v62, %v2329_v6 }
 0x340   : > { %v2046_v15 = vrot.slane %v1971_v1, 7  ;;  %v2118_v17 = vrot.slane %v1971_v1, 6  ;;  %v7081_v2 = vpack.i.bf16 %v2330_v18, %v2328_v23 }
 0x341   : > { %8821 = vst [vmem:[#allocation86_spill] sm:$0xff] %v7076_v36  ;;  %v2045_v28 = vrot.slane %v1970_v60, 7  ;;  %4134 = vrot.lane.b32.xlu0 %v7076_v36, %s4875_s30 }
 0x342   : > { %v2166_v22 = vsel %vm265_vm0, %v2046_v15, %v2118_v17 }
 0x343   : > { %v2259_v55 = vrot.slane %v2166_v22, 1  ;;  %v2334_v51 = vrot.slane %v2166_v22, 2  ;;  %v7085_v50 = vsel %vm265_vm0, %v2045_v28, %v2046_v15  ;;  %v7088_v45 = vsel %vm265_vm0, %v1970_v60, %v2045_v28 }
 0x344   : > { %8822 = vst [vmem:[#allocation107_spill] sm:$0xff] %v7085_v50  ;;  %8823 = vst [vmem:[#allocation104_spill] sm:$0xff] %v7088_v45  ;;  %v2256_v6 = vrot.slane %v7088_v45, 1  ;;  %v2257_v3 = vrot.slane %v7085_v50, 1  ;;  %v2331_v46 = vrot.slane %v7088_v45, 2  ;;  %v2332_v62 = vrot.slane %v7085_v50, 2 }
 0x345   : > { %v3965_v54 = vpop.f32.mrb[24].mxu0 }
 0x346   : > { %v1973_v1 = vmax.f32 %v3965_v54, 0.0  ;;  %v1909_v34 = vpop.f32.mrb[25].mxu0  ;;  %v2258_v20 = vsel %vm455_vm1, %v2256_v6, %v2257_v3  ;;  %v2260_v32 = vsel %vm455_vm1, %v2257_v3, %v2259_v55  ;;  %v2333_v23 = vsel %vm531_vm2, %v2331_v46, %v2332_v62 }
 0x347   : > { %v1972_v18 = vmax.f32 %v1909_v34, 0.0  ;;  %v7097_v60 = vpack.i.bf16 %v2260_v32, %v2258_v20  ;;  %v2335_v15 = vsel %vm531_vm2, %v2332_v62, %v2334_v51 }
 0x348   : > { %v2049_v17 = vrot.slane %v1973_v1, 7  ;;  %v2119_v28 = vrot.slane %v1973_v1, 6  ;;  %v7100_v22 = vpack.i.bf16 %v2335_v15, %v2333_v23 }
 0x349   : > { %8824 = vst [vmem:[#allocation61_spill] sm:$0xff] %v7097_v60  ;;  %v2048_v10 = vrot.slane %v1972_v18, 7  ;;  %4139 = vrot.lane.b32.xlu1 %v7097_v60, %s4875_s30 }
 0x34a   : > { %v2167_v54 = vsel %vm265_vm0, %v2049_v17, %v2119_v28 }
 0x34b   : > { %v2264_v6 = vrot.slane %v2167_v54, 1  ;;  %v2339_v36 = vrot.slane %v2167_v54, 2  ;;  %v7106_v55 = vsel %vm265_vm0, %v2048_v10, %v2049_v17  ;;  %v7109_v3 = vsel %vm265_vm0, %v1972_v18, %v2048_v10 }
 0x34c   : > { %8825 = vst [vmem:[#allocation67_spill] sm:$0xff] %v7106_v55  ;;  %8826 = vst [vmem:[#allocation6_spill] sm:$0xff] %v7109_v3  ;;  %v2261_v51 = vrot.slane %v7109_v3, 1  ;;  %v2262_v46 = vrot.slane %v7106_v55, 1  ;;  %v2336_v62 = vrot.slane %v7109_v3, 2  ;;  %v2337_v1 = vrot.slane %v7106_v55, 2 }
 0x34d   : > { %v3968_v34 = vpop.f32.mrb[26].mxu0 }
 0x34e   : > { %v1975_v20 = vmax.f32 %v3968_v34, 0.0  ;;  %v1919_v32 = vpop.f32.mrb[27].mxu0  ;;  %v2263_v23 = vsel %vm455_vm1, %v2261_v51, %v2262_v46  ;;  %v2265_v15 = vsel %vm455_vm1, %v2262_v46, %v2264_v6  ;;  %v2338_v17 = vsel %vm531_vm2, %v2336_v62, %v2337_v1 }
 0x34f   : > { %v1974_v28 = vmax.f32 %v1919_v32, 0.0  ;;  %v7118_v10 = vpack.i.bf16 %v2265_v15, %v2263_v23  ;;  %v2340_v18 = vsel %vm531_vm2, %v2337_v1, %v2339_v36 }
 0x350   : > { %v2052_v54 = vrot.slane %v1975_v20, 7  ;;  %v2120_v60 = vrot.slane %v1975_v20, 6  ;;  %v7121_v48 = vpack.i.bf16 %v2340_v18, %v2338_v17 }
 0x351   : > { %8827 = vst [vmem:[#allocation58_spill] sm:$0xff] %v7118_v10  ;;  %v2051_v43 = vrot.slane %v1974_v28, 7  ;;  %4144 = vrot.lane.b32.xlu0 %v7118_v10, %s4875_s30 }
 0x352   : > { %v2168_v34 = vsel %vm265_vm0, %v2052_v54, %v2120_v60 }
 0x353   : > { %v2269_v51 = vrot.slane %v2168_v34, 1  ;;  %v2344_v7 = vrot.slane %v2168_v34, 2  ;;  %v7127_v6 = vsel %vm265_vm0, %v2051_v43, %v2052_v54  ;;  %v7130_v46 = vsel %vm265_vm0, %v1974_v28, %v2051_v43 }
 0x354   : > { %8828 = vst [vmem:[#allocation89_spill] sm:$0xff] %v7127_v6  ;;  %8829 = vst [vmem:[#allocation130_spill] sm:$0xff] %v7130_v46  ;;  %v2266_v36 = vrot.slane %v7130_v46, 1  ;;  %v2267_v62 = vrot.slane %v7127_v6, 1  ;;  %v2341_v1 = vrot.slane %v7130_v46, 2  ;;  %v2342_v20 = vrot.slane %v7127_v6, 2 }
 0x355   : > { %v3971_v32 = vpop.f32.mrb[28].mxu0 }
 0x356   : > { %v1977_v23 = vmax.f32 %v3971_v32, 0.0  ;;  %v1929_v15 = vpop.f32.mrb[29].mxu0  ;;  %v2268_v60 = vsel %vm455_vm1, %v2266_v36, %v2267_v62  ;;  %v2270_v17 = vsel %vm455_vm1, %v2267_v62, %v2269_v51  ;;  %v2343_v18 = vsel %vm531_vm2, %v2341_v1, %v2342_v20 }
 0x357   : > { %v1976_v54 = vmax.f32 %v1929_v15, 0.0  ;;  %v7139_v43 = vpack.i.bf16 %v2270_v17, %v2268_v60  ;;  %v2345_v28 = vsel %vm531_vm2, %v2342_v20, %v2344_v7 }
 0x358   : > { %v2055_v34 = vrot.slane %v1977_v23, 7  ;;  %v2121_v10 = vrot.slane %v1977_v23, 6  ;;  %v7142_v5 = vpack.i.bf16 %v2345_v28, %v2343_v18 }
 0x359   : > { %8830 = vst [vmem:[#allocation111_spill] sm:$0xff] %v7139_v43  ;;  %v2054_v38 = vrot.slane %v1976_v54, 7  ;;  %4149 = vrot.lane.b32.xlu1 %v7139_v43, %s4875_s30  ;;  %v3974_v32 = vpop.f32.mrb[30].mxu0 }
 0x35a   : > { %v2169_v36 = vsel %vm265_vm0, %v2055_v34, %v2121_v10  ;;  %v1979_v41 = vmax.f32 %v3974_v32, 0.0  ;;  %v1939_v51 = vpop.f32.mrb[31].mxu0 }
 0x35b   : > { %v2274_v62 = vrot.slane %v2169_v36, 1  ;;  %v2349_v1 = vrot.slane %v2169_v36, 2  ;;  %v7148_v15 = vsel %vm265_vm0, %v2054_v38, %v2055_v34  ;;  %v7151_v7 = vsel %vm265_vm0, %v1976_v54, %v2054_v38 }
 0x35c   : > { %8831 = vst [vmem:[#allocation106_spill] sm:$0xff] %v7148_v15  ;;  %8832 = vst [vmem:[#allocation63_spill] sm:$0xff] %v7151_v7  ;;  %v2271_v20 = vrot.slane %v7151_v7, 1  ;;  %v2272_v23 = vrot.slane %v7148_v15, 1  ;;  %v2346_v60 = vrot.slane %v7151_v7, 2  ;;  %v2347_v17 = vrot.slane %v7148_v15, 2 }
 0x35d   : > { %v2058_v18 = vrot.slane %v1979_v41, 7  ;;  %v2122_v10 = vrot.slane %v1979_v41, 6  ;;  %v1978_v28 = vmax.f32 %v1939_v51, 0.0  ;;  %4159 = vrot.lane.b32.xlu1 %v6956_v61, %s4877_s5 }
 0x35e   : > { %v2273_v34 = vsel %vm455_vm1, %v2271_v20, %v2272_v23  ;;  %v2275_v32 = vsel %vm455_vm1, %v2272_v23, %v2274_v62  ;;  %v2348_v38 = vsel %vm531_vm2, %v2346_v60, %v2347_v17  ;;  %v2350_v54 = vsel %vm531_vm2, %v2347_v17, %v2349_v1 }
 0x35f   : > { %v2170_v36 = vsel %vm265_vm0, %v2058_v18, %v2122_v10  ;;  %v2057_v43 = vrot.slane %v1978_v28, 7  ;;  %v7164_v49 = vpack.i.bf16 %v2275_v32, %v2273_v34  ;;  %v7172_v62 = vpack.i.bf16 %v2350_v54, %v2348_v38 }
 0x360   : > { %v2356_v0 = vrot.slane %v2170_v36, 1  ;;  %v2361_v39 = vrot.slane %v2170_v36, 2  ;;  %v4233_v38 = vpack.i.bf16 %v6833_v13, %v6836_v27  ;;  %v7224_v54 = vpack.i.bf16 %v6932_v19, %v6935_v29  ;;  %v8840_v29 = vld [vmem:[#allocation87_spill] sm:$0xff] }
 0x361   : > { %v2059_v41 = vsel %vm265_vm0, %v2057_v43, %v2058_v18  ;;  %v2154_v51 = vsel %vm265_vm0, %v1978_v28, %v2057_v43  ;;  %4169 = vrot.lane.b32.xlu1 %v6983_v21, %s4877_s5  ;;  %4154 = vrot.lane.b32.xlu0 %v7164_v49, %s4875_s30  ;;  %v7228_v36 = vpack.i.bf16 %v6862_v16, %v6865_v44  ;;  %s4882_s30 = smov 40   ;;  %vm3452_vm0 = vcmask 523264  }
 0x362   : > { %v2353_v1 = vrot.slane %v2154_v51, 1  ;;  %v2354_v20 = vrot.slane %v2059_v41, 1  ;;  %v2358_v23 = vrot.slane %v2154_v51, 2  ;;  %v2359_v60 = vrot.slane %v2059_v41, 2 }
 0x363   : > { %v7174_v17 = vpack.i.bf16 %v2059_v41, %v2154_v51  ;;  %v7236_v41 = vpack.i.bf16 %v6989_v52, %v6992_v14  ;;  %v7240_v51 = vpack.i.bf16 %v6898_v56, %v6901_v42  ;;  %v4779_v56 = vld [vmem:[%s4961_s28 + $0x8] sm:$0xff] }
 0x364   : > { %v2355_v10 = vsel %vm455_vm1, %v2353_v1, %v2354_v20  ;;  %v2357_v18 = vsel %vm455_vm1, %v2354_v20, %v2356_v0  ;;  %v2360_v43 = vsel %vm531_vm2, %v2358_v23, %v2359_v60  ;;  %v2362_v28 = vsel %vm531_vm2, %v2359_v60, %v2361_v39 }
 0x365   : > { %4179 = vrot.lane.b32.xlu1 %v7008_v40, %s4877_s5  ;;  %4164 = vrot.lane.b32.xlu0 %v6971_v57, %s4877_s5  ;;  %v7184_v34 = vpack.i.bf16 %v2357_v18, %v2355_v10  ;;  %v7186_v32 = vpack.i.bf16 %v2362_v28, %v2360_v43  ;;  %v4238_v0 = vpack.i.bf16 %v6848_v63, %v6851_v12  ;;  %vm3485_vm1 = vcmask 588800  }
 0x366   : > { %v7215_v39 = vpack.i.bf16 %v6885_v26, %v6888_v30  ;;  %v4278_v1 = vpack.i.bf16 %v7043_v8, %v7046_v35  ;;  %v7250_v20 = vpack.i.bf16 %v6959_v4, %v6962_v31  ;;  %v7257_v23 = vpack.i.bf16 %v7085_v50, %v7088_v45  ;;  %v8834_v31 = vld [vmem:[#allocation39_spill] sm:$0xff]  ;;  %v8835_v4 = vld [vmem:[#allocation48_spill] sm:$0xff]  ;;  %v4781_v45 = vld [vmem:[%s4961_s28 + $0x88] sm:$0xff] }
 0x367   : > { %v7261_v60 = vpack.i.bf16 %v7017_v59, %v7020_v25  ;;  %v7269_v10 = vpack.i.bf16 %v7127_v6, %v7130_v46  ;;  %v4283_v18 = vpack.i.bf16 %v7064_v47, %v7067_v24  ;;  %v7278_v43 = vpack.i.bf16 %v7106_v55, %v7109_v3  ;;  %v8836_v46 = vld [vmem:[#allocation44_spill] sm:$0xff]  ;;  %v8837_v6 = vld [vmem:[#allocation110_spill] sm:$0xff] }
 0x368   : > { %v7286_v28 = vpack.i.bf16 %v7148_v15, %v7151_v7  ;;  %v8838_v7 = vld [vmem:[#allocation49_spill] sm:$0xff]  ;;  %v8839_v15 = vld [vmem:[#allocation59_spill] sm:$0xff]  ;;  %vm3519_vm2 = vcmask 621568  }
 0x369   : > { %4189 = vrot.lane.b32.xlu1 %v7027_v9, %s4877_s5  ;;  %4174 = vrot.lane.b32.xlu0 %v6999_v58, %s4877_s5  ;;  %vm7643_vm3 = vmpackc.low %vm3519_vm2, %vm3519_vm2 }
 0x36d   : > { %4199 = vrot.lane.b32.xlu1 %v7035_v37, %s4877_s5  ;;  %4184 = vrot.lane.b32.xlu0 %v7014_v53, %s4877_s5 }
 0x371   : > { %4209 = vrot.lane.b32.xlu1 %v7081_v2, %s4877_s5  ;;  %4194 = vrot.lane.b32.xlu0 %v7039_v11, %s4877_s5 }
 0x372   : > { %v7316_v19 = vpop.permute.xlu0 %4084 }
 0x375   : > { %4219 = vrot.lane.b32.xlu1 %v7121_v48, %s4877_s5  ;;  %4204 = vrot.lane.b32.xlu0 %v7058_v33, %s4877_s5 }
 0x379   : > { %4229 = vrot.lane.b32.xlu1 %v7172_v62, %s4877_s5  ;;  %4214 = vrot.lane.b32.xlu0 %v7100_v22, %s4877_s5 }
 0x37a   : > { %v7326_v3 = vpop.permute.xlu0 %4094 }
 0x37b   : > { %8843 = vst [vmem:[#allocation12_spill] sm:$0xff] %v7326_v3 }
 0x37d   : > { %4239 = vrot.lane.b32.xlu1 %v4238_v0, %s4879_s7  ;;  %4224 = vrot.lane.b32.xlu0 %v7142_v5, %s4877_s5  ;;  %s4884_s5 = smov 56  }
 0x381   : > { %4249 = vrot.lane.b32.xlu1 %v7215_v39, %s4879_s7  ;;  %4234 = vrot.lane.b32.xlu0 %v4233_v38, %s4879_s7  ;;  %v8833_v38 = vld [vmem:[#allocation42_spill] sm:$0xff] }
 0x383   : > { %v7335_v30 = vpop.permute.xlu0 %4104 }
 0x384   : > { %8845 = vst [vmem:[#allocation133_spill] sm:$0xff] %v7335_v30 }
 0x385   : > { %4259 = vrot.lane.b32.xlu1 %v7224_v54, %s4879_s7  ;;  %4244 = vrot.lane.b32.xlu0 %v7228_v36, %s4879_s7 }
 0x389   : > { %4269 = vrot.lane.b32.xlu1 %v7236_v41, %s4879_s7  ;;  %4254 = vrot.lane.b32.xlu0 %v7240_v51, %s4879_s7 }
 0x38d   : > { %4279 = vrot.lane.b32.xlu1 %v4278_v1, %s4879_s7  ;;  %4264 = vrot.lane.b32.xlu0 %v7250_v20, %s4879_s7 }
 0x391   : > { %4289 = vrot.lane.b32.xlu1 %v7257_v23, %s4879_s7  ;;  %4274 = vrot.lane.b32.xlu0 %v7261_v60, %s4879_s7 }
 0x395   : > { %4299 = vrot.lane.b32.xlu1 %v7269_v10, %s4879_s7  ;;  %4284 = vrot.lane.b32.xlu0 %v4283_v18, %s4879_s7 }
 0x399   : > { %4294 = vrot.lane.b32.xlu0 %v7278_v43, %s4879_s7  ;;  %4309 = vrot.lane.b32.xlu1 %v7174_v17, %s4879_s7 }
 0x39d   : > { %4304 = vrot.lane.b32.xlu0 %v7286_v28, %s4879_s7  ;;  %4319 = vrot.lane.b32.xlu1 %v8833_v38, %s4881_s29  ;;  %s4886_s7 = smov 72  }
 0x3a1   : > { %4314 = vrot.lane.b32.xlu0 %v8834_v31, %s4881_s29  ;;  %4329 = vrot.lane.b32.xlu1 %v8835_v4, %s4881_s29  ;;  %v7311_v31 = vpop.permute.xlu1 %4089 }
 0x3a5   : > { %4324 = vrot.lane.b32.xlu0 %v8836_v46, %s4881_s29  ;;  %4339 = vrot.lane.b32.xlu1 %v8837_v6, %s4881_s29  ;;  %v7318_v42 = vpop.permute.xlu1 %4099 }
 0x3a6   : > { %8841 = vst [vmem:[#allocation73_spill] sm:$0xff] %v7318_v42 }
 0x3a9   : > { %4334 = vrot.lane.b32.xlu0 %v8838_v7, %s4881_s29  ;;  %4349 = vrot.lane.b32.xlu1 %v8839_v15, %s4881_s29  ;;  %v7328_v55 = vpop.permute.xlu1 %4109 }
 0x3aa   : > { %8844 = vst [vmem:[#allocation60_spill] sm:$0xff] %v7328_v55 }
 0x3ad   : > { %4344 = vrot.lane.b32.xlu0 %v8840_v29, %s4881_s29  ;;  %4359 = vrot.lane.b32.xlu1 %v6956_v61, %s4882_s30  ;;  %v8842_v61 = vld [vmem:[#allocation71_spill] sm:$0xff]  ;;  %v7337_v26 = vpop.permute.xlu1 %4119 }
 0x3b1   : > { %4354 = vrot.lane.b32.xlu0 %v7035_v37, %s4882_s30  ;;  %4369 = vrot.lane.b32.xlu1 %v4238_v0, %s4883_s4  ;;  %v4778_v0 = vld [vmem:[%s4961_s28] sm:$0xff] }
 0x3b5   : > { %4364 = vrot.lane.b32.xlu0 %v4278_v1, %s4883_s4  ;;  %4379 = vrot.lane.b32.xlu1 %v8833_v38, %s4884_s5  ;;  %v4398_v1 = vpack.i.bf16 %v4779_v56, %v4778_v0  ;;  %v4780_v38 = vld [vmem:[%s4961_s28 + $0x80] sm:$0xff]  ;;  %v7342_v56 = vpop.permute.xlu0 %4114  ;;  %v7344_v0 = vpop.permute.xlu1 %4129 }
 0x3b6   : > { %v4393_v50 = vpack.i.bf16 %v4781_v45, %v4780_v38  ;;  %8846 = vst [vmem:[#allocation70_spill] sm:$0xff] %v7342_v56 }
 0x3b9   : > { %4374 = vrot.lane.b32.xlu0 %v8842_v61, %s4884_s5  ;;  %4389 = vrot.lane.b32.xlu1 %v6971_v57, %s4885_s6  ;;  %v7349_v45 = vpop.permute.xlu0 %4124 }
 0x3bd   : > { %4384 = vrot.lane.b32.xlu0 %v7058_v33, %s4885_s6  ;;  %4399 = vrot.lane.b32.xlu1 %v4398_v1, %s4886_s7  ;;  %v7351_v1 = vpop.permute.xlu1 %4139 }
 0x3be   : > { %8847 = vst [vmem:[#allocation5_spill] sm:$0xff] %v7351_v1 }
 0x3c1   : > { %4394 = vrot.lane.b32.xlu0 %v4393_v50, %s4886_s7  ;;  %4409 = vrot.lane.b32.xlu1 %v7058_v33, %s4882_s30  ;;  %v8848_v50 = vld [vmem:[#allocation86_spill] sm:$0xff]  ;;  %v7357_v33 = vpop.permute.xlu0 %4134 }
 0x3c5   : > { %4404 = vrot.lane.b32.xlu0 %v8842_v61, %s4881_s29  ;;  %4419 = vrot.lane.b32.xlu1 %v4283_v18, %s4883_s4  ;;  %v4782_v18 = vld [vmem:[%s4961_s28 + $0x90] sm:$0xff]  ;;  %v4783_v61 = vld [vmem:[%s4961_s28 + $0x98] sm:$0xff]  ;;  %v7367_v55 = vpop.permute.xlu0 %4144 }
 0x3c6   : > { %v4448_v56 = vpack.i.bf16 %v4783_v61, %v4782_v18  ;;  %8850 = vst [vmem:[#allocation131_spill] sm:$0xff] %v7367_v55  ;;  %v4785_v18 = vld [vmem:[%s4961_s28 + $0x18] sm:$0xff] }
 0x3c9   : > { %4414 = vrot.lane.b32.xlu0 %v6971_v57, %s4882_s30  ;;  %4429 = vrot.lane.b32.xlu1 %v8848_v50, %s4884_s5 }
 0x3cb   : > { %v7359_v38 = vpop.permute.xlu1 %4149 }
 0x3cc   : > { %8849 = vst [vmem:[#allocation91_spill] sm:$0xff] %v7359_v38 }
 0x3cd   : > { %4424 = vrot.lane.b32.xlu0 %v7228_v36, %s4883_s4  ;;  %4439 = vrot.lane.b32.xlu1 %v7081_v2, %s4885_s6  ;;  %v4784_v36 = vld [vmem:[%s4961_s28 + $0x10] sm:$0xff] }
 0x3ce   : > { %v4453_v61 = vpack.i.bf16 %v4785_v18, %v4784_v36 }
 0x3cf   : > { %v7369_v57 = vpop.permute.xlu1 %4159 }
 0x3d1   : > { %4434 = vrot.lane.b32.xlu0 %v8836_v46, %s4884_s5  ;;  %4449 = vrot.lane.b32.xlu1 %v4448_v56, %s4886_s7 }
 0x3d3   : > { %v7374_v30 = vpop.permute.xlu1 %4169  ;;  %v7376_v38 = vpop.permute.xlu0 %4154 }
 0x3d4   : > { %8851 = vst [vmem:[#allocation88_spill] sm:$0xff] %v7374_v30  ;;  %8852 = vst [vmem:[#allocation113_spill] sm:$0xff] %v7376_v38 }
 0x3d5   : > { %4444 = vrot.lane.b32.xlu0 %v6983_v21, %s4885_s6  ;;  %4459 = vrot.lane.b32.xlu1 %v8848_v50, %s4881_s29 }
 0x3d7   : > { %v7384_v55 = vpop.permute.xlu1 %4179  ;;  %v7386_v1 = vpop.permute.xlu0 %4164 }
 0x3d8   : > { %8853 = vst [vmem:[#allocation109_spill] sm:$0xff] %v7384_v55 }
 0x3d9   : > { %4454 = vrot.lane.b32.xlu0 %v4453_v61, %s4886_s7  ;;  %4469 = vrot.lane.b32.xlu1 %v6983_v21, %s4882_s30  ;;  %v4787_v61 = vld [vmem:[%s4961_s28 + $0x28] sm:$0xff] }
 0x3db   : > { %v7391_v46 = vpop.permute.xlu1 %4189  ;;  %v7393_v56 = vpop.permute.xlu0 %4174 }
 0x3dc   : > { %8854 = vst [vmem:[#allocation65_spill] sm:$0xff] %v7391_v46  ;;  %8855 = vst [vmem:[#allocation62_spill] sm:$0xff] %v7393_v56 }
 0x3dd   : > { %4464 = vrot.lane.b32.xlu0 %v7081_v2, %s4882_s30  ;;  %4479 = vrot.lane.b32.xlu1 %v7215_v39, %s4883_s4  ;;  %v8857_v2 = vld [vmem:[#allocation61_spill] sm:$0xff] }
 0x3de   : > { %v4786_v39 = vld [vmem:[%s4961_s28 + $0x20] sm:$0xff] }
 0x3df   : > { %v7399_v50 = vpop.permute.xlu1 %4199  ;;  %v7401_v36 = vpop.permute.xlu0 %4184  ;;  %v4508_v46 = vpack.i.bf16 %v4787_v61, %v4786_v39 }
 0x3e0   : > { %8856 = vst [vmem:[#allocation10_spill] sm:$0xff] %v7401_v36 }
 0x3e1   : > { %4474 = vrot.lane.b32.xlu0 %v7257_v23, %s4883_s4  ;;  %4489 = vrot.lane.b32.xlu1 %v8835_v4, %s4884_s5  ;;  %v4788_v4 = vld [vmem:[%s4961_s28 + $0xa0] sm:$0xff]  ;;  %v4789_v23 = vld [vmem:[%s4961_s28 + $0xa8] sm:$0xff] }
 0x3e2   : > { %v4503_v55 = vpack.i.bf16 %v4789_v23, %v4788_v4 }
 0x3e3   : > { %v7407_v21 = vpop.permute.xlu1 %4209  ;;  %v7409_v18 = vpop.permute.xlu0 %4194 }
 0x3e5   : > { %4484 = vrot.lane.b32.xlu0 %v8857_v2, %s4884_s5  ;;  %4499 = vrot.lane.b32.xlu1 %v6999_v58, %s4885_s6 }
 0x3e7   : > { %v7417_v38 = vpop.permute.xlu1 %4219  ;;  %v7419_v36 = vpop.permute.xlu0 %4204 }
 0x3e8   : > { %8858 = vst [vmem:[#allocation72_spill] sm:$0xff] %v7417_v38 }
 0x3e9   : > { %4494 = vrot.lane.b32.xlu0 %v7100_v22, %s4885_s6  ;;  %4509 = vrot.lane.b32.xlu1 %v4508_v46, %s4886_s7 }
 0x3eb   : > { %v7426_v56 = vpop.permute.xlu1 %4229  ;;  %v7428_v42 = vpop.permute.xlu0 %4214 }
 0x3ec   : > { %8859 = vst [vmem:[#allocation9_spill] sm:$0xff] %v7426_v56  ;;  %8860 = vst [vmem:[#allocation132_spill] sm:$0xff] %v7428_v42 }
 0x3ed   : > { %4504 = vrot.lane.b32.xlu0 %v4503_v55, %s4886_s7  ;;  %4519 = vrot.lane.b32.xlu1 %v7100_v22, %s4882_s30  ;;  %v8863_v55 = vld [vmem:[#allocation58_spill] sm:$0xff] }
 0x3ef   : > { %v7433_v39 = vpop.permute.xlu1 %4239  ;;  %v7435_v61 = vpop.permute.xlu0 %4224 }
 0x3f0   : > { %8861 = vst [vmem:[#allocation90_spill] sm:$0xff] %v7435_v61 }
 0x3f1   : > { %4514 = vrot.lane.b32.xlu0 %v8857_v2, %s4881_s29  ;;  %4529 = vrot.lane.b32.xlu1 %v7278_v43, %s4883_s4  ;;  %v4790_v43 = vld [vmem:[%s4961_s28 + $0xb0] sm:$0xff]  ;;  %v4791_v2 = vld [vmem:[%s4961_s28 + $0xb8] sm:$0xff] }
 0x3f2   : > { %v4558_v56 = vpack.i.bf16 %v4791_v2, %v4790_v43  ;;  %v4793_v43 = vld [vmem:[%s4961_s28 + $0x38] sm:$0xff] }
 0x3f3   : > { %v7441_v46 = vpop.permute.xlu1 %4249  ;;  %v7443_v4 = vpop.permute.xlu0 %4234 }
 0x3f4   : > { %8862 = vst [vmem:[#allocation112_spill] sm:$0xff] %v7441_v46  ;;  %v4237_v44 = vunpack.i.h.bf16 %v7443_v4  ;;  %v4236_v16 = vunpack.i.l.bf16 %v7443_v4 }
 0x3f5   : > { %4524 = vrot.lane.b32.xlu0 %v6999_v58, %s4882_s30  ;;  %4539 = vrot.lane.b32.xlu1 %v8863_v55, %s4884_s5 }
 0x3f7   : > { %v7449_v22 = vpop.permute.xlu1 %4259  ;;  %v7451_v23 = vpop.permute.xlu0 %4244 }
 0x3f8   : > { %8864 = vst [vmem:[#allocation74_spill] sm:$0xff] %v7449_v22 }
 0x3f9   : > { %4534 = vrot.lane.b32.xlu0 %v7240_v51, %s4883_s4  ;;  %4549 = vrot.lane.b32.xlu1 %v7121_v48, %s4885_s6  ;;  %v4792_v51 = vld [vmem:[%s4961_s28 + $0x30] sm:$0xff] }
 0x3fa   : > { %v4563_v2 = vpack.i.bf16 %v4793_v43, %v4792_v51 }
 0x3fb   : > { %v7459_v61 = vpop.permute.xlu1 %4269  ;;  %v7461_v58 = vpop.permute.xlu0 %4254 }
 0x3fc   : > { %8865 = vst [vmem:[#allocation16_spill] sm:$0xff] %v7459_v61  ;;  %8866 = vst [vmem:[#allocation64_spill] sm:$0xff] %v7461_v58 }
 0x3fd   : > { %4544 = vrot.lane.b32.xlu0 %v8838_v7, %s4884_s5  ;;  %4559 = vrot.lane.b32.xlu1 %v4558_v56, %s4886_s7 }
 0x3ff   : > { %v7466_v22 = vpop.permute.xlu1 %4279  ;;  %v7468_v38 = vpop.permute.xlu0 %4264 }
 0x400   : > { %8867 = vst [vmem:[#allocation75_spill] sm:$0xff] %v7468_v38 }
 0x401   : > { %4554 = vrot.lane.b32.xlu0 %v7008_v40, %s4885_s6  ;;  %4569 = vrot.lane.b32.xlu1 %v8863_v55, %s4881_s29 }
 0x403   : > { %v7476_v61 = vpop.permute.xlu1 %4289  ;;  %v7478_v58 = vpop.permute.xlu0 %4274 }
 0x404   : > { %v4277_v30 = vunpack.i.h.bf16 %v7478_v58 }
 0x405   : > { %4564 = vrot.lane.b32.xlu0 %v4563_v2, %s4886_s7  ;;  %4579 = vrot.lane.b32.xlu1 %v7008_v40, %s4882_s30  ;;  %v4795_v2 = vld [vmem:[%s4961_s28 + $0x48] sm:$0xff] }
 0x407   : > { %v7483_v7 = vpop.permute.xlu1 %4299  ;;  %v7485_v56 = vpop.permute.xlu0 %4284 }
 0x408   : > { %8868 = vst [vmem:[#allocation15_spill] sm:$0xff] %v7483_v7 }
 0x409   : > { %4589 = vrot.lane.b32.xlu1 %v7224_v54, %s4883_s4  ;;  %4574 = vrot.lane.b32.xlu0 %v7121_v48, %s4882_s30  ;;  %v8872_v48 = vld [vmem:[#allocation111_spill] sm:$0xff]  ;;  %v4794_v54 = vld [vmem:[%s4961_s28 + $0x40] sm:$0xff] }
 0x40b   : > { %v7491_v55 = vpop.permute.xlu1 %4309  ;;  %v7493_v51 = vpop.permute.xlu0 %4294 }
 0x40c   : > { %8869 = vst [vmem:[#allocation92_spill] sm:$0xff] %v7491_v55  ;;  %8870 = vst [vmem:[#allocation11_spill] sm:$0xff] %v7493_v51  ;;  %v4618_v55 = vpack.i.bf16 %v4795_v2, %v4794_v54 }
 0x40d   : > { %4599 = vrot.lane.b32.xlu1 %v8837_v6, %s4884_s5  ;;  %4584 = vrot.lane.b32.xlu0 %v7269_v10, %s4883_s4  ;;  %v4796_v6 = vld [vmem:[%s4961_s28 + $0xc0] sm:$0xff]  ;;  %v4797_v10 = vld [vmem:[%s4961_s28 + $0xc8] sm:$0xff] }
 0x40f   : > { %v7499_v40 = vpop.permute.xlu1 %4319  ;;  %v7501_v43 = vpop.permute.xlu0 %4304 }
 0x410   : > { %8871 = vst [vmem:[#allocation93_spill] sm:$0xff] %v7501_v43  ;;  %v4613_v43 = vpack.i.bf16 %v4797_v10, %v4796_v6 }
 0x411   : > { %4609 = vrot.lane.b32.xlu1 %v7014_v53, %s4885_s6  ;;  %4594 = vrot.lane.b32.xlu0 %v8872_v48, %s4884_s5 }
 0x413   : > { %v7509_v38 = vpop.permute.xlu1 %4329  ;;  %v7511_v7 = vpop.permute.xlu0 %4314 }
 0x414   : > { %8873 = vst [vmem:[#allocation51_spill] sm:$0xff] %v7509_v38  ;;  %v4162_v38 = vunpack.i.h.bf16 %v7369_v57 }
 0x415   : > { %4619 = vrot.lane.b32.xlu1 %v4618_v55, %s4886_s7  ;;  %4604 = vrot.lane.b32.xlu0 %v7142_v5, %s4885_s6  ;;  %v4087_v55 = vunpack.i.h.bf16 %v7316_v19 }
 0x417   : > { %v7518_v51 = vpop.permute.xlu1 %4339  ;;  %v7520_v42 = vpop.permute.xlu0 %4324 }
 0x418   : > { %8874 = vst [vmem:[#allocation114_spill] sm:$0xff] %v7518_v51  ;;  %v4121_v51 = vunpack.i.l.bf16 %v7337_v26 }
 0x419   : > { %4629 = vrot.lane.b32.xlu1 %v7142_v5, %s4882_s30  ;;  %4614 = vrot.lane.b32.xlu0 %v4613_v43, %s4886_s7  ;;  %v4086_v5 = vunpack.i.l.bf16 %v7316_v19  ;;  %v4122_v43 = vunpack.i.h.bf16 %v7337_v26 }
 0x41b   : > { %v7525_v54 = vpop.permute.xlu1 %4349  ;;  %v7527_v2 = vpop.permute.xlu0 %4334  ;;  %v3229_v26 = vsel %vm1388_vm4, %v6836_v27, %v4086_v5  ;;  %v4798_v27 = vld [vmem:[%s4961_s28 + $0xd0] sm:$0xff] }
 0x41c   : > { %8875 = vst [vmem:[#allocation66_spill] sm:$0xff] %v7527_v2  ;;  %v3244_v2 = vsel %vm1388_vm4, %v6989_v52, %v4122_v43  ;;  %v4197_v43 = vunpack.i.h.bf16 %v7409_v18  ;;  %v4352_v4 = vunpack.i.h.bf16 %v7525_v54 }
 0x41d   : > { %4639 = vrot.lane.b32.xlu1 %v7286_v28, %s4883_s4  ;;  %4624 = vrot.lane.b32.xlu0 %v8872_v48, %s4881_s29  ;;  %v3230_v28 = vsel %vm1388_vm4, %v6833_v13, %v4087_v55  ;;  %v4161_v48 = vunpack.i.l.bf16 %v7369_v57  ;;  %v4799_v55 = vld [vmem:[%s4961_s28 + $0xd8] sm:$0xff]  ;;  %v4800_v57 = vld [vmem:[%s4961_s28 + $0x50] sm:$0xff] }
 0x41e   : > { %v4668_v5 = vpack.i.bf16 %v4799_v55, %v4798_v27  ;;  %v7578_v52 = vsel %vm1452_vm7, %v3230_v28, %v4162_v38  ;;  %v3274_v38 = vsel %vm1452_vm7, %v3244_v2, %v4197_v43 }
 0x41f   : > { %v7534_v6 = vpop.permute.xlu1 %4359  ;;  %v7536_v10 = vpop.permute.xlu0 %4344  ;;  %v7572_v46 = vsel %vm1452_vm7, %v3229_v26, %v4161_v48  ;;  %v4317_v26 = vunpack.i.h.bf16 %v7511_v7  ;;  %v3290_v48 = vsel %vm1518_vm9, %v7578_v52, %v4237_v44  ;;  %v3306_v2 = vsel %vm1518_vm9, %v3274_v38, %v4277_v30 }
 0x420   : > { %8876 = vst [vmem:[#allocation68_spill] sm:$0xff] %v7536_v10  ;;  %v4362_v28 = vunpack.i.h.bf16 %v7534_v6 }
 0x421   : > { %4649 = vrot.lane.b32.xlu1 %v7164_v49, %s4884_s5  ;;  %4634 = vrot.lane.b32.xlu0 %v7014_v53, %s4882_s30  ;;  %v3243_v53 = vsel %vm1388_vm4, %v6992_v14, %v4121_v51  ;;  %v4196_v14 = vunpack.i.l.bf16 %v7409_v18  ;;  %v4801_v51 = vld [vmem:[%s4961_s28 + $0x58] sm:$0xff]  ;;  %v4361_v18 = vunpack.i.l.bf16 %v7534_v6 }
 0x422   : > { %v4673_v13 = vpack.i.bf16 %v4801_v51, %v4800_v57  ;;  %v4316_v57 = vunpack.i.l.bf16 %v7511_v7  ;;  %v4351_v51 = vunpack.i.l.bf16 %v7525_v54  ;;  %v3289_v7 = vsel %vm1518_vm9, %v7572_v46, %v4236_v16 }
 0x423   : > { %v7548_v10 = vpop.permute.xlu1 %4369  ;;  %v7550_v19 = vpop.permute.xlu0 %4354  ;;  %v3322_v16 = vsel %vm1584_vm11, %v3290_v48, %v4317_v26 }
 0x424   : > { %v4372_v43 = vunpack.i.h.bf16 %v7548_v10  ;;  %v4371_v6 = vunpack.i.l.bf16 %v7548_v10  ;;  %v4357_v10 = vunpack.i.h.bf16 %v7550_v19 }
 0x425   : > { %4659 = vrot.lane.b32.xlu1 %v7172_v62, %s4885_s6  ;;  %4644 = vrot.lane.b32.xlu0 %v7250_v20, %s4883_s4  ;;  %v4276_v20 = vunpack.i.l.bf16 %v7478_v58  ;;  %v3273_v58 = vsel %vm1452_vm7, %v3243_v53, %v4196_v14  ;;  %v3321_v53 = vsel %vm1584_vm11, %v3289_v7, %v4316_v57  ;;  %v3338_v14 = vsel %vm1584_vm11, %v3306_v2, %v4352_v4 }
 0x426   : > { %v3354_v30 = vsel %vm3353_vm13, %v3321_v53, %v4361_v18  ;;  %v3355_v57 = vsel %vm3353_vm13, %v3322_v16, %v4362_v28 }
 0x427   : > { %v4380_v27 = vpop.permute.xlu1 %4379  ;;  %v4365_v55 = vpop.permute.xlu0 %4364 }
 0x428   : > { %v4381_v38 = vunpack.i.l.bf16 %v4380_v27  ;;  %v4382_v48 = vunpack.i.h.bf16 %v4380_v27  ;;  %v4367_v26 = vunpack.i.h.bf16 %v4365_v55 }
 0x429   : > { %4669 = vrot.lane.b32.xlu1 %v4668_v5, %s4886_s7  ;;  %4654 = vrot.lane.b32.xlu0 %v8840_v29, %s4884_s5  ;;  %v3305_v5 = vsel %vm1518_vm9, %v3273_v58, %v4276_v20  ;;  %v4356_v20 = vunpack.i.l.bf16 %v7550_v19  ;;  %v3371_v19 = vsel %vm3353_vm13, %v3338_v14, %v4357_v10 }
 0x42a   : > { %v3337_v44 = vsel %vm1584_vm11, %v3305_v5, %v4351_v51  ;;  %v4366_v51 = vunpack.i.l.bf16 %v4365_v55  ;;  %v3387_v5 = vsel %vm3386_vm14, %v3354_v30, %v4371_v6  ;;  %v3404_v16 = vsel %vm3386_vm14, %v3371_v19, %v4367_v26 }
 0x42b   : > { %v4390_v3 = vpop.permute.xlu1 %4389  ;;  %v4375_v29 = vpop.permute.xlu0 %4374  ;;  %v3370_v24 = vsel %vm3353_vm13, %v3337_v44, %v4356_v20  ;;  %v3420_v27 = vsel %vm3419_vm15, %v3387_v5, %v4381_v38 }
 0x42c   : > { %v4391_v58 = vunpack.i.l.bf16 %v4390_v3  ;;  %v4377_v2 = vunpack.i.h.bf16 %v4375_v29  ;;  %v4376_v54 = vunpack.i.l.bf16 %v4375_v29  ;;  %v4392_v18 = vunpack.i.h.bf16 %v4390_v3 }
 0x42d   : > { %4679 = vrot.lane.b32.xlu1 %v7164_v49, %s4881_s29  ;;  %4664 = vrot.lane.b32.xlu0 %v7027_v9, %s4885_s6  ;;  %v3388_v49 = vsel %vm3386_vm14, %v3355_v57, %v4372_v43  ;;  %v3403_v29 = vsel %vm3386_vm14, %v3370_v24, %v4366_v51  ;;  %v4281_v57 = vunpack.i.l.bf16 %v7466_v22 }
 0x42e   : > { %v3421_v43 = vsel %vm3419_vm15, %v3388_v49, %v4382_v48  ;;  %v3453_v3 = vsel %vm3452_vm0, %v3420_v27, %v4391_v58  ;;  %v8880_v49 = vunpack.i.l.bf16 %v7349_v45  ;;  %v8882_v27 = vunpack.i.h.bf16 %v7399_v50 }
 0x42f   : > { %v4400_v4 = vpop.permute.xlu1 %4399  ;;  %v4385_v7 = vpop.permute.xlu0 %4384  ;;  %v3454_v10 = vsel %vm3452_vm0, %v3421_v43, %v4392_v18 }
 0x430   : > { %v4387_v53 = vunpack.i.h.bf16 %v4385_v7  ;;  %v4386_v28 = vunpack.i.l.bf16 %v4385_v7  ;;  %v4402_v55 = vunpack.i.h.bf16 %v4400_v4  ;;  %v4401_v6 = vunpack.i.l.bf16 %v4400_v4 }
 0x431   : > { %4689 = vrot.lane.b32.xlu1 %v7027_v9, %s4882_s30  ;;  %4674 = vrot.lane.b32.xlu0 %v4673_v13, %s4886_s7  ;;  %v3436_v9 = vsel %vm3419_vm15, %v3403_v29, %v4376_v54  ;;  %v3437_v13 = vsel %vm3419_vm15, %v3404_v16, %v4377_v2  ;;  %v3245_v2 = vsel %vm1388_vm4, %v7020_v25, %v8880_v49  ;;  %v4241_v49 = vunpack.i.l.bf16 %v7433_v39 }
 0x432   : > { %v3469_v24 = vsel %vm3452_vm0, %v3436_v9, %v4386_v28  ;;  %v3470_v38 = vsel %vm3452_vm0, %v3437_v13, %v4387_v53  ;;  %v3486_v26 = vsel %vm3485_vm1, %v3453_v3, %v4401_v6  ;;  %v3487_v51 = vsel %vm3485_vm1, %v3454_v10, %v4402_v55  ;;  %v8883_v6 = vld [vmem:[#allocation105_spill] sm:$0xff]  ;;  %v4803_v9 = vld [vmem:[%s4961_s28 + $0x68] sm:$0xff] }
 0x433   : > { %v4410_v44 = vpop.permute.xlu1 %4409  ;;  %v4395_v20 = vpop.permute.xlu0 %4394  ;;  %v8881_v28 = vunpack.i.l.bf16 %v7399_v50 }
 0x434   : > { %v4397_v30 = vunpack.i.h.bf16 %v4395_v20  ;;  %v4396_v14 = vunpack.i.l.bf16 %v4395_v20  ;;  %v4411_v20 = vunpack.i.l.bf16 %v4410_v44 }
 0x435   : > { %4699 = vrot.lane.b32.xlu1 %v7236_v41, %s4883_s4  ;;  %4684 = vrot.lane.b32.xlu0 %v7172_v62, %s4882_s30  ;;  %v8879_v62 = vunpack.i.h.bf16 %v7349_v45  ;;  %v3275_v19 = vsel %vm1452_vm7, %v3245_v2, %v8881_v28  ;;  %v8884_v45 = vunpack.i.h.bf16 %v7466_v22  ;;  %v4802_v22 = vld [vmem:[%s4961_s28 + $0x60] sm:$0xff] }
 0x436   : > { %v3502_v54 = vsel %vm3485_vm1, %v3469_v24, %v4396_v14  ;;  %v3503_v48 = vsel %vm3485_vm1, %v3470_v38, %v4397_v30  ;;  %v3307_v25 = vsel %vm1518_vm9, %v3275_v19, %v4281_v57  ;;  %v4728_v13 = vpack.i.bf16 %v4803_v9, %v4802_v22 }
 0x437   : > { %v4420_v58 = vpop.permute.xlu1 %4419  ;;  %v4405_v4 = vpop.permute.xlu0 %4404  ;;  %v3983_v7 = vpack.c.bf16 %v3503_v48, %v3502_v54  ;;  %v3246_v5 = vsel %vm1388_vm4, %v7017_v59, %v8879_v62  ;;  %v3986_v59 = vpack.c.bf16 %v3487_v51, %v3486_v26  ;;  %v4805_v26 = vld [vmem:[%s4961_s28 + $0xe8] sm:$0xff]  ;;  %v3291_v9 = vsel %vm1518_vm9, %v7572_v46, %v4241_v49  ;;  %v4807_v49 = vld [vmem:[%s4961_s28 + $0xf8] sm:$0xff] }
 0x438   : > { %v4407_v18 = vunpack.i.h.bf16 %v4405_v4  ;;  %v4406_v53 = vunpack.i.l.bf16 %v4405_v4  ;;  %v3276_v55 = vsel %vm1452_vm7, %v3246_v5, %v8882_v27  ;;  %v4422_v57 = vunpack.i.h.bf16 %v4420_v58 }
 0x439   : > { %4709 = vrot.lane.b32.xlu1 %v8883_v6, %s4884_s5  ;;  %4694 = vrot.lane.b32.xlu0 %v7174_v17, %s4883_s4  ;;  %v3308_v43 = vsel %vm1518_vm9, %v3276_v55, %v8884_v45  ;;  %v4412_v17 = vunpack.i.h.bf16 %v4410_v44  ;;  %v4421_v10 = vunpack.i.l.bf16 %v4420_v58  ;;  %v4804_v44 = vld [vmem:[%s4961_s28 + $0xe0] sm:$0xff]  ;;  %v4242_v58 = vunpack.i.h.bf16 %v7433_v39 }
 0x43a   : > { %3985 = vmatprep.subr.msk.bf16.mxu1 %vm7643_vm3, %v3983_v7  ;;  %v3339_v50 = vsel %vm1584_vm11, %v3307_v25, %v4406_v53  ;;  %v3340_v29 = vsel %vm1584_vm11, %v3308_v43, %v4407_v18  ;;  %v4723_v51 = vpack.i.bf16 %v4805_v26, %v4804_v44  ;;  %v4322_v55 = vunpack.i.h.bf16 %v7499_v40 }
 0x43b   : > { %3988 = vmatpush3.bf16.xpose.msk.msra.mxu1 %vm7643_vm3, %v3986_v59  ;;  %v4430_v16 = vpop.permute.xlu1 %4429  ;;  %v4415_v3 = vpop.permute.xlu0 %4414  ;;  %v3372_v30 = vsel %vm3353_vm13, %v3339_v50, %v4411_v20  ;;  %v3373_v14 = vsel %vm3353_vm13, %v3340_v29, %v4412_v17  ;;  %v4321_v59 = vunpack.i.l.bf16 %v7499_v40 }
 0x43c   : > { %v4432_v54 = vunpack.i.h.bf16 %v4430_v16  ;;  %v4431_v48 = vunpack.i.l.bf16 %v4430_v16  ;;  %v3405_v4 = vsel %vm3386_vm14, %v3372_v30, %v4421_v10  ;;  %v3406_v7 = vsel %vm3386_vm14, %v3373_v14, %v4422_v57 }
 0x43d   : > { %4719 = vrot.lane.b32.xlu1 %v7039_v11, %s4885_s6  ;;  %4704 = vrot.lane.b32.xlu0 %v7184_v34, %s4884_s5  ;;  %v4417_v39 = vunpack.i.h.bf16 %v4415_v3  ;;  %v4416_v43 = vunpack.i.l.bf16 %v4415_v3  ;;  %v3323_v3 = vsel %vm1584_vm11, %v3291_v9, %v4321_v59  ;;  %v4809_v9 = vld [vmem:[%s4961_s28 + $0x78] sm:$0xff] }
 0x43e   : > { %v3438_v53 = vsel %vm3419_vm15, %v3405_v4, %v4431_v48  ;;  %v3439_v28 = vsel %vm3419_vm15, %v3406_v7, %v4432_v54  ;;  %v4132_v54 = vunpack.i.h.bf16 %v7344_v0 }
 0x43f   : > { %v4440_v24 = vpop.permute.xlu1 %4439  ;;  %v4425_v38 = vpop.permute.xlu0 %4424  ;;  %v3356_v46 = vsel %vm3353_vm13, %v3323_v3, %v4416_v43  ;;  %v4287_v43 = vunpack.i.h.bf16 %v7485_v56  ;;  %v4212_v3 = vunpack.i.h.bf16 %v7407_v21 }
 0x440   : > { %v4442_v62 = vunpack.i.h.bf16 %v4440_v24  ;;  %v4441_v5 = vunpack.i.l.bf16 %v4440_v24  ;;  %v4427_v16 = vunpack.i.h.bf16 %v4425_v38  ;;  %v4426_v17 = vunpack.i.l.bf16 %v4425_v38 }
 0x441   : > { %4729 = vrot.lane.b32.xlu1 %v4728_v13, %s4886_s7  ;;  %4714 = vrot.lane.b32.xlu0 %v7186_v32, %s4885_s6  ;;  %v4092_v24 = vunpack.i.h.bf16 %v7311_v31  ;;  %v4091_v38 = vunpack.i.l.bf16 %v7311_v31  ;;  %v3248_v59 = vsel %vm1388_vm4, %v7043_v8, %v4132_v54 }
 0x442   : > { %v3471_v25 = vsel %vm3452_vm0, %v3438_v53, %v4441_v5  ;;  %v3472_v45 = vsel %vm3452_vm0, %v3439_v28, %v4442_v62  ;;  %v4131_v62 = vunpack.i.l.bf16 %v7344_v0 }
 0x443   : > { %v4450_v2 = vpop.permute.xlu1 %4449  ;;  %v4435_v18 = vpop.permute.xlu0 %4434 }
 0x444   : > { %v4452_v19 = vunpack.i.h.bf16 %v4450_v2  ;;  %v4451_v27 = vunpack.i.l.bf16 %v4450_v2  ;;  %v4437_v13 = vunpack.i.h.bf16 %v4435_v18  ;;  %v4436_v30 = vunpack.i.l.bf16 %v4435_v18 }
 0x445   : > { %4739 = vrot.lane.b32.xlu1 %v8883_v6, %s4881_s29  ;;  %4724 = vrot.lane.b32.xlu0 %v4723_v51, %s4886_s7  ;;  %v3292_v6 = vsel %vm1518_vm9, %v7578_v52, %v4242_v58  ;;  %v4806_v58 = vld [vmem:[%s4961_s28 + $0xf0] sm:$0xff]  ;;  %v4167_v18 = vunpack.i.h.bf16 %v7386_v1 }
 0x446   : > { %v3504_v50 = vsel %vm3485_vm1, %v3471_v25, %v4451_v27  ;;  %v3505_v29 = vsel %vm3485_vm1, %v3472_v45, %v4452_v19  ;;  %v3324_v14 = vsel %vm1584_vm11, %v3292_v6, %v4322_v55  ;;  %v4768_v2 = vpack.i.bf16 %v4807_v49, %v4806_v58 }
 0x447   : > { %v3989_v20 = vpack.c.bf16 %v3505_v29, %v3504_v50  ;;  %v7703_v22 = vpop.permute.xlu1 %4459  ;;  %v4445_v40 = vpop.permute.xlu0 %4444  ;;  %v3357_v52 = vsel %vm3353_vm13, %v3324_v14, %v4417_v39  ;;  %v4166_v55 = vunpack.i.l.bf16 %v7386_v1  ;;  %v3247_v25 = vsel %vm1388_vm4, %v7046_v35, %v4131_v62 }
 0x448   : > { %v4447_v57 = vunpack.i.h.bf16 %v4445_v40  ;;  %v4446_v10 = vunpack.i.l.bf16 %v4445_v40  ;;  %v3390_v48 = vsel %vm3386_vm14, %v3357_v52, %v4427_v16  ;;  %v4137_v45 = vunpack.i.h.bf16 %v7357_v33  ;;  %v4808_v40 = vld [vmem:[%s4961_s28 + $0x70] sm:$0xff]  ;;  %s161_s28 = sand.u32 1, %s4864_s13  }
 0x449   : > { %4749 = vrot.lane.b32.xlu1 %v7039_v11, %s4882_s30  ;;  %4734 = vrot.lane.b32.xlu0 %v7184_v34, %s4881_s29  ;;  %v3389_v11 = vsel %vm3386_vm14, %v3356_v46, %v4426_v17  ;;  %v3423_v51 = vsel %vm3419_vm15, %v3390_v48, %v4437_v13  ;;  %v4207_v35 = vunpack.i.h.bf16 %v7419_v36  ;;  %v4206_v1 = vunpack.i.l.bf16 %v7419_v36  ;;  %s3770_s10 = sshll.u32 %s161_s28, 4  ;;  %s3693_s26 = scalar_lea.sflag [#allocation3], %s161_s28 }
 0x44a   : > { %3991 = vmatprep.subr.msk.bf16.mxu1 %vm7643_vm3, %v3989_v20  ;;  %v3422_v26 = vsel %vm3419_vm15, %v3389_v11, %v4436_v30  ;;  %v3456_v5 = vsel %vm3452_vm0, %v3423_v51, %v4447_v57  ;;  %v4246_v39 = vunpack.i.l.bf16 %v7451_v23  ;;  %v4286_v50 = vunpack.i.l.bf16 %v7485_v56  ;;  %s163_s11 = scalar_lea.vmem [#allocation2], %s3770_s10  ;;  %s4814_s29 = sshll.u32 %s4887_s16, 4  ;;  %s4815_s29 = int_to_ptr.vmem [resolvable:$false] %s4814_s29 }
 0x44b   : > { %v7724_v34 = vpop.permute.xlu1 %4469  ;;  %v4455_v44 = vpop.permute.xlu0 %4454  ;;  %v3455_v31 = vsel %vm3452_vm0, %v3422_v26, %v4446_v10  ;;  %v4327_v36 = vunpack.i.h.bf16 %v7520_v42  ;;  %v4326_v20 = vunpack.i.l.bf16 %v7520_v42  ;;  %v4773_v6 = vpack.i.bf16 %v4809_v9, %v4808_v40  ;;  %s3707_s17 = sshll.u32 %s163_s11, 4  ;;  %s8192_s17 = int_to_ptr.vmem [resolvable:$true] %s3707_s17 }
 0x44c   : > { %v4457_v4 = vunpack.i.h.bf16 %v4455_v44  ;;  %v4456_v7 = vunpack.i.l.bf16 %v4455_v44  ;;  %v4461_v13 = vunpack.i.l.bf16 %v7703_v22  ;;  %v4472_v56 = vunpack.i.h.bf16 %v7724_v34  ;;  %s4810_s27 = scalar_lea.vmem %s8192_s17, 256  ;;  %p4817_p0 = scmp.lt.s32.totalorder %s8192_s17, %s4815_s29 }
 0x44d   : > { %4759 = vrot.lane.b32.xlu1 %v8839_v15, %s4884_s5  ;;  %4744 = vrot.lane.b32.xlu0 %v7186_v32, %s4882_s30  ;;  %v3232_v15 = vsel %vm1388_vm4, %v6848_v63, %v4092_v24  ;;  %v3231_v32 = vsel %vm1388_vm4, %v6851_v12, %v4091_v38  ;;  %v7760_v63 = vld [vmem:[%s8239_s2] sm:$0xff]  ;;  %v4136_v12 = vunpack.i.l.bf16 %v7357_v33  ;;  %v4471_v30 = vunpack.i.l.bf16 %v7724_v34  ;;  %p4811_p11 = scmp.ne.s32.totalorder %s8192_s17, %s4810_s27  ;;  %s4816_s30 = scalar_lea.vmem %s4815_s29, 512 }
 0x44e   : > { %v3488_v53 = vsel %vm3485_vm1, %v3455_v31, %v4456_v7  ;;  %v3489_v28 = vsel %vm3485_vm1, %v3456_v5, %v4457_v4  ;;  %v3262_v8 = vsel %vm1452_vm7, %v3232_v15, %v4167_v18  ;;  %3915 = vmatprep.mubr.msk.f32.mxu1 %vm3519_vm2, %v7760_v63  ;;  %v3261_v17 = vsel %vm1452_vm7, %v3231_v32, %v4166_v55  ;;  %p4818_p1 = scmp.lt.s32.totalorder %s4816_s30, %s4810_s27 }
 0x44f   : > { %v3992_v0 = vpack.c.bf16 %v3489_v28, %v3488_v53  ;;  %v7740_v19 = vpop.permute.xlu1 %4479  ;;  %v7742_v27 = vpop.permute.xlu0 %4464  ;;  %v4211_v14 = vunpack.i.l.bf16 %v7407_v21  ;;  %v3278_v42 = vsel %vm1452_vm7, %v3248_v59, %v4207_v35  ;;  %v3277_v57 = vsel %vm1452_vm7, %v3247_v25, %v4206_v1  ;;  %p4812_p12 = pnand %p4811_p11, %p4946_p5 }
 0x450   : > { %v3293_v10 = vsel %vm1518_vm9, %v3261_v17, %v4246_v39  ;;  %v3310_v46 = vsel %vm1518_vm9, %v3278_v42, %v4287_v43  ;;  %v4482_v11 = vunpack.i.h.bf16 %v7740_v19  ;;  %v4481_v48 = vunpack.i.l.bf16 %v7740_v19  ;;  %p4819_p2 = por %p4818_p1, %p4817_p0 }
 0x451   : > { %4769 = vrot.lane.b32.xlu1 %v4768_v2, %s4886_s7  ;;  %4754 = vrot.lane.b32.xlu0 %v7261_v60, %s4883_s4  ;;  %v4247_v60 = vunpack.i.h.bf16 %v7451_v23  ;;  %v4462_v23 = vunpack.i.h.bf16 %v7703_v22  ;;  %v3309_v22 = vsel %vm1518_vm9, %v3277_v57, %v4286_v50  ;;  %v4467_v4 = vunpack.i.h.bf16 %v7742_v27  ;;  %p4813_p13 = pneg %p4812_p12 }
 0x452   : > { %3994 = vmatpush3.bf16.xpose.msk.msra.mxu1 %vm7643_vm3, %v3992_v0  ;;  %v3341_v34 = vsel %vm1584_vm11, %v3309_v22, %v4461_v13  ;;  %v4466_v7 = vunpack.i.l.bf16 %v7742_v27 }
 0x453   : > { %v4490_v29 = vpop.permute.xlu1 %4489  ;;  %v4475_v16 = vpop.permute.xlu0 %4474  ;;  %v3294_v24 = vsel %vm1518_vm9, %v3262_v8, %v4247_v60  ;;  %v3342_v44 = vsel %vm1584_vm11, %v3310_v46, %v4462_v23  ;;  %p4820_p3 = pnand %p4819_p2, %p4813_p13 }
 0x454   : > { %v3326_v54 = vsel %vm1584_vm11, %v3294_v24, %v4327_v36  ;;  %v4492_v62 = vunpack.i.h.bf16 %v4490_v29  ;;  %v4491_v31 = vunpack.i.l.bf16 %v4490_v29  ;;  %v4477_v5 = vunpack.i.h.bf16 %v4475_v16 }
 0x455   : > { %4764 = vrot.lane.b32.xlu0 %v7035_v37, %s4885_s6  ;;  %v3325_v37 = vsel %vm1584_vm11, %v3293_v10, %v4326_v20  ;;  %v3359_v51 = vsel %vm3353_vm13, %v3326_v54, %v4472_v56  ;;  %v4476_v58 = vunpack.i.l.bf16 %v4475_v16  ;;  %v3374_v27 = vsel %vm3353_vm13, %v3341_v34, %v4466_v7 }
 0x456   : > { %v3358_v26 = vsel %vm3353_vm13, %v3325_v37, %v4471_v30  ;;  %v3392_v0 = vsel %vm3386_vm14, %v3359_v51, %v4482_v11  ;;  %v3375_v8 = vsel %vm3353_vm13, %v3342_v44, %v4467_v4  ;;  %v4292_v56 = vunpack.i.h.bf16 %v7476_v61 }
 0x457   : > { %v4500_v52 = vpop.permute.xlu1 %4499  ;;  %v4485_v38 = vpop.permute.xlu0 %4484  ;;  %v3391_v28 = vsel %vm3386_vm14, %v3358_v26, %v4481_v48  ;;  %v3425_v1 = vsel %vm3419_vm15, %v3392_v0, %v4492_v62  ;;  %v3407_v60 = vsel %vm3386_vm14, %v3374_v27, %v4476_v58  ;;  %v3408_v39 = vsel %vm3386_vm14, %v3375_v8, %v4477_v5  ;;  %v8886_v26 = vld [vmem:[#allocation12_spill] sm:$0xff] }
 0x458   : > { %v4502_v49 = vunpack.i.h.bf16 %v4500_v52  ;;  %v4501_v2 = vunpack.i.l.bf16 %v4500_v52  ;;  %v4487_v19 = vunpack.i.h.bf16 %v4485_v38  ;;  %v4486_v15 = vunpack.i.l.bf16 %v4485_v38  ;;  %v8885_v52 = vld [vmem:[#allocation8_spill] sm:$0xff] }
 0x459   : > { %4774 = vrot.lane.b32.xlu0 %v4773_v6, %s4886_s7  ;;  %v3424_v35 = vsel %vm3419_vm15, %v3391_v28, %v4491_v31  ;;  %v4291_v30 = vunpack.i.l.bf16 %v7476_v61  ;;  %v3250_v10 = vsel %vm1388_vm4, %v7064_v47, %v4137_v45  ;;  %v3249_v38 = vsel %vm1388_vm4, %v8885_v52, %v4136_v12  ;;  %v8887_v62 = vld [vmem:[#allocation88_spill] sm:$0xff] }
 0x45a   : > { %v3457_v43 = vsel %vm3452_vm0, %v3424_v35, %v4501_v2  ;;  %v3458_v50 = vsel %vm3452_vm0, %v3425_v1, %v4502_v49  ;;  %v3440_v17 = vsel %vm3419_vm15, %v3407_v60, %v4486_v15  ;;  %v3441_v36 = vsel %vm3419_vm15, %v3408_v39, %v4487_v19  ;;  %v8890_v35 = vld [vmem:[#allocation112_spill] sm:$0xff] }
 0x45b   : > { %v4510_v18 = vpop.permute.xlu1 %4509  ;;  %v4495_v53 = vpop.permute.xlu0 %4494  ;;  %v3279_v11 = vsel %vm1452_vm7, %v3249_v38, %v4211_v14  ;;  %v3280_v48 = vsel %vm1452_vm7, %v3250_v10, %v4212_v3  ;;  %v4097_v3 = vunpack.i.h.bf16 %v8886_v26  ;;  %v4096_v51 = vunpack.i.l.bf16 %v8886_v26 }
 0x45c   : > { %v4512_v55 = vunpack.i.h.bf16 %v4510_v18  ;;  %v4511_v32 = vunpack.i.l.bf16 %v4510_v18  ;;  %v4497_v59 = vunpack.i.h.bf16 %v4495_v53  ;;  %v4496_v25 = vunpack.i.l.bf16 %v4495_v53 }
 0x45d   : > { %v3311_v47 = vsel %vm1518_vm9, %v3279_v11, %v4291_v30  ;;  %v3312_v33 = vsel %vm1518_vm9, %v3280_v48, %v4292_v56  ;;  %v4171_v31 = vunpack.i.l.bf16 %v8887_v62  ;;  %v4172_v27 = vunpack.i.h.bf16 %v8887_v62 }
 0x45e   : > { %v3490_v9 = vsel %vm3485_vm1, %v3457_v43, %v4511_v32  ;;  %v3491_v6 = vsel %vm3485_vm1, %v3458_v50, %v4512_v55  ;;  %v3473_v23 = vsel %vm3452_vm0, %v3440_v17, %v4496_v25  ;;  %v3474_v13 = vsel %vm3452_vm0, %v3441_v36, %v4497_v59  ;;  %v8888_v55 = vld [vmem:[#allocation40_spill] sm:$0xff]  ;;  %v8889_v59 = vld [vmem:[#allocation41_spill] sm:$0xff]  ;;  %v8891_v36 = vld [vmem:[#allocation51_spill] sm:$0xff] }
 0x45f   : > { %v4520_v29 = vpop.permute.xlu1 %4519  ;;  %v4505_v16 = vpop.permute.xlu0 %4504  ;;  %v3998_v37 = vpack.c.bf16 %v3491_v6, %v3490_v9  ;;  %v3234_v32 = vsel %vm1388_vm4, %v8888_v55, %v4097_v3  ;;  %v3233_v25 = vsel %vm1388_vm4, %v8889_v59, %v4096_v51  ;;  %v4252_v1 = vunpack.i.h.bf16 %v8890_v35  ;;  %v8895_v59 = vld [vmem:[#allocation43_spill] sm:$0xff] }
 0x460   : > { %v4507_v20 = vunpack.i.h.bf16 %v4505_v16  ;;  %v4506_v40 = vunpack.i.l.bf16 %v4505_v16  ;;  %v4522_v44 = vunpack.i.h.bf16 %v4520_v29  ;;  %v4521_v21 = vunpack.i.l.bf16 %v4520_v29 }
 0x461   : > { %v3263_v8 = vsel %vm1452_vm7, %v3233_v25, %v4171_v31  ;;  %v4251_v60 = vunpack.i.l.bf16 %v8890_v35  ;;  %v8893_v31 = vld [vmem:[#allocation5_spill] sm:$0xff]  ;;  %v8897_v35 = vld [vmem:[#allocation107_spill] sm:$0xff] }
 0x462   : > { %v3506_v42 = vsel %vm3485_vm1, %v3473_v23, %v4506_v40  ;;  %v3507_v57 = vsel %vm3485_vm1, %v3474_v13, %v4507_v20  ;;  %v4332_v20 = vunpack.i.h.bf16 %v8891_v36  ;;  %v4331_v40 = vunpack.i.l.bf16 %v8891_v36 }
 0x463   : > { %v3995_v24 = vpack.c.bf16 %v3507_v57, %v3506_v42  ;;  %v4530_v22 = vpop.permute.xlu1 %4529  ;;  %v4515_v46 = vpop.permute.xlu0 %4514  ;;  %v3264_v42 = vsel %vm1452_vm7, %v3234_v32, %v4172_v27  ;;  %v3295_v52 = vsel %vm1518_vm9, %v3263_v8, %v4251_v60  ;;  %v8896_v27 = vld [vmem:[#allocation45_spill] sm:$0xff]  ;;  %v8898_v60 = vld [vmem:[#allocation104_spill] sm:$0xff] }
 0x464   : > { %v4517_v54 = vunpack.i.h.bf16 %v4515_v46  ;;  %v4516_v61 = vunpack.i.l.bf16 %v4515_v46  ;;  %v4532_v5 = vunpack.i.h.bf16 %v4530_v22  ;;  %v4531_v58 = vunpack.i.l.bf16 %v4530_v22 }
 0x465   : > { %3997 = vmatprep.subr.msk.bf16.mxu1 %vm7643_vm3, %v3995_v24  ;;  %v3296_v38 = vsel %vm1518_vm9, %v3264_v42, %v4252_v1 }
 0x466   : > { %4000 = vmatpush3.bf16.xpose.msk.msra.mxu1 %vm7643_vm3, %v3998_v37  ;;  %v3343_v45 = vsel %vm1584_vm11, %v3311_v47, %v4516_v61  ;;  %v3344_v12 = vsel %vm1584_vm11, %v3312_v33, %v4517_v54  ;;  %v3327_v61 = vsel %vm1584_vm11, %v3295_v52, %v4331_v40  ;;  %v3328_v11 = vsel %vm1584_vm11, %v3296_v38, %v4332_v20  ;;  %v8901_v20 = vld [vmem:[#allocation64_spill] sm:$0xff] }
 0x467   : > { %v4540_v34 = vpop.permute.xlu1 %4539  ;;  %v4525_v14 = vpop.permute.xlu0 %4524  ;;  %v3376_v4 = vsel %vm3353_vm13, %v3343_v45, %v4521_v21  ;;  %v3377_v7 = vsel %vm3353_vm13, %v3344_v12, %v4522_v44  ;;  %v8892_v12 = vld [vmem:[#allocation73_spill] sm:$0xff]  ;;  %v4257_v40 = vunpack.i.h.bf16 %v8901_v20 }
 0x468   : > { %v4542_v18 = vunpack.i.h.bf16 %v4540_v34  ;;  %v4541_v53 = vunpack.i.l.bf16 %v4540_v34  ;;  %v3409_v28 = vsel %vm3386_vm14, %v3376_v4, %v4531_v58  ;;  %v3410_v0 = vsel %vm3386_vm14, %v3377_v7, %v4532_v5 }
 0x469   : > { %v4527_v23 = vunpack.i.h.bf16 %v4525_v14  ;;  %v4526_v13 = vunpack.i.l.bf16 %v4525_v14  ;;  %v4102_v34 = vunpack.i.h.bf16 %v8892_v12  ;;  %v4101_v14 = vunpack.i.l.bf16 %v8892_v12 }
 0x46a   : > { %v3442_v50 = vsel %vm3419_vm15, %v3409_v28, %v4541_v53  ;;  %v3443_v29 = vsel %vm3419_vm15, %v3410_v0, %v4542_v18  ;;  %v4142_v5 = vunpack.i.h.bf16 %v8893_v31  ;;  %v4141_v58 = vunpack.i.l.bf16 %v8893_v31 }
 0x46b   : > { %v4550_v49 = vpop.permute.xlu1 %4549  ;;  %v4535_v2 = vpop.permute.xlu0 %4534  ;;  %v3360_v33 = vsel %vm3353_vm13, %v3327_v61, %v4526_v13  ;;  %v3361_v45 = vsel %vm3353_vm13, %v3328_v11, %v4527_v23  ;;  %v3236_v25 = vsel %vm1388_vm4, %v8895_v59, %v4102_v34  ;;  %v3235_v8 = vsel %vm1388_vm4, %v8896_v27, %v4101_v14  ;;  %v8904_v61 = vld [vmem:[#allocation72_spill] sm:$0xff] }
 0x46c   : > { %v4552_v19 = vunpack.i.h.bf16 %v4550_v49  ;;  %v4551_v15 = vunpack.i.l.bf16 %v4550_v49  ;;  %v4537_v57 = vunpack.i.h.bf16 %v4535_v2  ;;  %v4536_v10 = vunpack.i.l.bf16 %v4535_v2 }
 0x46d   : > { %v3252_v1 = vsel %vm1388_vm4, %v8897_v35, %v4142_v5  ;;  %v4222_v11 = vunpack.i.h.bf16 %v8904_v61 }
 0x46e   : > { %v3475_v9 = vsel %vm3452_vm0, %v3442_v50, %v4551_v15  ;;  %v3476_v6 = vsel %vm3452_vm0, %v3443_v29, %v4552_v19  ;;  %v3393_v44 = vsel %vm3386_vm14, %v3360_v33, %v4536_v10  ;;  %v3394_v21 = vsel %vm3386_vm14, %v3361_v45, %v4537_v57  ;;  %v8894_v15 = vld [vmem:[#allocation62_spill] sm:$0xff] }
 0x46f   : > { %v4560_v39 = vpop.permute.xlu1 %4559  ;;  %v4545_v43 = vpop.permute.xlu0 %4544  ;;  %v4177_v55 = vunpack.i.h.bf16 %v8894_v15  ;;  %v4176_v32 = vunpack.i.l.bf16 %v8894_v15  ;;  %v8903_v10 = vld [vmem:[#allocation66_spill] sm:$0xff] }
 0x470   : > { %v4562_v16 = vunpack.i.h.bf16 %v4560_v39  ;;  %v4561_v17 = vunpack.i.l.bf16 %v4560_v39  ;;  %v4547_v37 = vunpack.i.h.bf16 %v4545_v43  ;;  %v4546_v54 = vunpack.i.l.bf16 %v4545_v43  ;;  %v8899_v43 = vld [vmem:[#allocation131_spill] sm:$0xff] }
 0x471   : > { %v3251_v39 = vsel %vm1388_vm4, %v8898_v60, %v4141_v58  ;;  %v4147_v50 = vunpack.i.h.bf16 %v8899_v43  ;;  %v4146_v29 = vunpack.i.l.bf16 %v8899_v43  ;;  %v3266_v42 = vsel %vm1452_vm7, %v3236_v25, %v4177_v55 }
 0x472   : > { %v3508_v56 = vsel %vm3485_vm1, %v3475_v9, %v4561_v17  ;;  %v3509_v30 = vsel %vm3485_vm1, %v3476_v6, %v4562_v16  ;;  %v3426_v51 = vsel %vm3419_vm15, %v3393_v44, %v4546_v54  ;;  %v3427_v4 = vsel %vm3419_vm15, %v3394_v21, %v4547_v37  ;;  %v8900_v16 = vld [vmem:[#allocation132_spill] sm:$0xff]  ;;  %v8902_v6 = vld [vmem:[#allocation11_spill] sm:$0xff] }
 0x473   : > { %v4001_v24 = vpack.c.bf16 %v3509_v30, %v3508_v56  ;;  %v7870_v22 = vpop.permute.xlu1 %4569  ;;  %v4555_v46 = vpop.permute.xlu0 %4554  ;;  %v4217_v17 = vunpack.i.h.bf16 %v8900_v16  ;;  %v4216_v36 = vunpack.i.l.bf16 %v8900_v16  ;;  %v4256_v9 = vunpack.i.l.bf16 %v8901_v20 }
 0x474   : > { %v4557_v48 = vunpack.i.h.bf16 %v4555_v46  ;;  %v4556_v47 = vunpack.i.l.bf16 %v4555_v46  ;;  %v4297_v23 = vunpack.i.h.bf16 %v8902_v6  ;;  %v4296_v13 = vunpack.i.l.bf16 %v8902_v6 }
 0x475   : > { %4003 = vmatprep.subr.msk.bf16.mxu1 %vm7643_vm3, %v4001_v24  ;;  %v3265_v57 = vsel %vm1452_vm7, %v3235_v8, %v4176_v32  ;;  %v4337_v24 = vunpack.i.h.bf16 %v8903_v10  ;;  %v4336_v46 = vunpack.i.l.bf16 %v8903_v10  ;;  %v4572_v52 = vunpack.i.h.bf16 %v7870_v22 }
 0x476   : > { %v3459_v49 = vsel %vm3452_vm0, %v3426_v51, %v4556_v47  ;;  %v3460_v2 = vsel %vm3452_vm0, %v3427_v4, %v4557_v48  ;;  %v4571_v38 = vunpack.i.l.bf16 %v7870_v22  ;;  %v4221_v48 = vunpack.i.l.bf16 %v8904_v61 }
 0x477   : > { %v4580_v26 = vpop.permute.xlu1 %4579  ;;  %v4565_v3 = vpop.permute.xlu0 %4564  ;;  %v3282_v47 = vsel %vm1452_vm7, %v3252_v1, %v4217_v17  ;;  %v3281_v33 = vsel %vm1452_vm7, %v3251_v39, %v4216_v36  ;;  %v3297_v45 = vsel %vm1518_vm9, %v3265_v57, %v4256_v9  ;;  %v3298_v12 = vsel %vm1518_vm9, %v3266_v42, %v4257_v40 }
 0x478   : > { %v4567_v7 = vunpack.i.h.bf16 %v4565_v3  ;;  %v4566_v62 = vunpack.i.l.bf16 %v4565_v3  ;;  %v4582_v37 = vunpack.i.h.bf16 %v4580_v26  ;;  %v4581_v54 = vunpack.i.l.bf16 %v4580_v26 }
 0x479   : > { %v3313_v34 = vsel %vm1518_vm9, %v3281_v33, %v4296_v13  ;;  %v3314_v14 = vsel %vm1518_vm9, %v3282_v47, %v4297_v23  ;;  %v3329_v21 = vsel %vm1584_vm11, %v3297_v45, %v4336_v46  ;;  %v3330_v26 = vsel %vm1584_vm11, %v3298_v12, %v4337_v24  ;;  %v8906_v33 = vld [vmem:[#allocation67_spill] sm:$0xff] }
 0x47a   : > { %v3492_v18 = vsel %vm3485_vm1, %v3459_v49, %v4566_v62  ;;  %v3493_v53 = vsel %vm3485_vm1, %v3460_v2, %v4567_v7  ;;  %v3345_v4 = vsel %vm1584_vm11, %v3313_v34, %v4571_v38  ;;  %v3346_v7 = vsel %vm1584_vm11, %v3314_v14, %v4572_v52  ;;  %v8905_v52 = vld [vmem:[#allocation15_spill] sm:$0xff] }
 0x47b   : > { %v4004_v28 = vpack.c.bf16 %v3493_v53, %v3492_v18  ;;  %v4590_v0 = vpop.permute.xlu1 %4589  ;;  %v7892_v19 = vpop.permute.xlu0 %4574  ;;  %v3362_v62 = vsel %vm3353_vm13, %v3329_v21, %v4581_v54  ;;  %v3363_v31 = vsel %vm3353_vm13, %v3330_v26, %v4582_v37  ;;  %v4302_v38 = vunpack.i.h.bf16 %v8905_v52 }
 0x47c   : > { %v4592_v3 = vunpack.i.h.bf16 %v4590_v0  ;;  %v4591_v51 = vunpack.i.l.bf16 %v4590_v0  ;;  %v4577_v5 = vunpack.i.h.bf16 %v7892_v19  ;;  %v4576_v58 = vunpack.i.l.bf16 %v7892_v19 }
 0x47d   : > { %4006 = vmatpush3.bf16.xpose.msk.msra.mxu1 %vm7643_vm3, %v4004_v28  ;;  %v4301_v37 = vunpack.i.l.bf16 %v8905_v52  ;;  %v3254_v45 = vsel %vm1388_vm4, %v8906_v33, %v4147_v50 }
 0x47e   : > { %v3395_v32 = vsel %vm3386_vm14, %v3362_v62, %v4591_v51  ;;  %v3396_v59 = vsel %vm3386_vm14, %v3363_v31, %v4592_v3  ;;  %v3378_v19 = vsel %vm3353_vm13, %v3345_v4, %v4576_v58  ;;  %v3379_v39 = vsel %vm3353_vm13, %v3346_v7, %v4577_v5  ;;  %v8908_v5 = vld [vmem:[#allocation133_spill] sm:$0xff] }
 0x47f   : > { %v4600_v56 = vpop.permute.xlu1 %4599  ;;  %v4585_v30 = vpop.permute.xlu0 %4584  ;;  %v3284_v4 = vsel %vm1452_vm7, %v3254_v45, %v4222_v11  ;;  %v4107_v11 = vunpack.i.h.bf16 %v8908_v5  ;;  %v4106_v58 = vunpack.i.l.bf16 %v8908_v5 }
 0x480   : > { %v4602_v49 = vunpack.i.h.bf16 %v4600_v56  ;;  %v4601_v2 = vunpack.i.l.bf16 %v4600_v56  ;;  %v4587_v18 = vunpack.i.h.bf16 %v4585_v30  ;;  %v4586_v53 = vunpack.i.l.bf16 %v4585_v30 }
 0x481   : > { %v3316_v43 = vsel %vm1518_vm9, %v3284_v4, %v4302_v38 }
 0x482   : > { %v3428_v16 = vsel %vm3419_vm15, %v3395_v32, %v4601_v2  ;;  %v3429_v17 = vsel %vm3419_vm15, %v3396_v59, %v4602_v49  ;;  %v3411_v36 = vsel %vm3386_vm14, %v3378_v19, %v4586_v53  ;;  %v3412_v20 = vsel %vm3386_vm14, %v3379_v39, %v4587_v18  ;;  %v8909_v18 = vld [vmem:[#allocation109_spill] sm:$0xff]  ;;  %v8911_v19 = vld [vmem:[#allocation47_spill] sm:$0xff] }
 0x483   : > { %v4610_v44 = vpop.permute.xlu1 %4609  ;;  %v4595_v22 = vpop.permute.xlu0 %4594  ;;  %v4181_v53 = vunpack.i.l.bf16 %v8909_v18  ;;  %v3237_v39 = vsel %vm1388_vm4, %v8911_v19, %v4106_v58 }
 0x484   : > { %v4612_v28 = vunpack.i.h.bf16 %v4610_v44  ;;  %v4611_v15 = vunpack.i.l.bf16 %v4610_v44  ;;  %v4597_v25 = vunpack.i.h.bf16 %v4595_v22  ;;  %v4596_v27 = vunpack.i.l.bf16 %v4595_v22  ;;  %v8907_v44 = vld [vmem:[#allocation6_spill] sm:$0xff] }
 0x485   : > { %v3253_v22 = vsel %vm1388_vm4, %v8907_v44, %v4146_v29 }
 0x486   : > { %v3461_v40 = vsel %vm3452_vm0, %v3428_v16, %v4611_v15  ;;  %v3462_v9 = vsel %vm3452_vm0, %v3429_v17, %v4612_v28  ;;  %v3444_v13 = vsel %vm3419_vm15, %v3411_v36, %v4596_v27  ;;  %v3445_v56 = vsel %vm3419_vm15, %v3412_v20, %v4597_v25  ;;  %v8912_v36 = vld [vmem:[#allocation74_spill] sm:$0xff] }
 0x487   : > { %v4620_v55 = vpop.permute.xlu1 %4619  ;;  %v4605_v0 = vpop.permute.xlu0 %4604  ;;  %v3283_v51 = vsel %vm1452_vm7, %v3253_v22, %v4221_v48  ;;  %v4182_v16 = vunpack.i.h.bf16 %v8909_v18  ;;  %v3267_v17 = vsel %vm1452_vm7, %v3237_v39, %v4181_v53  ;;  %v4262_v20 = vunpack.i.h.bf16 %v8912_v36  ;;  %v8915_v53 = vld [vmem:[#allocation91_spill] sm:$0xff]  ;;  %v8918_v39 = vld [vmem:[#allocation70_spill] sm:$0xff] }
 0x488   : > { %v4622_v8 = vunpack.i.h.bf16 %v4620_v55  ;;  %v4621_v35 = vunpack.i.l.bf16 %v4620_v55  ;;  %v4607_v1 = vunpack.i.h.bf16 %v4605_v0  ;;  %v4606_v60 = vunpack.i.l.bf16 %v4605_v0 }
 0x489   : > { %v3315_v50 = vsel %vm1518_vm9, %v3283_v51, %v4301_v37 }
 0x48a   : > { %v3494_v57 = vsel %vm3485_vm1, %v3461_v40, %v4621_v35  ;;  %v3495_v10 = vsel %vm3485_vm1, %v3462_v9, %v4622_v8  ;;  %v3477_v24 = vsel %vm3452_vm0, %v3444_v13, %v4606_v60  ;;  %v3478_v46 = vsel %vm3452_vm0, %v3445_v56, %v4607_v1  ;;  %v8910_v1 = vld [vmem:[#allocation46_spill] sm:$0xff] }
 0x48b   : > { %v4630_v6 = vpop.permute.xlu1 %4629  ;;  %v4615_v23 = vpop.permute.xlu0 %4614  ;;  %v4010_v21 = vpack.c.bf16 %v3495_v10, %v3494_v57  ;;  %v3238_v60 = vsel %vm1388_vm4, %v8910_v1, %v4107_v11  ;;  %v4261_v40 = vunpack.i.l.bf16 %v8912_v36  ;;  %v4151_v1 = vunpack.i.l.bf16 %v8915_v53  ;;  %v8919_v36 = vld [vmem:[#allocation89_spill] sm:$0xff] }
 0x48c   : > { %v4617_v30 = vunpack.i.h.bf16 %v4615_v23  ;;  %v4616_v42 = vunpack.i.l.bf16 %v4615_v23  ;;  %v4632_v31 = vunpack.i.h.bf16 %v4630_v6  ;;  %v4631_v61 = vunpack.i.l.bf16 %v4630_v6 }
 0x48d   : > { %v3299_v44 = vsel %vm1518_vm9, %v3267_v17, %v4261_v40  ;;  %v4116_v17 = vunpack.i.l.bf16 %v8918_v39  ;;  %v8920_v40 = vld [vmem:[#allocation10_spill] sm:$0xff] }
 0x48e   : > { %v3510_v54 = vsel %vm3485_vm1, %v3477_v24, %v4616_v42  ;;  %v3511_v47 = vsel %vm3485_vm1, %v3478_v46, %v4617_v30  ;;  %v8913_v42 = vld [vmem:[#allocation114_spill] sm:$0xff] }
 0x48f   : > { %v4007_v12 = vpack.c.bf16 %v3511_v47, %v3510_v54  ;;  %v4640_v34 = vpop.permute.xlu1 %4639  ;;  %v4625_v14 = vpop.permute.xlu0 %4624  ;;  %v4342_v57 = vunpack.i.h.bf16 %v8913_v42  ;;  %v4341_v10 = vunpack.i.l.bf16 %v8913_v42  ;;  %v3268_v47 = vsel %vm1452_vm7, %v3238_v60, %v4182_v16  ;;  %v8917_v60 = vld [vmem:[#allocation108_spill] sm:$0xff] }
 0x490   : > { %v4627_v26 = vunpack.i.h.bf16 %v4625_v14  ;;  %v4626_v3 = vunpack.i.l.bf16 %v4625_v14  ;;  %v4642_v28 = vunpack.i.h.bf16 %v4640_v34  ;;  %v4641_v15 = vunpack.i.l.bf16 %v4640_v34 }
 0x491   : > { %4009 = vmatprep.subr.msk.bf16.mxu1 %vm7643_vm3, %v4007_v12  ;;  %v3300_v22 = vsel %vm1518_vm9, %v3268_v47, %v4262_v20  ;;  %v4117_v16 = vunpack.i.h.bf16 %v8918_v39  ;;  %v8925_v47 = vld [vmem:[#allocation113_spill] sm:$0xff] }
 0x492   : > { %4012 = vmatpush3.bf16.xpose.msk.msra.mxu1 %vm7643_vm3, %v4010_v21  ;;  %v3347_v29 = vsel %vm1584_vm11, %v3315_v50, %v4626_v3  ;;  %v3348_v7 = vsel %vm1584_vm11, %v3316_v43, %v4627_v26  ;;  %v3331_v3 = vsel %vm1584_vm11, %v3299_v44, %v4341_v10  ;;  %v3332_v51 = vsel %vm1584_vm11, %v3300_v22, %v4342_v57  ;;  %v8923_v10 = vld [vmem:[#allocation93_spill] sm:$0xff] }
 0x493   : > { %v4650_v62 = vpop.permute.xlu1 %4649  ;;  %v4635_v48 = vpop.permute.xlu0 %4634  ;;  %v3380_v49 = vsel %vm3353_vm13, %v3347_v29, %v4631_v61  ;;  %v3381_v2 = vsel %vm3353_vm13, %v3348_v7, %v4632_v31  ;;  %v8914_v7 = vld [vmem:[#allocation60_spill] sm:$0xff] }
 0x494   : > { %v4652_v32 = vunpack.i.h.bf16 %v4650_v62  ;;  %v4651_v59 = vunpack.i.l.bf16 %v4650_v62  ;;  %v3413_v25 = vsel %vm3386_vm14, %v3380_v49, %v4641_v15  ;;  %v3414_v27 = vsel %vm3386_vm14, %v3381_v2, %v4642_v28 }
 0x495   : > { %v4637_v52 = vunpack.i.h.bf16 %v4635_v48  ;;  %v4636_v38 = vunpack.i.l.bf16 %v4635_v48  ;;  %v4112_v62 = vunpack.i.h.bf16 %v8914_v7  ;;  %v4111_v18 = vunpack.i.l.bf16 %v8914_v7 }
 0x496   : > { %v3446_v23 = vsel %vm3419_vm15, %v3413_v25, %v4651_v59  ;;  %v3447_v13 = vsel %vm3419_vm15, %v3414_v27, %v4652_v32  ;;  %v4152_v28 = vunpack.i.h.bf16 %v8915_v53 }
 0x497   : > { %v4660_v55 = vpop.permute.xlu1 %4659  ;;  %v4645_v0 = vpop.permute.xlu0 %4644  ;;  %v3364_v43 = vsel %vm3353_vm13, %v3331_v3, %v4636_v38  ;;  %v3365_v29 = vsel %vm3353_vm13, %v3332_v51, %v4637_v52  ;;  %v3239_v19 = vsel %vm1388_vm4, %v8917_v60, %v4111_v18 }
 0x498   : > { %v4662_v8 = vunpack.i.h.bf16 %v4660_v55  ;;  %v4661_v35 = vunpack.i.l.bf16 %v4660_v55  ;;  %v4647_v33 = vunpack.i.h.bf16 %v4645_v0  ;;  %v4646_v45 = vunpack.i.l.bf16 %v4645_v0 }
 0x499   : > { %v3256_v20 = vsel %vm1388_vm4, %v8919_v36, %v4152_v28 }
 0x49a   : > { %v3479_v24 = vsel %vm3452_vm0, %v3446_v23, %v4661_v35  ;;  %v3480_v46 = vsel %vm3452_vm0, %v3447_v13, %v4662_v8  ;;  %v3397_v48 = vsel %vm3386_vm14, %v3364_v43, %v4646_v45  ;;  %v3398_v31 = vsel %vm3386_vm14, %v3365_v29, %v4647_v33  ;;  %v8916_v8 = vld [vmem:[#allocation50_spill] sm:$0xff]  ;;  %v8926_v45 = vld [vmem:[#allocation68_spill] sm:$0xff] }
 0x49b   : > { %v4670_v9 = vpop.permute.xlu1 %4669  ;;  %v4655_v6 = vpop.permute.xlu0 %4654  ;;  %v3240_v35 = vsel %vm1388_vm4, %v8916_v8, %v4112_v62  ;;  %v8921_v23 = vld [vmem:[#allocation90_spill] sm:$0xff]  ;;  %v4157_v33 = vunpack.i.h.bf16 %v8925_v47 }
 0x49c   : > { %v4672_v56 = vunpack.i.h.bf16 %v4670_v9  ;;  %v4671_v30 = vunpack.i.l.bf16 %v4670_v9  ;;  %v4657_v21 = vunpack.i.h.bf16 %v4655_v6  ;;  %v4656_v26 = vunpack.i.l.bf16 %v4655_v6 }
 0x49d   : > { %v4187_v9 = vunpack.i.h.bf16 %v8920_v40  ;;  %v4186_v6 = vunpack.i.l.bf16 %v8920_v40  ;;  %v4227_v13 = vunpack.i.h.bf16 %v8921_v23 }
 0x49e   : > { %v3512_v37 = vsel %vm3485_vm1, %v3479_v24, %v4671_v30  ;;  %v3513_v54 = vsel %vm3485_vm1, %v3480_v46, %v4672_v56  ;;  %v3430_v11 = vsel %vm3419_vm15, %v3397_v48, %v4656_v26  ;;  %v3431_v58 = vsel %vm3419_vm15, %v3398_v31, %v4657_v21  ;;  %v8922_v30 = vld [vmem:[#allocation75_spill] sm:$0xff] }
 0x49f   : > { %v4013_v12 = vpack.c.bf16 %v3513_v54, %v3512_v37  ;;  %v8002_v34 = vpop.permute.xlu1 %4679  ;;  %v4665_v14 = vpop.permute.xlu0 %4664  ;;  %v4226_v56 = vunpack.i.l.bf16 %v8921_v23  ;;  %v4267_v42 = vunpack.i.h.bf16 %v8922_v30  ;;  %v4266_v57 = vunpack.i.l.bf16 %v8922_v30  ;;  %v8924_v37 = vld [vmem:[#allocation130_spill] sm:$0xff] }
 0x4a0   : > { %v4667_v4 = vunpack.i.h.bf16 %v4665_v14  ;;  %v4666_v50 = vunpack.i.l.bf16 %v4665_v14  ;;  %v4307_v24 = vunpack.i.h.bf16 %v8923_v10  ;;  %v4306_v46 = vunpack.i.l.bf16 %v8923_v10 }
 0x4a1   : > { %4015 = vmatprep.subr.msk.bf16.mxu1 %vm7643_vm3, %v4013_v12  ;;  %v3255_v54 = vsel %vm1388_vm4, %v8924_v37, %v4151_v1  ;;  %v4347_v12 = vunpack.i.h.bf16 %v8926_v45  ;;  %v4346_v14 = vunpack.i.l.bf16 %v8926_v45  ;;  %v4682_v44 = vunpack.i.h.bf16 %v8002_v34 }
 0x4a2   : > { %v3463_v15 = vsel %vm3452_vm0, %v3430_v11, %v4666_v50  ;;  %v3464_v55 = vsel %vm3452_vm0, %v3431_v58, %v4667_v4  ;;  %v4681_v22 = vunpack.i.l.bf16 %v8002_v34  ;;  %v3270_v3 = vsel %vm1452_vm7, %v3240_v35, %v4187_v9 }
 0x4a3   : > { %v4690_v61 = vpop.permute.xlu1 %4689  ;;  %v4675_v5 = vpop.permute.xlu0 %4674  ;;  %v3269_v51 = vsel %vm1452_vm7, %v3239_v19, %v4186_v6  ;;  %v3286_v4 = vsel %vm1452_vm7, %v3256_v20, %v4227_v13  ;;  %v3285_v50 = vsel %vm1452_vm7, %v3255_v54, %v4226_v56  ;;  %v3302_v29 = vsel %vm1518_vm9, %v3270_v3, %v4267_v42 }
 0x4a4   : > { %v4677_v49 = vunpack.i.h.bf16 %v4675_v5  ;;  %v4676_v2 = vunpack.i.l.bf16 %v4675_v5  ;;  %v4692_v21 = vunpack.i.h.bf16 %v4690_v61  ;;  %v4691_v26 = vunpack.i.l.bf16 %v4690_v61 }
 0x4a5   : > { %v3301_v43 = vsel %vm1518_vm9, %v3269_v51, %v4266_v57  ;;  %v3317_v7 = vsel %vm1518_vm9, %v3285_v50, %v4306_v46  ;;  %v3318_v62 = vsel %vm1518_vm9, %v3286_v4, %v4307_v24  ;;  %v3334_v61 = vsel %vm1584_vm11, %v3302_v29, %v4347_v12 }
 0x4a6   : > { %v3496_v0 = vsel %vm3485_vm1, %v3463_v15, %v4676_v2  ;;  %v3497_v32 = vsel %vm3485_vm1, %v3464_v55, %v4677_v49  ;;  %v3333_v31 = vsel %vm1584_vm11, %v3301_v43, %v4346_v14  ;;  %v3349_v58 = vsel %vm1584_vm11, %v3317_v7, %v4681_v22  ;;  %v8928_v43 = vld [vmem:[#allocation9_spill] sm:$0xff] }
 0x4a7   : > { %v4016_v59 = vpack.c.bf16 %v3497_v32, %v3496_v0  ;;  %v4700_v25 = vpop.permute.xlu1 %4699  ;;  %v8023_v27 = vpop.permute.xlu0 %4684  ;;  %v3350_v49 = vsel %vm1584_vm11, %v3318_v62, %v4682_v44  ;;  %v3366_v2 = vsel %vm3353_vm13, %v3333_v31, %v4691_v26  ;;  %v3367_v18 = vsel %vm3353_vm13, %v3334_v61, %v4692_v21  ;;  %v8927_v26 = vld [vmem:[#allocation65_spill] sm:$0xff]  ;;  %v8929_v61 = vld [vmem:[#allocation92_spill] sm:$0xff] }
 0x4a8   : > { %v4702_v5 = vunpack.i.h.bf16 %v4700_v25  ;;  %v4701_v11 = vunpack.i.l.bf16 %v4700_v25  ;;  %v4687_v53 = vunpack.i.h.bf16 %v8023_v27  ;;  %v4686_v28 = vunpack.i.l.bf16 %v8023_v27 }
 0x4a9   : > { %4018 = vmatpush3.bf16.xpose.msk.msra.mxu1 %vm7643_vm3, %v4016_v59  ;;  %v4156_v21 = vunpack.i.l.bf16 %v8925_v47  ;;  %v4192_v3 = vunpack.i.h.bf16 %v8927_v26  ;;  %v4191_v50 = vunpack.i.l.bf16 %v8927_v26  ;;  %v4232_v29 = vunpack.i.h.bf16 %v8928_v43 }
 0x4aa   : > { %v3399_v1 = vsel %vm3386_vm14, %v3366_v2, %v4701_v11  ;;  %v3400_v60 = vsel %vm3386_vm14, %v3367_v18, %v4702_v5  ;;  %v3382_v6 = vsel %vm3353_vm13, %v3349_v58, %v4686_v28  ;;  %v3383_v23 = vsel %vm3353_vm13, %v3350_v49, %v4687_v53  ;;  %v8930_v18 = vld [vmem:[#allocation69_spill] sm:$0xff]  ;;  %v8931_v28 = vld [vmem:[#allocation7_spill] sm:$0xff] }
 0x4ab   : > { %v4710_v52 = vpop.permute.xlu1 %4709  ;;  %v8044_v38 = vpop.permute.xlu0 %4694  ;;  %v4231_v7 = vunpack.i.l.bf16 %v8928_v43  ;;  %v4312_v5 = vunpack.i.h.bf16 %v8929_v61  ;;  %v4311_v11 = vunpack.i.l.bf16 %v8929_v61  ;;  %v3242_v53 = vsel %vm1388_vm4, %v8930_v18, %v4117_v16 }
 0x4ac   : > { %v4712_v15 = vunpack.i.h.bf16 %v4710_v52  ;;  %v4711_v55 = vunpack.i.l.bf16 %v4710_v52  ;;  %v4697_v0 = vunpack.i.h.bf16 %v8044_v38  ;;  %v4696_v32 = vunpack.i.l.bf16 %v8044_v38 }
 0x4ad   : > { %v3272_v16 = vsel %vm1452_vm7, %v3242_v53, %v4192_v3 }
 0x4ae   : > { %v3432_v13 = vsel %vm3419_vm15, %v3399_v1, %v4711_v55  ;;  %v3433_v56 = vsel %vm3419_vm15, %v3400_v60, %v4712_v15  ;;  %v3415_v30 = vsel %vm3386_vm14, %v3382_v6, %v4696_v32  ;;  %v3416_v42 = vsel %vm3386_vm14, %v3383_v23, %v4697_v0  ;;  %v8932_v55 = vld [vmem:[#allocation106_spill] sm:$0xff]  ;;  %v8934_v23 = vld [vmem:[#allocation16_spill] sm:$0xff] }
 0x4af   : > { %v4720_v48 = vpop.permute.xlu1 %4719  ;;  %v8061_v34 = vpop.permute.xlu0 %4704  ;;  %v3241_v15 = vsel %vm1388_vm4, %v8931_v28, %v4116_v17 }
 0x4b0   : > { %v4722_v59 = vunpack.i.h.bf16 %v4720_v48  ;;  %v4721_v25 = vunpack.i.l.bf16 %v4720_v48  ;;  %v4707_v19 = vunpack.i.h.bf16 %v8061_v34  ;;  %v4706_v36 = vunpack.i.l.bf16 %v8061_v34 }
 0x4b1   : > { %v3271_v1 = vsel %vm1452_vm7, %v3241_v15, %v4191_v50 }
 0x4b2   : > { %v3465_v57 = vsel %vm3452_vm0, %v3432_v13, %v4721_v25  ;;  %v3466_v10 = vsel %vm3452_vm0, %v3433_v56, %v4722_v59  ;;  %v3448_v52 = vsel %vm3419_vm15, %v3415_v30, %v4706_v36  ;;  %v3449_v37 = vsel %vm3419_vm15, %v3416_v42, %v4707_v19  ;;  %v8933_v25 = vld [vmem:[#allocation63_spill] sm:$0xff] }
 0x4b3   : > { %v4730_v8 = vpop.permute.xlu1 %4729  ;;  %v8073_v35 = vpop.permute.xlu0 %4714  ;;  %v3258_v59 = vsel %vm1388_vm4, %v8932_v55, %v4157_v33  ;;  %v4272_v13 = vunpack.i.h.bf16 %v8934_v23  ;;  %v4271_v56 = vunpack.i.l.bf16 %v8934_v23 }
 0x4b4   : > { %v4732_v27 = vunpack.i.h.bf16 %v4730_v8  ;;  %v4731_v20 = vunpack.i.l.bf16 %v4730_v8  ;;  %v4717_v40 = vunpack.i.h.bf16 %v8073_v35  ;;  %v4716_v9 = vunpack.i.l.bf16 %v8073_v35 }
 0x4b5   : > { %v3257_v8 = vsel %vm1388_vm4, %v8933_v25, %v4156_v21  ;;  %v3288_v60 = vsel %vm1452_vm7, %v3258_v59, %v4232_v29 }
 0x4b6   : > { %v3498_v12 = vsel %vm3485_vm1, %v3465_v57, %v4731_v20  ;;  %v3499_v14 = vsel %vm3485_vm1, %v3466_v10, %v4732_v27  ;;  %v3481_v44 = vsel %vm3452_vm0, %v3448_v52, %v4716_v9  ;;  %v3482_v22 = vsel %vm3452_vm0, %v3449_v37, %v4717_v40 }
 0x4b7   : > { %v8093_v24 = vpop.permute.xlu1 %4739  ;;  %v4725_v46 = vpop.permute.xlu0 %4724  ;;  %v4022_v58 = vpack.c.bf16 %v3499_v14, %v3498_v12  ;;  %v3287_v39 = vsel %vm1452_vm7, %v3257_v8, %v4231_v7  ;;  %v3320_v33 = vsel %vm1518_vm9, %v3288_v60, %v4312_v5 }
 0x4b8   : > { %v4727_v54 = vunpack.i.h.bf16 %v4725_v46  ;;  %v4726_v45 = vunpack.i.l.bf16 %v4725_v46  ;;  %v3319_v47 = vsel %vm1518_vm9, %v3287_v39, %v4311_v11  ;;  %v4742_v57 = vunpack.i.h.bf16 %v8093_v24 }
 0x4b9   : > { %v4741_v10 = vunpack.i.l.bf16 %v8093_v24 }
 0x4ba   : > { %v3514_v51 = vsel %vm3485_vm1, %v3481_v44, %v4726_v45  ;;  %v3515_v4 = vsel %vm3485_vm1, %v3482_v22, %v4727_v54 }
 0x4bb   : > { %v4019_v62 = vpack.c.bf16 %v3515_v4, %v3514_v51  ;;  %v4750_v48 = vpop.permute.xlu1 %4749  ;;  %v4735_v31 = vpop.permute.xlu0 %4734  ;;  %v3303_v51 = vsel %vm1518_vm9, %v3271_v1, %v4271_v56  ;;  %v3304_v4 = vsel %vm1518_vm9, %v3272_v16, %v4272_v13 }
 0x4bc   : > { %v4737_v49 = vunpack.i.h.bf16 %v4735_v31  ;;  %v4736_v2 = vunpack.i.l.bf16 %v4735_v31  ;;  %v4752_v37 = vunpack.i.h.bf16 %v4750_v48  ;;  %v4751_v54 = vunpack.i.l.bf16 %v4750_v48 }
 0x4bd   : > { %4021 = vmatprep.subr.msk.bf16.mxu1 %vm7643_vm3, %v4019_v62  ;;  %v3336_v50 = vsel %vm1584_vm11, %v3304_v4, %v4742_v57 }
 0x4be   : > { %4024 = vmatpush3.bf16.xpose.msk.msra.mxu1 %vm7643_vm3, %v4022_v58  ;;  %v3351_v30 = vsel %vm1584_vm11, %v3319_v47, %v4736_v2  ;;  %v3352_v42 = vsel %vm1584_vm11, %v3320_v33, %v4737_v49 }
 0x4bf   : > { %v4760_v17 = vpop.permute.xlu1 %4759  ;;  %v4745_v27 = vpop.permute.xlu0 %4744 }
 0x4c0   : > { %v4747_v20 = vunpack.i.h.bf16 %v4745_v27  ;;  %v4746_v6 = vunpack.i.l.bf16 %v4745_v27  ;;  %v4762_v31 = vunpack.i.h.bf16 %v4760_v17  ;;  %v4761_v61 = vunpack.i.l.bf16 %v4760_v17 }
 0x4c2   : > { %v3384_v46 = vsel %vm3353_vm13, %v3351_v30, %v4746_v6  ;;  %v3385_v52 = vsel %vm3353_vm13, %v3352_v42, %v4747_v20 }
 0x4c3   : > { %v3417_v45 = vsel %vm3386_vm14, %v3384_v46, %v4696_v32  ;;  %v3418_v12 = vsel %vm3386_vm14, %v3385_v52, %v4697_v0  ;;  %v4770_v14 = vpop.permute.xlu1 %4769  ;;  %v4755_v44 = vpop.permute.xlu0 %4754 }
 0x4c4   : > { %v4772_v22 = vunpack.i.h.bf16 %v4770_v14  ;;  %v4771_v21 = vunpack.i.l.bf16 %v4770_v14  ;;  %v3450_v24 = vsel %vm3419_vm15, %v3417_v45, %v4706_v36  ;;  %v3451_v26 = vsel %vm3419_vm15, %v3418_v12, %v4707_v19 }
 0x4c5   : > { %v3483_v32 = vsel %vm3452_vm0, %v3450_v24, %v4716_v9  ;;  %v3484_v38 = vsel %vm3452_vm0, %v3451_v26, %v4717_v40  ;;  %v4757_v0 = vunpack.i.h.bf16 %v4755_v44  ;;  %v4756_v3 = vunpack.i.l.bf16 %v4755_v44 }
 0x4c6   : > { %v3516_v36 = vsel %vm3485_vm1, %v3483_v32, %v4771_v21  ;;  %v3517_v34 = vsel %vm3485_vm1, %v3484_v38, %v4772_v22  ;;  %v3335_v19 = vsel %vm1584_vm11, %v3303_v51, %v4741_v10  ;;  %v3369_v40 = vsel %vm3353_vm13, %v3336_v50, %v4752_v37 }
 0x4c7   : > { %v4025_v43 = vpack.c.bf16 %v3517_v34, %v3516_v36  ;;  %v4765_v9 = vpop.permute.xlu0 %4764  ;;  %v3368_v35 = vsel %vm3353_vm13, %v3335_v19, %v4751_v54  ;;  %v3402_v7 = vsel %vm3386_vm14, %v3369_v40, %v4757_v0 }
 0x4c8   : > { %v3401_v29 = vsel %vm3386_vm14, %v3368_v35, %v4756_v3  ;;  %v4767_v62 = vunpack.i.h.bf16 %v4765_v9  ;;  %v4766_v48 = vunpack.i.l.bf16 %v4765_v9  ;;  %v3435_v58 = vsel %vm3419_vm15, %v3402_v7, %v4762_v31 }
 0x4c9   : > { %4027 = vmatprep.subr.msk.bf16.mxu1 %vm7643_vm3, %v4025_v43  ;;  %v3434_v11 = vsel %vm3419_vm15, %v3401_v29, %v4761_v61 }
 0x4ca   : > { %v3467_v18 = vsel %vm3452_vm0, %v3434_v11, %v4766_v48  ;;  %v3468_v53 = vsel %vm3452_vm0, %v3435_v58, %v4767_v62 }
 0x4cb   : > { %v4775_v5 = vpop.permute.xlu0 %4774 }
 0x4cc   : > { %v4777_v49 = vunpack.i.h.bf16 %v4775_v5  ;;  %v4776_v2 = vunpack.i.l.bf16 %v4775_v5 }
 0x4ce   : > { %v3500_v28 = vsel %vm3485_vm1, %v3467_v18, %v4776_v2  ;;  %v3501_v15 = vsel %vm3485_vm1, %v3468_v53, %v4777_v49 }
 0x4cf   : > { %v4028_v55 = vpack.c.bf16 %v3501_v15, %v3500_v28 }
 0x4d1   : > { %4030 = vmatpush3.bf16.xpose.msk.msra.mxu1 %vm7643_vm3, %v4028_v55 }
 0x4d8   : > { %3916 = vmatmul.mubr.msk.f32.vlgmr.msra.gmra.mrb[0].mxu1 %vm3519_vm2, %v7760_v63 }
 0x5ab   : > { %v3685_v59 = vpop.f32.mrb[0].mxu1 }
 0x5ac   : > { %3690 = vst [vmem:[%s163_s11] sm:$0xff] %v3685_v59  ;;  %v3687_v41 = vpop.f32.mrb[1].mxu1 }
 0x5ad   : > { %3691 = vst [vmem:[%s163_s11 + $0x8] sm:$0xff] %v3687_v41 }
 0x5ae   : > { %4823 = shalt.err (!%p4820_p3)
}
 0x5af   : > { %s4824_s4 = scalar_lea.hbm %s8197_s25, 256  ;;  %s4828_s7 = scalar_lea.hbm %s8240_s3, 512 }
 0x5b0   : > { %p4825_p4 = scmp.ne.s32.totalorder %s8197_s25, %s4824_s4  ;;  %p4829_p9 = scmp.lt.u32.totalorder %s8197_s25, %s8240_s3 }
 0x5b1   : > { %p4830_p10 = scmp.lt.u32.totalorder %s4828_s7, %s4824_s4  ;;  %p4832_p12 = scmp.lt.u32.totalorder %s4824_s4, %s8197_s25 }
 0x5b2   : > { %p4826_p7 = pnand %p4825_p4, %p4946_p5 }
 0x5b3   : > { %p4831_p11 = por %p4830_p10, %p4829_p9 }
 0x5b4   : > { %p4827_p8 = pneg %p4826_p7 }
 0x5b5   : > { %p4833_p13 = por %p4832_p12, %p4831_p11 }
 0x5b7   : > { %p4834_p0 = pnand %p4833_p13, %p4827_p8 }
 0x5b9   : > { %4837 = shalt.err (!%p4834_p0)
}
 0x5ba   : > { %4031 = dma.vmem_to_hbm [thread:$0]  (%p4946_p5), %s8192_s17, 256, %s8197_s25, %s3693_s26  }
 0x5bb PF: > { %p4037_p1 = scmp.ge.s32.totalorder %s4872_s15, 2  ;;  %s3719_s28 = sand.u32 1, %s4860_s12  }
 0x5bc   : > { %s3720_s10 = scalar_lea.sflag [#allocation3], %s3719_s28 }
 0x5bd   : > { %p4034_p2 = pnand %p4037_p1, %p4950_p6 }
 0x5bf   : > { %4855 = dma.done.wait (!%p4034_p2), %s3720_s10, 256  }
 0x5c0   : > { %4857 = vsyncadd (!%p4034_p2), %s3720_s10, 4294967040  ;;  %p13_p3 = scmp.ge.s32.totalorder %s4933_s18, 4   ;;  %s8935_s12 = smov %s4864_s13 }
 0x5c1   : > { %s8936_s13 = smov %s4868_s14  ;;  %s8937_s14 = smov %s4944_s21 }
 0x5c2   : > { %s8938_s15 = smov %s4933_s18  ;;  %15 = sbr.rel (!%p13_p3) target bundleno = 3 (0x3), region = 67 }
 0x5c9   :  { %3725 = vsyncpa [#allocation3], 1 }
 0x5ca   :  { %3727 = vsyncpa [#allocation3 + $0x1], 1 }

</bundles_post_ra>
